<compile_context>
chip_gen: v7x
topology: tpu7x:2x2x1
jax: 0.10.0
libtpu: 0.0.40
codegen_flags: <defaults>
</compile_context>

<pallas_src>
import functools

import jax
import jax.numpy as jnp
from jax import lax
from jax.experimental import pallas as pl
from jax.experimental.pallas import tpu as pltpu

NEG_SLOPE = 0.2
BN_EPS = 1e-5
VMEM_LIMIT = 32 * 1024 * 1024  # fits every generation (v7x scoped default)


# ------------------------------ small helpers ------------------------------ #

def _round_up(n, m):
    return ((n + m - 1) // m) * m


def _pick_row_tile(m, target=512):
    """Largest multiple-of-8 tile <= target that divides m (else m itself)."""
    if m <= target:
        return m
    t = (target // 8) * 8
    while t >= 8:
        if m % t == 0:
            return t
        t -= 8
    return m


def _pick_lane_tile(n, target=512):
    """Largest multiple-of-128 tile <= target that divides n (else n)."""
    if n <= target:
        return n
    t = (target // 128) * 128
    while t >= 128:
        if n % t == 0:
            return t
        t -= 128
    return n


# ------------------------------ Pallas kernels ------------------------------ #

def _linear_lrelu_kernel(x_ref, w_ref, b_ref, o_ref):
    """o = LeakyReLU(x @ w + b); bf16 operands, f32 accumulate/epilogue."""
    y = jnp.dot(x_ref[...], w_ref[...], preferred_element_type=jnp.float32)
    y = y + b_ref[...]
    o_ref[...] = jnp.where(y > 0, y, NEG_SLOPE * y)


def _conv_mm_stats_kernel(x_ref, w_ref, b_ref, y_ref, s_ref):
    """Conv-phase matmul + bias, plus fused per-channel sum / sum-of-squares
    accumulated across the whole (phase, M-tile) grid for BatchNorm."""
    @pl.when(jnp.logical_and(pl.program_id(0) == 0, pl.program_id(1) == 0))
    def _init():
        s_ref[...] = jnp.zeros_like(s_ref)

    y = jnp.dot(x_ref[...], w_ref[...], preferred_element_type=jnp.float32)
    y = y + b_ref[...]
    y_ref[...] = y
    ssum = jnp.sum(y, axis=0, keepdims=True)
    ssq = jnp.sum(y * y, axis=0, keepdims=True)
    s_ref[...] = s_ref[...] + jnp.concatenate([ssum, ssq], axis=0)


def _conv_mm_act_kernel(x_ref, w_ref, b_ref, y_ref, *, act):
    """Conv-phase matmul + bias + fused activation (no BN)."""
    y = jnp.dot(x_ref[...], w_ref[...], preferred_element_type=jnp.float32)
    y = y + b_ref[...]
    if act == "lrelu":
        y = jnp.where(y > 0, y, NEG_SLOPE * y)
    elif act == "tanh":
        y = jnp.tanh(y)
    y_ref[...] = y


def _bn_apply_lrelu_kernel(y_ref, s_ref, t_ref, o_ref):
    """o = LeakyReLU(y * scale + shift) — the thin BN apply pass."""
    v = y_ref[...] * s_ref[...] + t_ref[...]
    o_ref[...] = jnp.where(v > 0, v, NEG_SLOPE * v)


# ------------------------------ Pallas wrappers ----------------------------- #

def linear_lrelu(x, w, b):
    """x:(B,K) f32, w:(K,Nout), b:(Nout,) -> LeakyReLU(x@w+b) f32, (B,Nout)."""
    B, K = x.shape
    n_out = w.shape[1]
    kp = _round_up(K, 128)                       # pad K 100 -> 128
    bp = _round_up(B, 8)                         # round batch up to sublane mult
    xp = jnp.pad(x, ((0, bp - B), (0, kp - K))).astype(jnp.bfloat16)
    wp = jnp.pad(w, ((0, kp - K), (0, 0))).astype(jnp.bfloat16)
    b2 = b.reshape(1, n_out).astype(jnp.float32)

    tn = _pick_lane_tile(n_out, 512)
    grid = (n_out // tn,)
    cost = pl.CostEstimate(
        flops=2 * bp * kp * n_out, transcendentals=0,
        bytes_accessed=xp.size * 2 + wp.size * 2 + bp * n_out * 4 + n_out * 4)

    out = pl.pallas_call(
        _linear_lrelu_kernel,
        out_shape=jax.ShapeDtypeStruct((bp, n_out), jnp.float32),
        grid=grid,
        in_specs=[pl.BlockSpec((bp, kp), lambda j: (0, 0)),
                  pl.BlockSpec((kp, tn), lambda j: (0, j)),
                  pl.BlockSpec((1, tn), lambda j: (0, j))],
        out_specs=pl.BlockSpec((bp, tn), lambda j: (0, j)),
        compiler_params=pltpu.CompilerParams(
            dimension_semantics=("parallel",),
            vmem_limit_bytes=VMEM_LIMIT),
        cost_estimate=cost,
    )(xp, wp, b2)
    return out[:B]


def conv_phase_matmul(xph, wph, bias, *, act=None, with_stats=False):
    """All 4 sub-pixel phases of one ConvT layer in a single pallas_call.

    xph:(4,M,K) bf16, wph:(4,K,Cpad) bf16, bias:(Cpad,) f32.
    Returns y:(4,M,Cpad) f32 and, if with_stats, stats:(2,Cpad) f32
    (row 0 = per-channel sum, row 1 = sum of squares, over all 4*M rows).
    """
    P, M, K = xph.shape
    cpad = wph.shape[2]
    tm = _pick_row_tile(M, 512)                  # bf16 x-tile <= 1 MiB at K=1024
    grid = (P, M // tm)
    b2 = bias.reshape(1, cpad).astype(jnp.float32)

    x_spec = pl.BlockSpec((None, tm, K), lambda p, i: (p, i, 0))
    w_spec = pl.BlockSpec((None, K, cpad), lambda p, i: (p, 0, 0))  # resident/phase
    b_spec = pl.BlockSpec((1, cpad), lambda p, i: (0, 0))
    y_spec = pl.BlockSpec((None, tm, cpad), lambda p, i: (p, i, 0))

    flops = 2 * P * M * K * cpad
    transc = P * M * cpad if act == "tanh" else 0
    bytes_acc = xph.size * 2 + wph.size * 2 + P * M * cpad * 4 + cpad * 4
    cost = pl.CostEstimate(flops=flops, transcendentals=transc,
                           bytes_accessed=bytes_acc)

    if with_stats:
        # Stats accumulator is revisited across both grid axes -> "arbitrary".
        return pl.pallas_call(
            _conv_mm_stats_kernel,
            out_shape=(jax.ShapeDtypeStruct((P, M, cpad), jnp.float32),
                       jax.ShapeDtypeStruct((2, cpad), jnp.float32)),
            grid=grid,
            in_specs=[x_spec, w_spec, b_spec],
            out_specs=(y_spec, pl.BlockSpec((2, cpad), lambda p, i: (0, 0))),
            compiler_params=pltpu.CompilerParams(
                dimension_semantics=("arbitrary", "arbitrary"),
                vmem_limit_bytes=VMEM_LIMIT),
            cost_estimate=cost,
        )(xph, wph, b2)

    return pl.pallas_call(
        functools.partial(_conv_mm_act_kernel, act=act),
        out_shape=jax.ShapeDtypeStruct((P, M, cpad), jnp.float32),
        grid=grid,
        in_specs=[x_spec, w_spec, b_spec],
        out_specs=y_spec,
        compiler_params=pltpu.CompilerParams(
            dimension_semantics=("parallel", "parallel"),
            vmem_limit_bytes=VMEM_LIMIT),
        cost_estimate=cost,
    )(xph, wph, b2)


def bn_apply_lrelu(y, scale, shift):
    """y:(M,C) f32 -> LeakyReLU(y*scale + shift), tiled over rows."""
    M, C = y.shape
    tm = _pick_row_tile(M, 1024)
    grid = (M // tm,)
    return pl.pallas_call(
        _bn_apply_lrelu_kernel,
        out_shape=jax.ShapeDtypeStruct((M, C), jnp.float32),
        grid=grid,
        in_specs=[pl.BlockSpec((tm, C), lambda i: (i, 0)),
                  pl.BlockSpec((1, C), lambda i: (0, 0)),
                  pl.BlockSpec((1, C), lambda i: (0, 0))],
        out_specs=pl.BlockSpec((tm, C), lambda i: (i, 0)),
        compiler_params=pltpu.CompilerParams(
            dimension_semantics=("parallel",),
            vmem_limit_bytes=VMEM_LIMIT),
    )(y, scale.reshape(1, C).astype(jnp.float32),
      shift.reshape(1, C).astype(jnp.float32))


# ------------------- ConvTranspose2d(k4,s2,p1): 4-phase form ----------------- #
# out[2m+ry, 2n+rx, co] = b[co] +
#   sum_{a,b in {0,1}, ci} x_pad[m+ry+a, n+rx+b, ci] * W[ci, co, kh, kw]
# with kh = 3-2a (ry=0) / 2-2a (ry=1), kw = 3-2b (rx=0) / 2-2b (rx=1),
# x_pad = x zero-padded by 1 on each spatial side.

def _phase_patches(h):
    """h:(N,H,W,C) -> (4, N*H*W, 4*C) bf16; phase order p = 2*ry + rx,
    columns ordered (a, b, c) with c fastest."""
    N, H, W, C = h.shape
    hp = jnp.pad(h, ((0, 0), (1, 1), (1, 1), (0, 0))).astype(jnp.bfloat16)
    phases = []
    for ry in (0, 1):
        for rx in (0, 1):
            taps = []
            for a in (0, 1):
                for b in (0, 1):
                    taps.append(hp[:, ry + a:ry + a + H, rx + b:rx + b + W, :])
            xph = jnp.concatenate(taps, axis=-1)            # (N,H,W,4C)
            phases.append(xph.reshape(N * H * W, 4 * C))
    return jnp.stack(phases, axis=0), (N, H, W)


def _phase_weights(wt, cpad):
    """torch ConvTranspose2d weight (Cin,Cout,4,4) -> (4, 4*Cin, Cpad) bf16,
    rows ordered (a, b, cin) to match _phase_patches, Cout zero-padded to Cpad
    for lane-dense MXU output stores."""
    cout = wt.shape[1]
    phases = []
    for ry in (0, 1):
        for rx in (0, 1):
            rows = []
            for a in (0, 1):
                for b in (0, 1):
                    kh = (3 - 2 * a) if ry == 0 else (2 - 2 * a)
                    kw = (3 - 2 * b) if rx == 0 else (2 - 2 * b)
                    rows.append(wt[:, :, kh, kw])           # (Cin, Cout)
            phases.append(jnp.concatenate(rows, axis=0))    # (4*Cin, Cout)
    w = jnp.stack(phases, axis=0)                           # (4, 4*Cin, Cout)
    if cout < cpad:
        w = jnp.pad(w, ((0, 0), (0, 0), (0, cpad - cout)))
    return w.astype(jnp.bfloat16)


def _interleave_phases(yp):
    """(4, N, H, W, C) phase-major (p = 2*ry + rx) -> (N, 2H, 2W, C)."""
    _, N, H, W, C = yp.shape
    y = yp.reshape(2, 2, N, H, W, C)                        # (ry, rx, n, h, w, c)
    y = jnp.transpose(y, (2, 3, 0, 4, 1, 5))                # (n, h, ry, w, rx, c)
    return y.reshape(N, 2 * H, 2 * W, C)


def convT_bn_lrelu(h, wt, bias, gamma, beta):
    """ConvT(k4,s2,p1) + BatchNorm2d (training-mode batch stats) + LeakyReLU."""
    cout = wt.shape[1]
    cpad = _round_up(cout, 128)
    xph, (N, H, W) = _phase_patches(h)
    wph = _phase_weights(wt, cpad)
    bpad = jnp.pad(bias.astype(jnp.float32), (0, cpad - cout))

    y, stats = conv_phase_matmul(xph, wph, bpad, with_stats=True)

    # Per-channel batch statistics (biased variance, as torch BN training mode).
    cnt = float(4 * xph.shape[1])                           # N * 2H * 2W
    mean = stats[0] / cnt
    var = jnp.maximum(stats[1] / cnt - mean * mean, 0.0)
    gp = jnp.pad(gamma.astype(jnp.float32), (0, cpad - cout))
    bp = jnp.pad(beta.astype(jnp.float32), (0, cpad - cout))
    scale = gp * lax.rsqrt(var + BN_EPS)
    shift = bp - mean * scale

    M = xph.shape[1]
    y = bn_apply_lrelu(y.reshape(4 * M, cpad), scale, shift)
    y = y.reshape(4, N, H, W, cpad)[..., :cout]
    return _interleave_phases(y)                            # (N, 2H, 2W, cout)


def convT_tanh(h, wt, bias):
    """ConvT(k4,s2,p1) + Tanh (final layer, no BN)."""
    cout = wt.shape[1]
    cpad = _round_up(cout, 128)
    xph, (N, H, W) = _phase_patches(h)
    wph = _phase_weights(wt, cpad)
    bpad = jnp.pad(bias.astype(jnp.float32), (0, cpad - cout))
    y = conv_phase_matmul(xph, wph, bpad, act="tanh")
    y = y.reshape(4, N, H, W, cpad)[..., :cout]
    return _interleave_phases(y)


# --------------------------------- Generator -------------------------------- #

def init_params(key, in_length=100):
    ks = jax.random.split(key, 8)

    def rnd(k, shape, scale=0.05):
        return scale * jax.random.normal(k, shape, jnp.float32)

    return {
        "lin_w": rnd(ks[0], (in_length, 256 * 4 * 4)),
        "lin_b": rnd(ks[1], (256 * 4 * 4,)),
        "w1": rnd(ks[2], (256, 128, 4, 4)), "b1": rnd(ks[3], (128,)),
        "g1": jnp.ones((128,), jnp.float32), "be1": jnp.zeros((128,), jnp.float32),
        "w2": rnd(ks[4], (128, 64, 4, 4)), "b2": rnd(ks[5], (64,)),
        "g2": jnp.ones((64,), jnp.float32), "be2": jnp.zeros((64,), jnp.float32),
        "w3": rnd(ks[6], (64, 1, 4, 4)), "b3": rnd(ks[7], (1,)),
    }
    # TODO(synk): BatchNorm running_mean/running_var buffer updates (training-time
    # state mutation) are not modeled; only the forward output is reproduced.


def generator_forward(params, x):
    """x: (N, in_length) f32 -> (N, 1, 32, 32) f32 (NCHW, matching PyTorch)."""
    N = x.shape[0]
    h = linear_lrelu(x, params["lin_w"], params["lin_b"])            # (N, 4096)
    # torch reshape (N,256,4,4) then move to channels-last layout:
    h = h.reshape(N, 256, 4, 4).transpose(0, 2, 3, 1)                # (N,4,4,256)

    h = convT_bn_lrelu(h, params["w1"], params["b1"],
                       params["g1"], params["be1"])                  # (N,8,8,128)
    h = convT_bn_lrelu(h, params["w2"], params["b2"],
                       params["g2"], params["be2"])                  # (N,16,16,64)
    h = convT_tanh(h, params["w3"], params["b3"])                    # (N,32,32,1)
    return h.transpose(0, 3, 1, 2)                                   # NCHW


if __name__ == "__main__":
    key = jax.random.PRNGKey(0)
    pkey, xkey = jax.random.split(key)

    in_length = 100
    batch = 2
    params = init_params(pkey, in_length=in_length)
    x = jax.random.normal(xkey, (batch, in_length), jnp.float32)

    fwd = jax.jit(generator_forward)
    out = jax.block_until_ready(fwd(params, x))

    assert out.shape == (batch, 1, 32, 32), out.shape
    assert out.dtype == jnp.float32
    assert bool(jnp.all(jnp.isfinite(out)))
    assert bool(jnp.all(jnp.abs(out) <= 1.0 + 1e-6))   # tanh range

    print("KERNEL_OK")
</pallas_src>

<mosaic_0001>
module attributes {stable_mosaic.version = 11 : i64} {
  func.func @_linear_lrelu_kernel(%arg0: i32, %arg1: memref<8x128xbf16, #tpu.memory_space<vmem>>, %arg2: memref<128x512xbf16, #tpu.memory_space<vmem>>, %arg3: memref<1x512xf32, #tpu.memory_space<vmem>>, %arg4: memref<8x512xf32, #tpu.memory_space<vmem>>) attributes {dimension_semantics = [#tpu.dimension_semantics<parallel>], iteration_bounds = array<i64: 8>, scalar_prefetch = 0 : i64, scratch_operands = 0 : i64, tpu.core_type = #tpu.core_type<tc>, window_params = [{pipeline_mode = #tpu.pipeline_mode<synchronous>, transform_indices = @transform_0, window_bounds = array<i64: 8, 128>}, {transform_indices = @transform_1, window_bounds = array<i64: 128, 512>}, {transform_indices = @transform_2, window_bounds = array<i64: 1, 512>}, {transform_indices = @transform_3, window_bounds = array<i64: 8, 512>}]} {
    %c0 = arith.constant 0 : index
    %c0_0 = arith.constant 0 : index
    %0 = vector.load %arg1[%c0, %c0_0] : memref<8x128xbf16, #tpu.memory_space<vmem>>, vector<8x128xbf16>
    %c0_1 = arith.constant 0 : index
    %c0_2 = arith.constant 0 : index
    %1 = vector.load %arg2[%c0_1, %c0_2] : memref<128x512xbf16, #tpu.memory_space<vmem>>, vector<128x512xbf16>
    %cst = arith.constant dense<0.000000e+00> : vector<8x512xf32>
    %2 = tpu.matmul %0, %1, %cst {dimension_numbers = #tpu.dot_dimension_numbers<[1], [0], [0], [1], [0, 0, 1, 1], [], []>} : vector<8x128xbf16>, vector<128x512xbf16>, vector<8x512xf32> -> vector<8x512xf32>
    %c0_3 = arith.constant 0 : index
    %c0_4 = arith.constant 0 : index
    %3 = vector.load %arg3[%c0_3, %c0_4] : memref<1x512xf32, #tpu.memory_space<vmem>>, vector<1x512xf32>
    %4 = vector.broadcast %3 : vector<1x512xf32> to vector<8x512xf32>
    %5 = arith.addf %2, %4 : vector<8x512xf32>
    %cst_5 = arith.constant 0.000000e+00 : f32
    %6 = vector.broadcast %cst_5 : f32 to vector<8x512xf32>
    %7 = arith.cmpf ogt, %5, %6 : vector<8x512xf32>
    %cst_6 = arith.constant 2.000000e-01 : f32
    %8 = vector.broadcast %cst_6 : f32 to vector<8x512xf32>
    %9 = arith.mulf %8, %5 : vector<8x512xf32>
    %10 = arith.select %7, %5, %9 : vector<8x512xi1>, vector<8x512xf32>
    %c0_7 = arith.constant 0 : index
    %c0_8 = arith.constant 0 : index
    %11 = vector.load %arg4[%c0_7, %c0_8] : memref<8x512xf32, #tpu.memory_space<vmem>>, vector<8x512xf32>
    tpu.vector_store %arg4[%c0_7, %c0_8], %10 {strides = array<i32>} : memref<8x512xf32, #tpu.memory_space<vmem>>, vector<8x512xf32>,
    return
  }
  func.func @transform_0(%arg0: i32) -> (i32, i32) {
    %c0_i32 = arith.constant 0 : i32
    %c0_i32_0 = arith.constant 0 : i32
    %c0_i32_1 = arith.constant 0 : i32
    return %c0_i32, %c0_i32_0 : i32, i32
  }
  func.func @transform_1(%arg0: i32) -> (i32, i32) {
    %c0_i32 = arith.constant 0 : i32
    %c0_i32_0 = arith.constant 0 : i32
    return %c0_i32, %arg0 : i32, i32
  }
  func.func @transform_2(%arg0: i32) -> (i32, i32) {
    %c0_i32 = arith.constant 0 : i32
    %c0_i32_0 = arith.constant 0 : i32
    return %c0_i32, %arg0 : i32, i32
  }
  func.func @transform_3(%arg0: i32) -> (i32, i32) {
    %c0_i32 = arith.constant 0 : i32
    %c0_i32_0 = arith.constant 0 : i32
    return %c0_i32, %arg0 : i32, i32
  }
}

module attributes {stable_mosaic.version = 11 : i64} {
  func.func @_conv_mm_stats_kernel(%arg0: i32, %arg1: i32, %arg2: memref<1x32x1024xbf16, #tpu.memory_space<vmem>>, %arg3: memref<1x1024x128xbf16, #tpu.memory_space<vmem>>, %arg4: memref<1x128xf32, #tpu.memory_space<vmem>>, %arg5: memref<1x32x128xf32, #tpu.memory_space<vmem>>, %arg6: memref<2x128xf32, #tpu.memory_space<vmem>>) attributes {dimension_semantics = [#tpu.dimension_semantics<arbitrary>, #tpu.dimension_semantics<arbitrary>], iteration_bounds = array<i64: 4, 1>, scalar_prefetch = 0 : i64, scratch_operands = 0 : i64, tpu.core_type = #tpu.core_type<tc>, window_params = [{transform_indices = @transform_0, window_bounds = array<i64: 1, 32, 1024>}, {transform_indices = @transform_1, window_bounds = array<i64: 1, 1024, 128>}, {pipeline_mode = #tpu.pipeline_mode<synchronous>, transform_indices = @transform_2, window_bounds = array<i64: 1, 128>}, {transform_indices = @transform_3, window_bounds = array<i64: 1, 32, 128>}, {pipeline_mode = #tpu.pipeline_mode<synchronous>, transform_indices = @transform_4, window_bounds = array<i64: 2, 128>}]} {
    %c0_i32 = arith.constant 0 : i32
    %0 = arith.cmpi eq, %arg0, %c0_i32 : i32
    %c0_i32_0 = arith.constant 0 : i32
    %1 = arith.cmpi eq, %arg1, %c0_i32_0 : i32
    %2 = arith.andi %0, %1 : i1
    %3 = arith.extui %2 : i1 to i32
    %c0_i32_1 = arith.constant 0 : i32
    %4 = arith.cmpi ne, %3, %c0_i32_1 : i32
    scf.if %4 {
      %cst_18 = arith.constant 0.000000e+00 : f32
      %25 = vector.broadcast %cst_18 : f32 to vector<2x128xf32>
      %c0_19 = arith.constant 0 : index
      %c0_20 = arith.constant 0 : index
      %26 = vector.load %arg6[%c0_19, %c0_20] : memref<2x128xf32, #tpu.memory_space<vmem>>, vector<2x128xf32>
      tpu.vector_store %arg6[%c0_19, %c0_20], %25 {strides = array<i32>} : memref<2x128xf32, #tpu.memory_space<vmem>>, vector<2x128xf32>,
    } else {
    }
    %c0 = arith.constant 0 : index
    %c0_2 = arith.constant 0 : index
    %c0_3 = arith.constant 0 : index
    %5 = vector.load %arg2[%c0, %c0_2, %c0_3] : memref<1x32x1024xbf16, #tpu.memory_space<vmem>>, vector<1x32x1024xbf16>
    %6 = vector.shape_cast %5 : vector<1x32x1024xbf16> to vector<32x1024xbf16>
    %c0_4 = arith.constant 0 : index
    %c0_5 = arith.constant 0 : index
    %c0_6 = arith.constant 0 : index
    %7 = vector.load %arg3[%c0_4, %c0_5, %c0_6] : memref<1x1024x128xbf16, #tpu.memory_space<vmem>>, vector<1x1024x128xbf16>
    %8 = vector.shape_cast %7 : vector<1x1024x128xbf16> to vector<1024x128xbf16>
    %cst = arith.constant dense<0.000000e+00> : vector<32x128xf32>
    %9 = tpu.matmul %6, %8, %cst {dimension_numbers = #tpu.dot_dimension_numbers<[1], [0], [0], [1], [0, 0, 1, 1], [], []>} : vector<32x1024xbf16>, vector<1024x128xbf16>, vector<32x128xf32> -> vector<32x128xf32>
    %c0_7 = arith.constant 0 : index
    %c0_8 = arith.constant 0 : index
    %10 = vector.load %arg4[%c0_7, %c0_8] : memref<1x128xf32, #tpu.memory_space<vmem>>, vector<1x128xf32>
    %11 = vector.broadcast %10 : vector<1x128xf32> to vector<32x128xf32>
    %12 = arith.addf %9, %11 : vector<32x128xf32>
    %c0_9 = arith.constant 0 : index
    %c0_10 = arith.constant 0 : index
    %c0_11 = arith.constant 0 : index
    %13 = vector.load %arg5[%c0_9, %c0_10, %c0_11] : memref<1x32x128xf32, #tpu.memory_space<vmem>>, vector<1x32x128xf32>
    %14 = vector.shape_cast %13 : vector<1x32x128xf32> to vector<32x128xf32>
    %15 = vector.shape_cast %12 : vector<32x128xf32> to vector<1x32x128xf32>
    tpu.vector_store %arg5[%c0_9, %c0_10, %c0_11], %15 {strides = array<i32>} : memref<1x32x128xf32, #tpu.memory_space<vmem>>, vector<1x32x128xf32>,
    %cst_12 = arith.constant dense<0.000000e+00> : vector<128xf32>
    %16 = vector.multi_reduction <add>, %12, %cst_12 [0] : vector<32x128xf32> to vector<128xf32>
    %17 = vector.shape_cast %16 : vector<128xf32> to vector<1x128xf32>
    %18 = arith.mulf %12, %12 : vector<32x128xf32>
    %cst_13 = arith.constant dense<0.000000e+00> : vector<128xf32>
    %19 = vector.multi_reduction <add>, %18, %cst_13 [0] : vector<32x128xf32> to vector<128xf32>
    %20 = vector.shape_cast %19 : vector<128xf32> to vector<1x128xf32>
    %c0_14 = arith.constant 0 : index
    %c0_15 = arith.constant 0 : index
    %21 = vector.load %arg6[%c0_14, %c0_15] : memref<2x128xf32, #tpu.memory_space<vmem>>, vector<2x128xf32>
    %22 = tpu.concatenate %17, %20 in 0 : vector<1x128xf32>, vector<1x128xf32> -> vector<2x128xf32>
    %23 = arith.addf %21, %22 : vector<2x128xf32>
    %c0_16 = arith.constant 0 : index
    %c0_17 = arith.constant 0 : index
    %24 = vector.load %arg6[%c0_16, %c0_17] : memref<2x128xf32, #tpu.memory_space<vmem>>, vector<2x128xf32>
    tpu.vector_store %arg6[%c0_16, %c0_17], %23 {strides = array<i32>} : memref<2x128xf32, #tpu.memory_space<vmem>>, vector<2x128xf32>,
    return
  }
  func.func @transform_0(%arg0: i32, %arg1: i32) -> (i32, i32, i32) {
    %c0_i32 = arith.constant 0 : i32
    %c0_i32_0 = arith.constant 0 : i32
    return %arg0, %arg1, %c0_i32 : i32, i32, i32
  }
  func.func @transform_1(%arg0: i32, %arg1: i32) -> (i32, i32, i32) {
    %c0_i32 = arith.constant 0 : i32
    %c0_i32_0 = arith.constant 0 : i32
    %c0_i32_1 = arith.constant 0 : i32
    return %arg0, %c0_i32, %c0_i32_0 : i32, i32, i32
  }
  func.func @transform_2(%arg0: i32, %arg1: i32) -> (i32, i32) {
    %c0_i32 = arith.constant 0 : i32
    %c0_i32_0 = arith.constant 0 : i32
    %c0_i32_1 = arith.constant 0 : i32
    return %c0_i32, %c0_i32_0 : i32, i32
  }
  func.func @transform_3(%arg0: i32, %arg1: i32) -> (i32, i32, i32) {
    %c0_i32 = arith.constant 0 : i32
    %c0_i32_0 = arith.constant 0 : i32
    return %arg0, %arg1, %c0_i32 : i32, i32, i32
  }
  func.func @transform_4(%arg0: i32, %arg1: i32) -> (i32, i32) {
    %c0_i32 = arith.constant 0 : i32
    %c0_i32_0 = arith.constant 0 : i32
    %c0_i32_1 = arith.constant 0 : i32
    return %c0_i32, %c0_i32_0 : i32, i32
  }
}

module attributes {stable_mosaic.version = 11 : i64} {
  func.func @_bn_apply_lrelu_kernel(%arg0: i32, %arg1: memref<128x128xf32, #tpu.memory_space<vmem>>, %arg2: memref<1x128xf32, #tpu.memory_space<vmem>>, %arg3: memref<1x128xf32, #tpu.memory_space<vmem>>, %arg4: memref<128x128xf32, #tpu.memory_space<vmem>>) attributes {dimension_semantics = [#tpu.dimension_semantics<parallel>], iteration_bounds = array<i64: 1>, scalar_prefetch = 0 : i64, scratch_operands = 0 : i64, tpu.core_type = #tpu.core_type<tc>, window_params = [{transform_indices = @transform_0, window_bounds = array<i64: 128, 128>}, {pipeline_mode = #tpu.pipeline_mode<synchronous>, transform_indices = @transform_1, window_bounds = array<i64: 1, 128>}, {pipeline_mode = #tpu.pipeline_mode<synchronous>, transform_indices = @transform_2, window_bounds = array<i64: 1, 128>}, {transform_indices = @transform_3, window_bounds = array<i64: 128, 128>}]} {
    %c0 = arith.constant 0 : index
    %c0_0 = arith.constant 0 : index
    %0 = vector.load %arg1[%c0, %c0_0] : memref<128x128xf32, #tpu.memory_space<vmem>>, vector<128x128xf32>
    %c0_1 = arith.constant 0 : index
    %c0_2 = arith.constant 0 : index
    %1 = vector.load %arg2[%c0_1, %c0_2] : memref<1x128xf32, #tpu.memory_space<vmem>>, vector<1x128xf32>
    %2 = vector.broadcast %1 : vector<1x128xf32> to vector<128x128xf32>
    %3 = arith.mulf %0, %2 : vector<128x128xf32>
    %c0_3 = arith.constant 0 : index
    %c0_4 = arith.constant 0 : index
    %4 = vector.load %arg3[%c0_3, %c0_4] : memref<1x128xf32, #tpu.memory_space<vmem>>, vector<1x128xf32>
    %5 = vector.broadcast %4 : vector<1x128xf32> to vector<128x128xf32>
    %6 = arith.addf %3, %5 : vector<128x128xf32>
    %cst = arith.constant 0.000000e+00 : f32
    %7 = vector.broadcast %cst : f32 to vector<128x128xf32>
    %8 = arith.cmpf ogt, %6, %7 : vector<128x128xf32>
    %cst_5 = arith.constant 2.000000e-01 : f32
    %9 = vector.broadcast %cst_5 : f32 to vector<128x128xf32>
    %10 = arith.mulf %9, %6 : vector<128x128xf32>
    %11 = arith.select %8, %6, %10 : vector<128x128xi1>, vector<128x128xf32>
    %c0_6 = arith.constant 0 : index
    %c0_7 = arith.constant 0 : index
    %12 = vector.load %arg4[%c0_6, %c0_7] : memref<128x128xf32, #tpu.memory_space<vmem>>, vector<128x128xf32>
    tpu.vector_store %arg4[%c0_6, %c0_7], %11 {strides = array<i32>} : memref<128x128xf32, #tpu.memory_space<vmem>>, vector<128x128xf32>,
    return
  }
  func.func @transform_0(%arg0: i32) -> (i32, i32) {
    %c0_i32 = arith.constant 0 : i32
    %c0_i32_0 = arith.constant 0 : i32
    return %arg0, %c0_i32 : i32, i32
  }
  func.func @transform_1(%arg0: i32) -> (i32, i32) {
    %c0_i32 = arith.constant 0 : i32
    %c0_i32_0 = arith.constant 0 : i32
    %c0_i32_1 = arith.constant 0 : i32
    return %c0_i32, %c0_i32_0 : i32, i32
  }
  func.func @transform_2(%arg0: i32) -> (i32, i32) {
    %c0_i32 = arith.constant 0 : i32
    %c0_i32_0 = arith.constant 0 : i32
    %c0_i32_1 = arith.constant 0 : i32
    return %c0_i32, %c0_i32_0 : i32, i32
  }
  func.func @transform_3(%arg0: i32) -> (i32, i32) {
    %c0_i32 = arith.constant 0 : i32
    %c0_i32_0 = arith.constant 0 : i32
    return %arg0, %c0_i32 : i32, i32
  }
}

module attributes {stable_mosaic.version = 11 : i64} {
  func.func @_conv_mm_stats_kernel(%arg0: i32, %arg1: i32, %arg2: memref<1x128x512xbf16, #tpu.memory_space<vmem>>, %arg3: memref<1x512x128xbf16, #tpu.memory_space<vmem>>, %arg4: memref<1x128xf32, #tpu.memory_space<vmem>>, %arg5: memref<1x128x128xf32, #tpu.memory_space<vmem>>, %arg6: memref<2x128xf32, #tpu.memory_space<vmem>>) attributes {dimension_semantics = [#tpu.dimension_semantics<arbitrary>, #tpu.dimension_semantics<arbitrary>], iteration_bounds = array<i64: 4, 1>, scalar_prefetch = 0 : i64, scratch_operands = 0 : i64, tpu.core_type = #tpu.core_type<tc>, window_params = [{transform_indices = @transform_0, window_bounds = array<i64: 1, 128, 512>}, {transform_indices = @transform_1, window_bounds = array<i64: 1, 512, 128>}, {pipeline_mode = #tpu.pipeline_mode<synchronous>, transform_indices = @transform_2, window_bounds = array<i64: 1, 128>}, {transform_indices = @transform_3, window_bounds = array<i64: 1, 128, 128>}, {pipeline_mode = #tpu.pipeline_mode<synchronous>, transform_indices = @transform_4, window_bounds = array<i64: 2, 128>}]} {
    %c0_i32 = arith.constant 0 : i32
    %0 = arith.cmpi eq, %arg0, %c0_i32 : i32
    %c0_i32_0 = arith.constant 0 : i32
    %1 = arith.cmpi eq, %arg1, %c0_i32_0 : i32
    %2 = arith.andi %0, %1 : i1
    %3 = arith.extui %2 : i1 to i32
    %c0_i32_1 = arith.constant 0 : i32
    %4 = arith.cmpi ne, %3, %c0_i32_1 : i32
    scf.if %4 {
      %cst_18 = arith.constant 0.000000e+00 : f32
      %25 = vector.broadcast %cst_18 : f32 to vector<2x128xf32>
      %c0_19 = arith.constant 0 : index
      %c0_20 = arith.constant 0 : index
      %26 = vector.load %arg6[%c0_19, %c0_20] : memref<2x128xf32, #tpu.memory_space<vmem>>, vector<2x128xf32>
      tpu.vector_store %arg6[%c0_19, %c0_20], %25 {strides = array<i32>} : memref<2x128xf32, #tpu.memory_space<vmem>>, vector<2x128xf32>,
    } else {
    }
    %c0 = arith.constant 0 : index
    %c0_2 = arith.constant 0 : index
    %c0_3 = arith.constant 0 : index
    %5 = vector.load %arg2[%c0, %c0_2, %c0_3] : memref<1x128x512xbf16, #tpu.memory_space<vmem>>, vector<1x128x512xbf16>
    %6 = vector.shape_cast %5 : vector<1x128x512xbf16> to vector<128x512xbf16>
    %c0_4 = arith.constant 0 : index
    %c0_5 = arith.constant 0 : index
    %c0_6 = arith.constant 0 : index
    %7 = vector.load %arg3[%c0_4, %c0_5, %c0_6] : memref<1x512x128xbf16, #tpu.memory_space<vmem>>, vector<1x512x128xbf16>
    %8 = vector.shape_cast %7 : vector<1x512x128xbf16> to vector<512x128xbf16>
    %cst = arith.constant dense<0.000000e+00> : vector<128x128xf32>
    %9 = tpu.matmul %6, %8, %cst {dimension_numbers = #tpu.dot_dimension_numbers<[1], [0], [0], [1], [0, 0, 1, 1], [], []>} : vector<128x512xbf16>, vector<512x128xbf16>, vector<128x128xf32> -> vector<128x128xf32>
    %c0_7 = arith.constant 0 : index
    %c0_8 = arith.constant 0 : index
    %10 = vector.load %arg4[%c0_7, %c0_8] : memref<1x128xf32, #tpu.memory_space<vmem>>, vector<1x128xf32>
    %11 = vector.broadcast %10 : vector<1x128xf32> to vector<128x128xf32>
    %12 = arith.addf %9, %11 : vector<128x128xf32>
    %c0_9 = arith.constant 0 : index
    %c0_10 = arith.constant 0 : index
    %c0_11 = arith.constant 0 : index
    %13 = vector.load %arg5[%c0_9, %c0_10, %c0_11] : memref<1x128x128xf32, #tpu.memory_space<vmem>>, vector<1x128x128xf32>
    %14 = vector.shape_cast %13 : vector<1x128x128xf32> to vector<128x128xf32>
    %15 = vector.shape_cast %12 : vector<128x128xf32> to vector<1x128x128xf32>
    tpu.vector_store %arg5[%c0_9, %c0_10, %c0_11], %15 {strides = array<i32>} : memref<1x128x128xf32, #tpu.memory_space<vmem>>, vector<1x128x128xf32>,
    %cst_12 = arith.constant dense<0.000000e+00> : vector<128xf32>
    %16 = vector.multi_reduction <add>, %12, %cst_12 [0] : vector<128x128xf32> to vector<128xf32>
    %17 = vector.shape_cast %16 : vector<128xf32> to vector<1x128xf32>
    %18 = arith.mulf %12, %12 : vector<128x128xf32>
    %cst_13 = arith.constant dense<0.000000e+00> : vector<128xf32>
    %19 = vector.multi_reduction <add>, %18, %cst_13 [0] : vector<128x128xf32> to vector<128xf32>
    %20 = vector.shape_cast %19 : vector<128xf32> to vector<1x128xf32>
    %c0_14 = arith.constant 0 : index
    %c0_15 = arith.constant 0 : index
    %21 = vector.load %arg6[%c0_14, %c0_15] : memref<2x128xf32, #tpu.memory_space<vmem>>, vector<2x128xf32>
    %22 = tpu.concatenate %17, %20 in 0 : vector<1x128xf32>, vector<1x128xf32> -> vector<2x128xf32>
    %23 = arith.addf %21, %22 : vector<2x128xf32>
    %c0_16 = arith.constant 0 : index
    %c0_17 = arith.constant 0 : index
    %24 = vector.load %arg6[%c0_16, %c0_17] : memref<2x128xf32, #tpu.memory_space<vmem>>, vector<2x128xf32>
    tpu.vector_store %arg6[%c0_16, %c0_17], %23 {strides = array<i32>} : memref<2x128xf32, #tpu.memory_space<vmem>>, vector<2x128xf32>,
    return
  }
  func.func @transform_0(%arg0: i32, %arg1: i32) -> (i32, i32, i32) {
    %c0_i32 = arith.constant 0 : i32
    %c0_i32_0 = arith.constant 0 : i32
    return %arg0, %arg1, %c0_i32 : i32, i32, i32
  }
  func.func @transform_1(%arg0: i32, %arg1: i32) -> (i32, i32, i32) {
    %c0_i32 = arith.constant 0 : i32
    %c0_i32_0 = arith.constant 0 : i32
    %c0_i32_1 = arith.constant 0 : i32
    return %arg0, %c0_i32, %c0_i32_0 : i32, i32, i32
  }
  func.func @transform_2(%arg0: i32, %arg1: i32) -> (i32, i32) {
    %c0_i32 = arith.constant 0 : i32
    %c0_i32_0 = arith.constant 0 : i32
    %c0_i32_1 = arith.constant 0 : i32
    return %c0_i32, %c0_i32_0 : i32, i32
  }
  func.func @transform_3(%arg0: i32, %arg1: i32) -> (i32, i32, i32) {
    %c0_i32 = arith.constant 0 : i32
    %c0_i32_0 = arith.constant 0 : i32
    return %arg0, %arg1, %c0_i32 : i32, i32, i32
  }
  func.func @transform_4(%arg0: i32, %arg1: i32) -> (i32, i32) {
    %c0_i32 = arith.constant 0 : i32
    %c0_i32_0 = arith.constant 0 : i32
    %c0_i32_1 = arith.constant 0 : i32
    return %c0_i32, %c0_i32_0 : i32, i32
  }
}

module attributes {stable_mosaic.version = 11 : i64} {
  func.func @_bn_apply_lrelu_kernel(%arg0: i32, %arg1: memref<512x128xf32, #tpu.memory_space<vmem>>, %arg2: memref<1x128xf32, #tpu.memory_space<vmem>>, %arg3: memref<1x128xf32, #tpu.memory_space<vmem>>, %arg4: memref<512x128xf32, #tpu.memory_space<vmem>>) attributes {dimension_semantics = [#tpu.dimension_semantics<parallel>], iteration_bounds = array<i64: 1>, scalar_prefetch = 0 : i64, scratch_operands = 0 : i64, tpu.core_type = #tpu.core_type<tc>, window_params = [{transform_indices = @transform_0, window_bounds = array<i64: 512, 128>}, {pipeline_mode = #tpu.pipeline_mode<synchronous>, transform_indices = @transform_1, window_bounds = array<i64: 1, 128>}, {pipeline_mode = #tpu.pipeline_mode<synchronous>, transform_indices = @transform_2, window_bounds = array<i64: 1, 128>}, {transform_indices = @transform_3, window_bounds = array<i64: 512, 128>}]} {
    %c0 = arith.constant 0 : index
    %c0_0 = arith.constant 0 : index
    %0 = vector.load %arg1[%c0, %c0_0] : memref<512x128xf32, #tpu.memory_space<vmem>>, vector<512x128xf32>
    %c0_1 = arith.constant 0 : index
    %c0_2 = arith.constant 0 : index
    %1 = vector.load %arg2[%c0_1, %c0_2] : memref<1x128xf32, #tpu.memory_space<vmem>>, vector<1x128xf32>
    %2 = vector.broadcast %1 : vector<1x128xf32> to vector<512x128xf32>
    %3 = arith.mulf %0, %2 : vector<512x128xf32>
    %c0_3 = arith.constant 0 : index
    %c0_4 = arith.constant 0 : index
    %4 = vector.load %arg3[%c0_3, %c0_4] : memref<1x128xf32, #tpu.memory_space<vmem>>, vector<1x128xf32>
    %5 = vector.broadcast %4 : vector<1x128xf32> to vector<512x128xf32>
    %6 = arith.addf %3, %5 : vector<512x128xf32>
    %cst = arith.constant 0.000000e+00 : f32
    %7 = vector.broadcast %cst : f32 to vector<512x128xf32>
    %8 = arith.cmpf ogt, %6, %7 : vector<512x128xf32>
    %cst_5 = arith.constant 2.000000e-01 : f32
    %9 = vector.broadcast %cst_5 : f32 to vector<512x128xf32>
    %10 = arith.mulf %9, %6 : vector<512x128xf32>
    %11 = arith.select %8, %6, %10 : vector<512x128xi1>, vector<512x128xf32>
    %c0_6 = arith.constant 0 : index
    %c0_7 = arith.constant 0 : index
    %12 = vector.load %arg4[%c0_6, %c0_7] : memref<512x128xf32, #tpu.memory_space<vmem>>, vector<512x128xf32>
    tpu.vector_store %arg4[%c0_6, %c0_7], %11 {strides = array<i32>} : memref<512x128xf32, #tpu.memory_space<vmem>>, vector<512x128xf32>,
    return
  }
  func.func @transform_0(%arg0: i32) -> (i32, i32) {
    %c0_i32 = arith.constant 0 : i32
    %c0_i32_0 = arith.constant 0 : i32
    return %arg0, %c0_i32 : i32, i32
  }
  func.func @transform_1(%arg0: i32) -> (i32, i32) {
    %c0_i32 = arith.constant 0 : i32
    %c0_i32_0 = arith.constant 0 : i32
    %c0_i32_1 = arith.constant 0 : i32
    return %c0_i32, %c0_i32_0 : i32, i32
  }
  func.func @transform_2(%arg0: i32) -> (i32, i32) {
    %c0_i32 = arith.constant 0 : i32
    %c0_i32_0 = arith.constant 0 : i32
    %c0_i32_1 = arith.constant 0 : i32
    return %c0_i32, %c0_i32_0 : i32, i32
  }
  func.func @transform_3(%arg0: i32) -> (i32, i32) {
    %c0_i32 = arith.constant 0 : i32
    %c0_i32_0 = arith.constant 0 : i32
    return %arg0, %c0_i32 : i32, i32
  }
}

module attributes {stable_mosaic.version = 11 : i64} {
  func.func @_conv_mm_act_kernel(%arg0: i32, %arg1: i32, %arg2: memref<1x512x256xbf16, #tpu.memory_space<vmem>>, %arg3: memref<1x256x128xbf16, #tpu.memory_space<vmem>>, %arg4: memref<1x128xf32, #tpu.memory_space<vmem>>, %arg5: memref<1x512x128xf32, #tpu.memory_space<vmem>>) attributes {dimension_semantics = [#tpu.dimension_semantics<parallel>, #tpu.dimension_semantics<parallel>], iteration_bounds = array<i64: 4, 1>, scalar_prefetch = 0 : i64, scratch_operands = 0 : i64, tpu.core_type = #tpu.core_type<tc>, window_params = [{transform_indices = @transform_0, window_bounds = array<i64: 1, 512, 256>}, {transform_indices = @transform_1, window_bounds = array<i64: 1, 256, 128>}, {pipeline_mode = #tpu.pipeline_mode<synchronous>, transform_indices = @transform_2, window_bounds = array<i64: 1, 128>}, {transform_indices = @transform_3, window_bounds = array<i64: 1, 512, 128>}]} {
    %c0 = arith.constant 0 : index
    %c0_0 = arith.constant 0 : index
    %c0_1 = arith.constant 0 : index
    %0 = vector.load %arg2[%c0, %c0_0, %c0_1] : memref<1x512x256xbf16, #tpu.memory_space<vmem>>, vector<1x512x256xbf16>
    %1 = vector.shape_cast %0 : vector<1x512x256xbf16> to vector<512x256xbf16>
    %c0_2 = arith.constant 0 : index
    %c0_3 = arith.constant 0 : index
    %c0_4 = arith.constant 0 : index
    %2 = vector.load %arg3[%c0_2, %c0_3, %c0_4] : memref<1x256x128xbf16, #tpu.memory_space<vmem>>, vector<1x256x128xbf16>
    %3 = vector.shape_cast %2 : vector<1x256x128xbf16> to vector<256x128xbf16>
    %cst = arith.constant dense<0.000000e+00> : vector<512x128xf32>
    %4 = tpu.matmul %1, %3, %cst {dimension_numbers = #tpu.dot_dimension_numbers<[1], [0], [0], [1], [0, 0, 1, 1], [], []>} : vector<512x256xbf16>, vector<256x128xbf16>, vector<512x128xf32> -> vector<512x128xf32>
    %c0_5 = arith.constant 0 : index
    %c0_6 = arith.constant 0 : index
    %5 = vector.load %arg4[%c0_5, %c0_6] : memref<1x128xf32, #tpu.memory_space<vmem>>, vector<1x128xf32>
    %6 = vector.broadcast %5 : vector<1x128xf32> to vector<512x128xf32>
    %7 = arith.addf %4, %6 : vector<512x128xf32>
    %8 = math.tanh %7 : vector<512x128xf32>
    %c0_7 = arith.constant 0 : index
    %c0_8 = arith.constant 0 : index
    %c0_9 = arith.constant 0 : index
    %9 = vector.load %arg5[%c0_7, %c0_8, %c0_9] : memref<1x512x128xf32, #tpu.memory_space<vmem>>, vector<1x512x128xf32>
    %10 = vector.shape_cast %9 : vector<1x512x128xf32> to vector<512x128xf32>
    %11 = vector.shape_cast %8 : vector<512x128xf32> to vector<1x512x128xf32>
    tpu.vector_store %arg5[%c0_7, %c0_8, %c0_9], %11 {strides = array<i32>} : memref<1x512x128xf32, #tpu.memory_space<vmem>>, vector<1x512x128xf32>,
    return
  }
  func.func @transform_0(%arg0: i32, %arg1: i32) -> (i32, i32, i32) {
    %c0_i32 = arith.constant 0 : i32
    %c0_i32_0 = arith.constant 0 : i32
    return %arg0, %arg1, %c0_i32 : i32, i32, i32
  }
  func.func @transform_1(%arg0: i32, %arg1: i32) -> (i32, i32, i32) {
    %c0_i32 = arith.constant 0 : i32
    %c0_i32_0 = arith.constant 0 : i32
    %c0_i32_1 = arith.constant 0 : i32
    return %arg0, %c0_i32, %c0_i32_0 : i32, i32, i32
  }
  func.func @transform_2(%arg0: i32, %arg1: i32) -> (i32, i32) {
    %c0_i32 = arith.constant 0 : i32
    %c0_i32_0 = arith.constant 0 : i32
    %c0_i32_1 = arith.constant 0 : i32
    return %c0_i32, %c0_i32_0 : i32, i32
  }
  func.func @transform_3(%arg0: i32, %arg1: i32) -> (i32, i32, i32) {
    %c0_i32 = arith.constant 0 : i32
    %c0_i32_0 = arith.constant 0 : i32
    return %arg0, %arg1, %c0_i32 : i32, i32, i32
  }
}

</mosaic_0001>

<bundles_post_ra>
// kernel: generator_forward.6
= control target key start
LH: loop header
LB: loop body
LE: loop exit
PB: predicated region body
PF: predicated region fallthrough
CT: control target
= control target key end

     0   :  { %s824_s12 = smov 0   ;;  %s826_s13 = smov 0   ;;  %s984_s0 = inlined_call_operand.vmem [shape: bf16[8,128], index: 0, kind: input, shape index: {}]   ;;  %s985_s1 = inlined_call_operand.vmem [shape: bf16[128,4096], index: 1, kind: input, shape index: {}]   ;;  %s986_s2 = inlined_call_operand.vmem [shape: f32[1,4096], index: 2, kind: input, shape index: {}]   ;;  %s987_s3 = inlined_call_operand.vmem [shape: f32[8,4096], index: 3, kind: output, shape index: {}]  }
   0x1   :  { %s828_s14 = smov 0  }
   0x2 LB: > { %s659_s15 = sadd.s32 4294967295, %s801_s14   ;;  %s841_s16 = sadd.s32 1, %s801_s14   ;;  %s801_s14 = sphi %s828_s14, %s990_s14   ;;  %s797_s13 = sphi %s826_s13, %s989_s13   ;;  %s793_s12 = sphi %s824_s12, %s988_s12  }
   0x3   : > { %s38_s17 = ssub.s32 %s801_s14, %s841_s16  ;;  %s41_s18 = sadd.s32 1, %s797_s13 }
   0x4   : > { %p39_p0 = scmp.eq.s32.totalorder %s38_s17, 0  ;;  %p48_p1 = scmp.ne.s32.totalorder %s797_s13, %s793_s12 }
   0x5   : > { %p49_p2 = scmp.eq.s32.totalorder %s801_s14, 0  ;;  %p662_p4 = scmp.ge.s32.totalorder %s801_s14, 8 }
   0x6   : > { %s850_s19 = scalar_select %p39_p0, %s797_s13, %s41_s18  }
   0x7   : > { %p50_p3 = por %p49_p2, %p48_p1  ;;  %129 = sbr.rel (%p662_p4) target bundleno = 34 (0x22), region = 20 }
   0xe   : > { %132 = sbr.rel (!%p50_p3) target bundleno = 34 (0x22), region = 24  ;;  %s134_s20 = sand.u32 (%p50_p3), 1, %s797_s13  }
   0xf   : > { %s705_s21 = sshll.u32 (%p50_p3), %s801_s14, 4  ;;  %s663_s22 = sshll.u32 (%p50_p3), %s134_s20, 8 }
  0x10   : > { %s858_s25 = scalar_lea.vmem (%p50_p3), %s985_s1, %s705_s21  ;;  %s863_s26 = scalar_lea.vmem (%p50_p3), [#allocation2], %s663_s22 }
  0x11   : > { %v152_v0 = vld [vmem:[%s858_s25] sm:$0xff] (%p50_p3)  ;;  %v154_v1 = vld [vmem:[%s858_s25 + $0x8] sm:$0xff] (%p50_p3) }
  0x12   : > { %v156_v2 = vld [vmem:[%s858_s25 + $0x80] sm:$0xff] (%p50_p3)  ;;  %153 = vst [vmem:[%s863_s26] sm:$0xff] (%p50_p3), %v152_v0  ;;  %155 = vst [vmem:[%s863_s26 + $0x8] sm:$0xff] (%p50_p3), %v154_v1  ;;  %v158_v3 = vld [vmem:[%s858_s25 + $0x88] sm:$0xff] (%p50_p3) }
  0x13   : > { %157 = vst [vmem:[%s863_s26 + $0x10] sm:$0xff] (%p50_p3), %v156_v2  ;;  %v160_v4 = vld [vmem:[%s858_s25 + $0x100] sm:$0xff] (%p50_p3)  ;;  %v162_v5 = vld [vmem:[%s858_s25 + $0x108] sm:$0xff] (%p50_p3)  ;;  %159 = vst [vmem:[%s863_s26 + $0x18] sm:$0xff] (%p50_p3), %v158_v3 }
  0x14   : > { %161 = vst [vmem:[%s863_s26 + $0x20] sm:$0xff] (%p50_p3), %v160_v4  ;;  %163 = vst [vmem:[%s863_s26 + $0x28] sm:$0xff] (%p50_p3), %v162_v5  ;;  %v164_v6 = vld [vmem:[%s858_s25 + $0x180] sm:$0xff] (%p50_p3)  ;;  %v166_v7 = vld [vmem:[%s858_s25 + $0x188] sm:$0xff] (%p50_p3) }
  0x15   : > { %v168_v8 = vld [vmem:[%s858_s25 + $0x200] sm:$0xff]  ;;  %165 = vst [vmem:[%s863_s26 + $0x30] sm:$0xff] %v164_v6  ;;  %167 = vst [vmem:[%s863_s26 + $0x38] sm:$0xff] %v166_v7  ;;  %v170_v9 = vld [vmem:[%s858_s25 + $0x208] sm:$0xff] }
  0x16   : > { %169 = vst [vmem:[%s863_s26 + $0x40] sm:$0xff] %v168_v8  ;;  %v172_v10 = vld [vmem:[%s858_s25 + $0x280] sm:$0xff]  ;;  %v174_v11 = vld [vmem:[%s858_s25 + $0x288] sm:$0xff]  ;;  %171 = vst [vmem:[%s863_s26 + $0x48] sm:$0xff] %v170_v9 }
  0x17   : > { %173 = vst [vmem:[%s863_s26 + $0x50] sm:$0xff] %v172_v10  ;;  %175 = vst [vmem:[%s863_s26 + $0x58] sm:$0xff] %v174_v11  ;;  %v176_v12 = vld [vmem:[%s858_s25 + $0x300] sm:$0xff]  ;;  %v178_v13 = vld [vmem:[%s858_s25 + $0x308] sm:$0xff] }
  0x18   : > { %v180_v14 = vld [vmem:[%s858_s25 + $0x380] sm:$0xff]  ;;  %177 = vst [vmem:[%s863_s26 + $0x60] sm:$0xff] %v176_v12  ;;  %179 = vst [vmem:[%s863_s26 + $0x68] sm:$0xff] %v178_v13  ;;  %v182_v15 = vld [vmem:[%s858_s25 + $0x388] sm:$0xff] }
  0x19   : > { %181 = vst [vmem:[%s863_s26 + $0x70] sm:$0xff] %v180_v14  ;;  %v184_v16 = vld [vmem:[%s858_s25 + $0x400] sm:$0xff]  ;;  %v186_v17 = vld [vmem:[%s858_s25 + $0x408] sm:$0xff]  ;;  %183 = vst [vmem:[%s863_s26 + $0x78] sm:$0xff] %v182_v15 }
  0x1a   : > { %185 = vst [vmem:[%s863_s26 + $0x80] sm:$0xff] %v184_v16  ;;  %187 = vst [vmem:[%s863_s26 + $0x88] sm:$0xff] %v186_v17  ;;  %v188_v18 = vld [vmem:[%s858_s25 + $0x480] sm:$0xff]  ;;  %v190_v19 = vld [vmem:[%s858_s25 + $0x488] sm:$0xff] }
  0x1b   : > { %v192_v20 = vld [vmem:[%s858_s25 + $0x500] sm:$0xff]  ;;  %189 = vst [vmem:[%s863_s26 + $0x90] sm:$0xff] %v188_v18  ;;  %191 = vst [vmem:[%s863_s26 + $0x98] sm:$0xff] %v190_v19  ;;  %v194_v21 = vld [vmem:[%s858_s25 + $0x508] sm:$0xff] }
  0x1c   : > { %193 = vst [vmem:[%s863_s26 + $0xa0] sm:$0xff] %v192_v20  ;;  %v196_v22 = vld [vmem:[%s858_s25 + $0x580] sm:$0xff]  ;;  %v198_v23 = vld [vmem:[%s858_s25 + $0x588] sm:$0xff]  ;;  %195 = vst [vmem:[%s863_s26 + $0xa8] sm:$0xff] %v194_v21 }
  0x1d   : > { %197 = vst [vmem:[%s863_s26 + $0xb0] sm:$0xff] %v196_v22  ;;  %199 = vst [vmem:[%s863_s26 + $0xb8] sm:$0xff] %v198_v23  ;;  %v200_v24 = vld [vmem:[%s858_s25 + $0x600] sm:$0xff]  ;;  %v202_v25 = vld [vmem:[%s858_s25 + $0x608] sm:$0xff] }
  0x1e   : > { %v204_v26 = vld [vmem:[%s858_s25 + $0x680] sm:$0xff]  ;;  %201 = vst [vmem:[%s863_s26 + $0xc0] sm:$0xff] %v200_v24  ;;  %203 = vst [vmem:[%s863_s26 + $0xc8] sm:$0xff] %v202_v25  ;;  %v206_v27 = vld [vmem:[%s858_s25 + $0x688] sm:$0xff] }
  0x1f   : > { %205 = vst [vmem:[%s863_s26 + $0xd0] sm:$0xff] %v204_v26  ;;  %v208_v28 = vld [vmem:[%s858_s25 + $0x700] sm:$0xff]  ;;  %v210_v29 = vld [vmem:[%s858_s25 + $0x708] sm:$0xff]  ;;  %207 = vst [vmem:[%s863_s26 + $0xd8] sm:$0xff] %v206_v27 }
  0x20   : > { %209 = vst [vmem:[%s863_s26 + $0xe0] sm:$0xff] %v208_v28  ;;  %211 = vst [vmem:[%s863_s26 + $0xe8] sm:$0xff] %v210_v29  ;;  %v212_v30 = vld [vmem:[%s858_s25 + $0x780] sm:$0xff]  ;;  %v214_v31 = vld [vmem:[%s858_s25 + $0x788] sm:$0xff] }
  0x21   : > { %213 = vst [vmem:[%s863_s26 + $0xf0] sm:$0xff] %v212_v30  ;;  %215 = vst [vmem:[%s863_s26 + $0xf8] sm:$0xff] %v214_v31 }
  0x22 PF: > { %p666_p5 = scmp.ge.s32.totalorder %s801_s14, 1  ;;  %p228_p6 = scmp.lt.s32.totalorder %s801_s14, 9 }
  0x24   : > { %p229_p7 = pnand %p666_p5, %p228_p6 }
  0x25   : > { %s235_s27 = sand.u32 (!%p229_p7), 1, %s793_s12   ;;  %v803_v32 = vmov (!%p229_p7), 0   ;;  %v275_v1 = vld [vmem:[%s984_s0] sm:$0xf] (!%p229_p7)  ;;  %s668_s5 = sshll.u32 (!%p229_p7), %s659_s15, 2  ;;  %v310_v2 = vlaneseq (!%p229_p7) }
  0x26   : > { %232 = sbr.rel (%p229_p7) target bundleno = 292 (0x124), region = 51  ;;  %s667_s28 = sshll.u32 (!%p229_p7), %s235_s27, 8  ;;  %522 = vmatprep.mubr.bf16.mxu0 (!%p229_p7), %v803_v32  ;;  %563 = vmatprep.mubr.bf16.mxu1 (!%p229_p7), %v803_v32 }
  0x27   : > { %s929_s29 = scalar_lea.vmem (!%p229_p7), [#allocation2], %s667_s28  ;;  %p264_p8 = scmp.lt.s32.totalorder (!%p229_p7), %s668_s5, 31  ;;  %v311_v3 = vshrl.u32 (!%p229_p7), %v310_v2, 7 }
  0x28   : > { %v731_v33 = vld [vmem:[%s929_s29 + $0x4] ss:$16 sps:$4 sm:$0xff] (!%p229_p7)   ;;  %v733_v34 = vld [vmem:[%s929_s29 + $0xc] ss:$16 sps:$4 sm:$0xff] (!%p229_p7)   ;;  %v735_v35 = vld [vmem:[%s929_s29] ss:$16 sps:$4 sm:$0xff] (!%p229_p7)  }
  0x29   : > { %490 = vmatprep.subr.bf16.mxu0 (!%p229_p7), %v731_v33  ;;  %v736_v36 = vld [vmem:[%s929_s29 + $0x8] ss:$16 sps:$4 sm:$0xff] (!%p229_p7)   ;;  %531 = vmatprep.subr.bf16.mxu1 (!%p229_p7), %v733_v34  ;;  %v737_v37 = vld [vmem:[%s929_s29 + $0x24] ss:$16 sps:$4 sm:$0xff] (!%p229_p7)   ;;  %v739_v38 = vld [vmem:[%s929_s29 + $0x2c] ss:$16 sps:$4 sm:$0xff] (!%p229_p7)  }
  0x2a   : > { %491 = vmatpush1.bf16.msra.mxu0 (!%p229_p7), %v735_v35  ;;  %532 = vmatpush1.bf16.msra.mxu1 (!%p229_p7), %v736_v36  ;;  %v741_v39 = vld [vmem:[%s929_s29 + $0x20] ss:$16 sps:$4 sm:$0xff] (!%p229_p7)   ;;  %v742_v40 = vld [vmem:[%s929_s29 + $0x28] ss:$16 sps:$4 sm:$0xff] (!%p229_p7)   ;;  %v743_v41 = vld [vmem:[%s929_s29 + $0x44] ss:$16 sps:$4 sm:$0xff] (!%p229_p7)  }
  0x2b   : > { %492 = vmatprep.subr.bf16.mxu0 (!%p229_p7), %v737_v37  ;;  %533 = vmatprep.subr.bf16.mxu1 (!%p229_p7), %v739_v38  ;;  %v745_v42 = vld [vmem:[%s929_s29 + $0x4c] ss:$16 sps:$4 sm:$0xff] (!%p229_p7)   ;;  %v747_v43 = vld [vmem:[%s929_s29 + $0x40] ss:$16 sps:$4 sm:$0xff] (!%p229_p7)   ;;  %v748_v44 = vld [vmem:[%s929_s29 + $0x48] ss:$16 sps:$4 sm:$0xff] (!%p229_p7)  }
  0x2c   : > { %v749_v45 = vld [vmem:[%s929_s29 + $0x64] ss:$16 sps:$4 sm:$0xff] (!%p229_p7)   ;;  %v751_v46 = vld [vmem:[%s929_s29 + $0x6c] ss:$16 sps:$4 sm:$0xff] (!%p229_p7)   ;;  %v753_v47 = vld [vmem:[%s929_s29 + $0x60] ss:$16 sps:$4 sm:$0xff] (!%p229_p7)  }
  0x2d   : > { %v754_v48 = vld [vmem:[%s929_s29 + $0x68] ss:$16 sps:$4 sm:$0xff]   ;;  %v755_v49 = vld [vmem:[%s929_s29 + $0x84] ss:$16 sps:$4 sm:$0xff]   ;;  %v757_v50 = vld [vmem:[%s929_s29 + $0x8c] ss:$16 sps:$4 sm:$0xff]  }
  0x2e   : > { %493 = vmatpush1.bf16.msra.mxu0 %v741_v39  ;;  %534 = vmatpush1.bf16.msra.mxu1 %v742_v40  ;;  %v759_v51 = vld [vmem:[%s929_s29 + $0x80] ss:$16 sps:$4 sm:$0xff]   ;;  %v760_v52 = vld [vmem:[%s929_s29 + $0x88] ss:$16 sps:$4 sm:$0xff]   ;;  %v761_v53 = vld [vmem:[%s929_s29 + $0xa4] ss:$16 sps:$4 sm:$0xff]  }
  0x2f   : > { %494 = vmatprep.subr.bf16.mxu0 %v743_v41  ;;  %535 = vmatprep.subr.bf16.mxu1 %v745_v42  ;;  %v763_v54 = vld [vmem:[%s929_s29 + $0xac] ss:$16 sps:$4 sm:$0xff]   ;;  %v765_v55 = vld [vmem:[%s929_s29 + $0xa0] ss:$16 sps:$4 sm:$0xff]   ;;  %v766_v56 = vld [vmem:[%s929_s29 + $0xa8] ss:$16 sps:$4 sm:$0xff]  }
  0x30   : > { %v767_v57 = vld [vmem:[%s929_s29 + $0xc4] ss:$16 sps:$4 sm:$0xff]   ;;  %v769_v58 = vld [vmem:[%s929_s29 + $0xcc] ss:$16 sps:$4 sm:$0xff]   ;;  %v771_v59 = vld [vmem:[%s929_s29 + $0xc0] ss:$16 sps:$4 sm:$0xff]  }
  0x31   : > { %v772_v60 = vld [vmem:[%s929_s29 + $0xc8] ss:$16 sps:$4 sm:$0xff]   ;;  %v773_v61 = vld [vmem:[%s929_s29 + $0xe4] ss:$16 sps:$4 sm:$0xff]   ;;  %v775_v62 = vld [vmem:[%s929_s29 + $0xec] ss:$16 sps:$4 sm:$0xff]  }
  0x32   : > { %495 = vmatpush1.bf16.msra.mxu0 %v747_v43  ;;  %536 = vmatpush1.bf16.msra.mxu1 %v748_v44  ;;  %v777_v63 = vld [vmem:[%s929_s29 + $0xe0] ss:$16 sps:$4 sm:$0xff]   ;;  %v778_v0 = vld [vmem:[%s929_s29 + $0xe8] ss:$16 sps:$4 sm:$0xff]   ;;  %s992_s5 = smov (!%p264_p8, %s668_s5), 31  ;;  %v312_v4 = vsub.s32 0, %v311_v3 }
  0x33   : > { %496 = vmatprep.subr.bf16.mxu0 %v749_v45  ;;  %537 = vmatprep.subr.bf16.mxu1 %v751_v46  ;;  %s266_s8 = scalar_lea.vmem %s986_s2, %s992_s5  ;;  %v320_v5 = vsub.s32 2, %v311_v3  ;;  %v316_v7 = vsub.s32 1, %v311_v3  ;;  %v324_v8 = vsub.s32 3, %v311_v3  ;;  %s670_s9 = sshll.u32 %s992_s5, 3 }
  0x34   : > { %v308_v6 = vld [vmem:[%s266_s8] sm:$0xf]  ;;  %s272_s12 = scalar_lea.vmem %s987_s3, %s670_s9 }
  0x35   : > { %v313_v9 = vrot.slane %v308_v6, %v312_v4  ;;  %v321_v10 = vrot.slane %v308_v6, %v320_v5  ;;  %v317_v11 = vrot.slane %v308_v6, %v316_v7  ;;  %v325_v12 = vrot.slane %v308_v6, %v324_v8 }
  0x36   : > { %497 = vmatpush1.bf16.msra.mxu0 %v753_v47  ;;  %538 = vmatpush1.bf16.msra.mxu1 %v754_v48 }
  0x37   : > { %498 = vmatprep.subr.bf16.mxu0 %v755_v49  ;;  %539 = vmatprep.subr.bf16.mxu1 %v757_v50 }
  0x3a   : > { %499 = vmatpush1.bf16.msra.mxu0 %v759_v51  ;;  %540 = vmatpush1.bf16.msra.mxu1 %v760_v52 }
  0x3b   : > { %500 = vmatprep.subr.bf16.mxu0 %v761_v53  ;;  %541 = vmatprep.subr.bf16.mxu1 %v763_v54 }
  0x3e   : > { %501 = vmatpush1.bf16.msra.mxu0 %v765_v55  ;;  %542 = vmatpush1.bf16.msra.mxu1 %v766_v56 }
  0x3f   : > { %502 = vmatprep.subr.bf16.mxu0 %v767_v57  ;;  %543 = vmatprep.subr.bf16.mxu1 %v769_v58 }
  0x42   : > { %503 = vmatpush1.bf16.msra.mxu0 %v771_v59  ;;  %544 = vmatpush1.bf16.msra.mxu1 %v772_v60 }
  0x43   : > { %504 = vmatprep.subr.bf16.mxu0 %v773_v61  ;;  %545 = vmatprep.subr.bf16.mxu1 %v775_v62 }
  0x46   : > { %505 = vmatpush1.bf16.msra.mxu0 %v777_v63  ;;  %546 = vmatpush1.bf16.msra.mxu1 %v778_v0 }
  0x49   : > { %523 = vmatmul.mubr.bf16.vlgmr.msra.gmra.mrb[0].mxu0 %v275_v1  ;;  %564 = vmatmul.mubr.bf16.vlgmr.msra.gmra.mrb[0].mxu1 %v275_v1 }
 0x11c   : > { %v524_v13 = vpop.f32.mrb[0].mxu0  ;;  %v565_v14 = vpop.f32.mrb[0].mxu1 }
 0x11d   : > { %v525_v15 = vadd.f32 %v524_v13, %v313_v9  ;;  %v566_v16 = vadd.f32 %v565_v14, %v321_v10  ;;  %v526_v17 = vpop.f32.mrb[1].mxu0  ;;  %v567_v18 = vpop.f32.mrb[1].mxu1 }
 0x11e   : > { %v527_v19 = vadd.f32 %v526_v17, %v317_v11  ;;  %v568_v20 = vadd.f32 %v567_v18, %v325_v12  ;;  %v528_v21 = vpop.f32.mrb[2].mxu0  ;;  %v569_v22 = vpop.f32.mrb[2].mxu1 }
 0x11f   : > { %vm572_vm0 = vcmp.gt.f32.partialorder %v525_v15, 0.0  ;;  %v576_v23 = vmul.f32 0.2, %v525_v15  ;;  %vm574_vm1 = vcmp.gt.f32.partialorder %v566_v16, 0.0  ;;  %v578_v24 = vmul.f32 0.2, %v566_v16 }
 0x120   : > { %vm573_vm2 = vcmp.gt.f32.partialorder %v527_v19, 0.0  ;;  %v577_v25 = vmul.f32 0.2, %v527_v19  ;;  %vm575_vm3 = vcmp.gt.f32.partialorder %v568_v20, 0.0  ;;  %v579_v26 = vmul.f32 0.2, %v568_v20 }
 0x121   : > { %v580_v27 = vsel %vm572_vm0, %v525_v15, %v576_v23  ;;  %v582_v28 = vsel %vm574_vm1, %v566_v16, %v578_v24  ;;  %v529_v29 = vpop.f32.mrb[3].mxu0  ;;  %v570_v30 = vpop.f32.mrb[3].mxu1 }
 0x122   : > { %584 = vst [vmem:[%s272_s12] sm:$0xff] %v580_v27  ;;  %586 = vst [vmem:[%s272_s12 + $0x10] sm:$0xff] %v582_v28  ;;  %v581_v31 = vsel %vm573_vm2, %v527_v19, %v577_v25  ;;  %v583_v32 = vsel %vm575_vm3, %v568_v20, %v579_v26 }
 0x123   : > { %585 = vst [vmem:[%s272_s12 + $0x8] sm:$0xff] %v581_v31  ;;  %587 = vst [vmem:[%s272_s12 + $0x18] sm:$0xff] %v583_v32 }
 0x124 PF: > { %p10_p9 = scmp.ge.s32.totalorder %s841_s16, 10   ;;  %s988_s12 = smov %s797_s13 }
 0x125   : > { %s989_s13 = smov %s850_s19  ;;  %s990_s14 = smov %s841_s16 }
 0x126   :  { %12 = sbr.rel (!%p10_p9) target bundleno = 2 (0x2), region = 93 }

// kernel: generator_forward.7
= control target key start
LH: loop header
LB: loop body
LE: loop exit
PB: predicated region body
PF: predicated region fallthrough
CT: control target
= control target key end

     0   :  { %s1566_s15 = smov 0   ;;  %s1568_s16 = smov 0   ;;  %s1704_s0 = inlined_call_operand.vmem [shape: bf16[4,32,1024], index: 0, kind: input, shape index: {}]   ;;  %s1705_s1 = inlined_call_operand.vmem [shape: bf16[4,1024,128], index: 1, kind: input, shape index: {}]   ;;  %s1706_s2 = inlined_call_operand.vmem [shape: f32[1,128], index: 2, kind: input, shape index: {}]   ;;  %s1707_s3 = inlined_call_operand.vmem [shape: f32[4,32,128], index: 3, kind: output, shape index: {0}]   ;;  %s1708_s4 = inlined_call_operand.vmem [shape: f32[2,128], index: 4, kind: output, shape index: {1}]  }
   0x1   :  { %s1570_s17 = smov 0  }
   0x2 LB: > { %s27_s18 = sadd.s32 1, %s1534_s16  ;;  %p1220_p0 = scmp.ge.s32.totalorder %s1538_s17, 1  ;;  %s1538_s17 = sphi %s1570_s17, %s15_s17   ;;  %s1534_s16 = sphi %s1568_s16, %s1710_s16   ;;  %s1530_s15 = sphi %s1566_s15, %s1709_s15  }
   0x3   : > { %p29_p1 = scmp.ge.s32.totalorder %s27_s18, 4  ;;  %p192_p2 = scmp.lt.s32.totalorder %s1538_s17, 5 }
   0x5   : > { %s1712_s18 = smov (%p29_p1, %s27_s18), 0  ;;  %p193_p3 = pnand %p1220_p0, %p192_p2 }
   0x6   : > { %p233_p4 = scmp.lt.s32.totalorder (!%p193_p3), %s1530_s15, 3  ;;  %p259_p5 = scmp.eq.s32.totalorder (!%p193_p3), %s1530_s15, 0 }
   0x7   : > { %196 = sbr.rel (%p193_p3) target bundleno = 336 (0x150), region = 32 }
   0xe   : > { %s1714_s15 = smov (!%p233_p4, %s1530_s15), 3  ;;  %264 = sbr.rel (!%p259_p5) target bundleno = 21 (0x15), region = 36 }
   0xf   : > { %s1311_s19 = sshll.u32 %s1714_s15, 7  ;;  %s1312_s20 = sshll.u32 %s1714_s15, 9  ;;  %v1540_v0 = vmov (%p259_p5), 0.0  }
  0x10   : > { %s1587_s23 = scalar_lea.vmem %s1704_s0, %s1311_s19  ;;  %s1592_s26 = scalar_lea.vmem %s1705_s1, %s1312_s20  ;;  %265 = vst [vmem:[%s1708_s4] sm:$0x3] (%p259_p5), %v1540_v0 }
  0x11   : > { %s1313_s27 = sshll.u32 %s1714_s15, 5 }
  0x12   : > { %s1597_s30 = scalar_lea.vmem %s1707_s3, %s1313_s27 }
  0x15 PF: > { %v1452_v1 = vld [vmem:[%s1592_s26 + $0x40] sm:$0xff]   ;;  %v1456_v5 = vld [vmem:[%s1592_s26 + $0x48] sm:$0xff]   ;;  %v1460_v9 = vld [vmem:[%s1592_s26 + $0x50] sm:$0xff]   ;;  %vm1104_vm0 = vcmask 1040384  }
  0x16   : > { %v1453_v2 = vld [vmem:[%s1592_s26 + $0xc0] sm:$0xff]   ;;  %1315 = vmatprep.subr.bf16.mxu0 %v1452_v1  ;;  %v1457_v6 = vld [vmem:[%s1592_s26 + $0xc8] sm:$0xff]   ;;  %v1461_v10 = vld [vmem:[%s1592_s26 + $0xd0] sm:$0xff]  }
  0x17   : > { %v1454_v3 = vld [vmem:[%s1592_s26] sm:$0xff]   ;;  %1343 = vmatprep.subr.bf16.mxu1 %v1453_v2  ;;  %v1458_v7 = vld [vmem:[%s1592_s26 + $0x8] sm:$0xff]   ;;  %v1462_v11 = vld [vmem:[%s1592_s26 + $0x10] sm:$0xff]  }
  0x18   : > { %v1455_v4 = vld [vmem:[%s1592_s26 + $0x80] sm:$0xff]   ;;  %1316 = vmatpush3.bf16.msra.mxu0 %v1454_v3  ;;  %v1459_v8 = vld [vmem:[%s1592_s26 + $0x88] sm:$0xff]   ;;  %v1463_v12 = vld [vmem:[%s1592_s26 + $0x90] sm:$0xff]  }
  0x19   : > { %1344 = vmatpush3.bf16.msra.mxu1 %v1455_v4  ;;  %1317 = vmatprep.subr.bf16.mxu0 %v1456_v5  ;;  %v1464_v13 = vld [vmem:[%s1592_s26 + $0x58] sm:$0xff]   ;;  %v1468_v17 = vld [vmem:[%s1592_s26 + $0x60] sm:$0xff]   ;;  %v1472_v21 = vld [vmem:[%s1592_s26 + $0x68] sm:$0xff]  }
  0x1a   : > { %1345 = vmatprep.subr.bf16.mxu1 %v1457_v6  ;;  %v1465_v14 = vld [vmem:[%s1592_s26 + $0xd8] sm:$0xff]   ;;  %v1469_v18 = vld [vmem:[%s1592_s26 + $0xe0] sm:$0xff]   ;;  %v1473_v22 = vld [vmem:[%s1592_s26 + $0xe8] sm:$0xff]  }
  0x1b   : > { %v1466_v15 = vld [vmem:[%s1592_s26 + $0x18] sm:$0xff]   ;;  %v1470_v19 = vld [vmem:[%s1592_s26 + $0x20] sm:$0xff]   ;;  %v1474_v23 = vld [vmem:[%s1592_s26 + $0x28] sm:$0xff]  }
  0x1c   : > { %1318 = vmatpush3.bf16.msra.mxu0 %v1458_v7  ;;  %v1467_v16 = vld [vmem:[%s1592_s26 + $0x98] sm:$0xff]   ;;  %v1471_v20 = vld [vmem:[%s1592_s26 + $0xa0] sm:$0xff]   ;;  %v1475_v24 = vld [vmem:[%s1592_s26 + $0xa8] sm:$0xff]  }
  0x1d   : > { %1346 = vmatpush3.bf16.msra.mxu1 %v1459_v8  ;;  %1319 = vmatprep.subr.bf16.mxu0 %v1460_v9  ;;  %v1476_v25 = vld [vmem:[%s1592_s26 + $0x70] sm:$0xff]   ;;  %v1480_v29 = vld [vmem:[%s1592_s26 + $0x78] sm:$0xff]   ;;  %v266_v33 = vld [vmem:[%s1587_s23] sm:$0xff] }
  0x1e   : > { %1347 = vmatprep.subr.bf16.mxu1 %v1461_v10  ;;  %v1477_v26 = vld [vmem:[%s1592_s26 + $0xf0] sm:$0xff]   ;;  %v1481_v30 = vld [vmem:[%s1592_s26 + $0xf8] sm:$0xff]   ;;  %v270_v34 = vld [vmem:[%s1587_s23 + $0x20] sm:$0xff] }
  0x1f   : > { %v1478_v27 = vld [vmem:[%s1592_s26 + $0x30] sm:$0xff]   ;;  %v1482_v31 = vld [vmem:[%s1592_s26 + $0x38] sm:$0xff]   ;;  %v267_v35 = vld [vmem:[%s1587_s23 + $0x8] sm:$0xff]  ;;  %v1229_v36 = vcombine.low %v266_v33, %v270_v34  ;;  %v1230_v37 = vcombine.high %v266_v33, %v270_v34 }
  0x20   : > { %1320 = vmatpush3.bf16.msra.mxu0 %v1462_v11  ;;  %v1479_v28 = vld [vmem:[%s1592_s26 + $0xb0] sm:$0xff]   ;;  %v1483_v32 = vld [vmem:[%s1592_s26 + $0xb8] sm:$0xff]   ;;  %v271_v38 = vld [vmem:[%s1587_s23 + $0x28] sm:$0xff] }
  0x21   : > { %1348 = vmatpush3.bf16.msra.mxu1 %v1463_v12  ;;  %1321 = vmatprep.subr.bf16.mxu0 %v1464_v13  ;;  %v1231_v39 = vcombine.low %v267_v35, %v271_v38  ;;  %v1232_v40 = vcombine.high %v267_v35, %v271_v38  ;;  %v1484_v41 = vld [vmem:[%s1592_s26 + $0x140] sm:$0xff]   ;;  %v1488_v45 = vld [vmem:[%s1592_s26 + $0x148] sm:$0xff]   ;;  %v1492_v49 = vld [vmem:[%s1592_s26 + $0x150] sm:$0xff]  }
  0x22   : > { %1349 = vmatprep.subr.bf16.mxu1 %v1465_v14  ;;  %913 = vmatprep.mubr.bf16.mxu0 %v1230_v37  ;;  %v1485_v42 = vld [vmem:[%s1592_s26 + $0x1c0] sm:$0xff]   ;;  %v1489_v46 = vld [vmem:[%s1592_s26 + $0x1c8] sm:$0xff]   ;;  %v1493_v50 = vld [vmem:[%s1592_s26 + $0x1d0] sm:$0xff]  }
  0x23   : > { %962 = vmatprep.mubr.bf16.mxu1 %v1232_v40  ;;  %v1486_v43 = vld [vmem:[%s1592_s26 + $0x100] sm:$0xff]   ;;  %v1490_v47 = vld [vmem:[%s1592_s26 + $0x108] sm:$0xff]   ;;  %v1494_v51 = vld [vmem:[%s1592_s26 + $0x110] sm:$0xff]  }
  0x24   : > { %1322 = vmatpush3.bf16.msra.mxu0 %v1466_v15  ;;  %v1487_v44 = vld [vmem:[%s1592_s26 + $0x180] sm:$0xff]   ;;  %v1491_v48 = vld [vmem:[%s1592_s26 + $0x188] sm:$0xff]   ;;  %v1495_v52 = vld [vmem:[%s1592_s26 + $0x190] sm:$0xff]  }
  0x25   : > { %1350 = vmatpush3.bf16.msra.mxu1 %v1467_v16  ;;  %1323 = vmatprep.subr.bf16.mxu0 %v1468_v17  ;;  %v1496_v53 = vld [vmem:[%s1592_s26 + $0x158] sm:$0xff]   ;;  %v1500_v57 = vld [vmem:[%s1592_s26 + $0x160] sm:$0xff]   ;;  %v1504_v0 = vld [vmem:[%s1592_s26 + $0x168] sm:$0xff]  }
  0x26   : > { %1351 = vmatprep.subr.bf16.mxu1 %v1469_v18  ;;  %v1497_v54 = vld [vmem:[%s1592_s26 + $0x1d8] sm:$0xff]   ;;  %v1501_v58 = vld [vmem:[%s1592_s26 + $0x1e0] sm:$0xff]   ;;  %v1505_v2 = vld [vmem:[%s1592_s26 + $0x1e8] sm:$0xff]  }
  0x27   : > { %v1498_v55 = vld [vmem:[%s1592_s26 + $0x118] sm:$0xff]   ;;  %v1502_v59 = vld [vmem:[%s1592_s26 + $0x120] sm:$0xff]   ;;  %v1506_v3 = vld [vmem:[%s1592_s26 + $0x128] sm:$0xff]  }
  0x28   : > { %1324 = vmatpush3.bf16.msra.mxu0 %v1470_v19  ;;  %v1499_v56 = vld [vmem:[%s1592_s26 + $0x198] sm:$0xff]   ;;  %v1503_v60 = vld [vmem:[%s1592_s26 + $0x1a0] sm:$0xff]   ;;  %v1507_v4 = vld [vmem:[%s1592_s26 + $0x1a8] sm:$0xff]  }
  0x29   : > { %1352 = vmatpush3.bf16.msra.mxu1 %v1471_v20  ;;  %1325 = vmatprep.subr.bf16.mxu0 %v1472_v21  ;;  %v274_v61 = vld [vmem:[%s1587_s23 + $0x40] sm:$0xff]  ;;  %v275_v5 = vld [vmem:[%s1587_s23 + $0x48] sm:$0xff]  ;;  %v1508_v9 = vld [vmem:[%s1592_s26 + $0x170] sm:$0xff]  }
  0x2a   : > { %1353 = vmatprep.subr.bf16.mxu1 %v1473_v22  ;;  %v278_v62 = vld [vmem:[%s1587_s23 + $0x60] sm:$0xff]  ;;  %v279_v6 = vld [vmem:[%s1587_s23 + $0x68] sm:$0xff]  ;;  %v1509_v10 = vld [vmem:[%s1592_s26 + $0x1f0] sm:$0xff]  }
  0x2b   : > { %v1238_v63 = vcombine.high %v274_v61, %v278_v62  ;;  %v1237_v1 = vcombine.low %v274_v61, %v278_v62  ;;  %v1240_v7 = vcombine.high %v275_v5, %v279_v6  ;;  %v1239_v8 = vcombine.low %v275_v5, %v279_v6  ;;  %v1510_v11 = vld [vmem:[%s1592_s26 + $0x130] sm:$0xff]   ;;  %v1512_v13 = vld [vmem:[%s1592_s26 + $0x178] sm:$0xff]   ;;  %v1228_v35 = vld [vmem:[%s1706_s2] ss:$0 sm:$0xff] }
  0x2c   : > { %1326 = vmatpush3.bf16.msra.mxu0 %v1474_v23  ;;  %v1511_v12 = vld [vmem:[%s1592_s26 + $0x1b0] sm:$0xff]   ;;  %v1513_v14 = vld [vmem:[%s1592_s26 + $0x1f8] sm:$0xff]  }
  0x2d   : > { %1354 = vmatpush3.bf16.msra.mxu1 %v1475_v24  ;;  %1327 = vmatprep.subr.bf16.mxu0 %v1476_v25  ;;  %v1514_v15 = vld [vmem:[%s1592_s26 + $0x138] sm:$0xff]   ;;  %v268_v17 = vld [vmem:[%s1587_s23 + $0x10] sm:$0xff] }
  0x2e   : > { %1355 = vmatprep.subr.bf16.mxu1 %v1477_v26  ;;  %v1515_v16 = vld [vmem:[%s1592_s26 + $0x1b8] sm:$0xff]   ;;  %v272_v18 = vld [vmem:[%s1587_s23 + $0x30] sm:$0xff] }
  0x2f   : > { %v269_v19 = vld [vmem:[%s1587_s23 + $0x18] sm:$0xff]  ;;  %v1233_v21 = vcombine.low %v268_v17, %v272_v18  ;;  %v1234_v22 = vcombine.high %v268_v17, %v272_v18  ;;  %v276_v25 = vld [vmem:[%s1587_s23 + $0x50] sm:$0xff] }
  0x30   : > { %1328 = vmatpush3.bf16.msra.mxu0 %v1478_v27  ;;  %v273_v20 = vld [vmem:[%s1587_s23 + $0x38] sm:$0xff]  ;;  %v280_v26 = vld [vmem:[%s1587_s23 + $0x70] sm:$0xff] }
  0x31   : > { %1356 = vmatpush3.bf16.msra.mxu1 %v1479_v28  ;;  %1329 = vmatprep.subr.bf16.mxu0 %v1480_v29  ;;  %v1235_v23 = vcombine.low %v269_v19, %v273_v20  ;;  %v1236_v24 = vcombine.high %v269_v19, %v273_v20  ;;  %v277_v27 = vld [vmem:[%s1587_s23 + $0x58] sm:$0xff]  ;;  %v1242_v28 = vcombine.high %v276_v25, %v280_v26 }
  0x32   : > { %1357 = vmatprep.subr.bf16.mxu1 %v1481_v30  ;;  %v281_v29 = vld [vmem:[%s1587_s23 + $0x78] sm:$0xff] }
  0x33   : > { %v1244_v30 = vcombine.high %v277_v27, %v281_v29 }
  0x34   : > { %1330 = vmatpush3.bf16.msra.mxu0 %v1482_v31  ;;  %v1241_v31 = vcombine.low %v276_v25, %v280_v26 }
  0x35   : > { %1358 = vmatpush3.bf16.msra.mxu1 %v1483_v32  ;;  %1371 = vmatprep.subr.bf16.mxu0 %v1484_v41  ;;  %v1243_v32 = vcombine.low %v277_v27, %v281_v29 }
  0x36   : > { %1399 = vmatprep.subr.bf16.mxu1 %v1485_v42 }
  0x37   : > { %914 = vmatmul.mubr.bf16.vlgmr.msra.gmra.mrb[0].mxu0 %v1229_v36 }
  0x38   : > { %963 = vmatmul.mubr.bf16.vlgmr.msra.gmra.mrb[0].mxu1 %v1231_v39  ;;  %1372 = vmatpush3.bf16.msra.mxu0 %v1486_v43 }
  0x39   : > { %1400 = vmatpush3.bf16.msra.mxu1 %v1487_v44  ;;  %1373 = vmatprep.subr.bf16.mxu0 %v1488_v45 }
  0x3a   : > { %1401 = vmatprep.subr.bf16.mxu1 %v1489_v46  ;;  %921 = vmatprep.mubr.bf16.mxu0 %v1238_v63 }
  0x3b   : > { %970 = vmatprep.mubr.bf16.mxu1 %v1240_v7 }
  0x3c   : > { %1374 = vmatpush3.bf16.msra.mxu0 %v1490_v47 }
  0x3d   : > { %1402 = vmatpush3.bf16.msra.mxu1 %v1491_v48  ;;  %1375 = vmatprep.subr.bf16.mxu0 %v1492_v49 }
  0x3e   : > { %1403 = vmatprep.subr.bf16.mxu1 %v1493_v50 }
  0x3f   : > { %922 = vmatmul.mubr.bf16.gmra.mrb[4].mxu0 %v1237_v1 }
  0x40   : > { %1376 = vmatpush3.bf16.msra.mxu0 %v1494_v51  ;;  %971 = vmatmul.mubr.bf16.gmra.mrb[4].mxu1 %v1239_v8 }
  0x41   : > { %1404 = vmatpush3.bf16.msra.mxu1 %v1495_v52  ;;  %1377 = vmatprep.subr.bf16.mxu0 %v1496_v53 }
  0x42   : > { %1405 = vmatprep.subr.bf16.mxu1 %v1497_v54  ;;  %1011 = vmatprep.mubr.bf16.mxu0 %v1234_v22 }
  0x43   : > { %1060 = vmatprep.mubr.bf16.mxu1 %v1236_v24 }
  0x44   : > { %1378 = vmatpush3.bf16.msra.mxu0 %v1498_v55 }
  0x45   : > { %1406 = vmatpush3.bf16.msra.mxu1 %v1499_v56  ;;  %1379 = vmatprep.subr.bf16.mxu0 %v1500_v57 }
  0x46   : > { %1407 = vmatprep.subr.bf16.mxu1 %v1501_v58 }
  0x48   : > { %1380 = vmatpush3.bf16.msra.mxu0 %v1502_v59 }
  0x49   : > { %1408 = vmatpush3.bf16.msra.mxu1 %v1503_v60  ;;  %1381 = vmatprep.subr.bf16.mxu0 %v1504_v0 }
  0x4a   : > { %1409 = vmatprep.subr.bf16.mxu1 %v1505_v2 }
  0x4c   : > { %1382 = vmatpush3.bf16.msra.mxu0 %v1506_v3 }
  0x4d   : > { %1410 = vmatpush3.bf16.msra.mxu1 %v1507_v4  ;;  %1383 = vmatprep.subr.bf16.mxu0 %v1508_v9 }
  0x4e   : > { %1411 = vmatprep.subr.bf16.mxu1 %v1509_v10 }
  0x50   : > { %1384 = vmatpush3.bf16.msra.mxu0 %v1510_v11 }
  0x51   : > { %1412 = vmatpush3.bf16.msra.mxu1 %v1511_v12  ;;  %1385 = vmatprep.subr.bf16.mxu0 %v1512_v13 }
  0x52   : > { %1413 = vmatprep.subr.bf16.mxu1 %v1513_v14 }
  0x54   : > { %1386 = vmatpush3.bf16.msra.mxu0 %v1514_v15 }
  0x55   : > { %1414 = vmatpush3.bf16.msra.mxu1 %v1515_v16 }
  0x57   : > { %1012 = vmatmul.mubr.bf16.vlgmr.msra.gmra.mrb[8].mxu0 %v1233_v21 }
  0x58   : > { %1061 = vmatmul.mubr.bf16.vlgmr.msra.gmra.mrb[8].mxu1 %v1235_v23  ;;  %1019 = vmatprep.mubr.bf16.mxu0 %v1242_v28 }
  0x59   : > { %1068 = vmatprep.mubr.bf16.mxu1 %v1244_v30 }
  0x5f   : > { %1020 = vmatmul.mubr.bf16.gmra.mrb[12].mxu0 %v1241_v31 }
  0x60   : > { %1069 = vmatmul.mubr.bf16.gmra.mrb[12].mxu1 %v1243_v32 }
 0x10a   : > { %v1331_v33 = vpop.f32.mrb[0].mxu0 }
 0x10b   : > { %v1359_v34 = vpop.f32.mrb[0].mxu1  ;;  %v1332_v36 = vpop.f32.mrb[1].mxu0 }
 0x10c   : > { %v1333_v37 = vadd.f32 %v1332_v36, %v1331_v33  ;;  %v1360_v38 = vpop.f32.mrb[1].mxu1  ;;  %v1334_v39 = vpop.f32.mrb[2].mxu0 }
 0x10d   : > { %v1361_v40 = vadd.f32 %v1360_v38, %v1359_v34  ;;  %v1362_v41 = vpop.f32.mrb[2].mxu1  ;;  %v1335_v42 = vpop.f32.mrb[3].mxu0 }
 0x10e   : > { %v916_v43 = vadd.f32 %v1333_v37, %v1228_v35  ;;  %v1336_v44 = vadd.f32 %v1335_v42, %v1334_v39  ;;  %v1363_v45 = vpop.f32.mrb[3].mxu1 }
 0x10f   : > { %v1364_v46 = vadd.f32 %v1363_v45, %v1362_v41 }
 0x110   : > { %v965_v47 = vadd.f32 %v1361_v40, %v916_v43  ;;  %v919_v48 = vadd.f32 %v1336_v44, %v1228_v35 }
 0x112   : > { %v968_v49 = vadd.f32 %v1364_v46, %v919_v48  ;;  %v1337_v50 = vpop.f32.mrb[4].mxu0 }
 0x113   : > { %v1338_v51 = vpop.f32.mrb[5].mxu0  ;;  %v1365_v57 = vpop.f32.mrb[4].mxu1 }
 0x114   : > { %v1339_v52 = vadd.f32 %v1338_v51, %v1337_v50  ;;  %v1340_v53 = vpop.f32.mrb[6].mxu0  ;;  %v1366_v58 = vpop.f32.mrb[5].mxu1 }
 0x115   : > { %v1341_v54 = vpop.f32.mrb[7].mxu0  ;;  %v1367_v60 = vadd.f32 %v1366_v58, %v1365_v57  ;;  %v1368_v61 = vpop.f32.mrb[6].mxu1 }
 0x116   : > { %v1342_v55 = vadd.f32 %v1341_v54, %v1340_v53  ;;  %v924_v56 = vadd.f32 %v1339_v52, %v1228_v35  ;;  %v1369_v62 = vpop.f32.mrb[7].mxu1 }
 0x117   : > { %v1370_v0 = vadd.f32 %v1369_v62, %v1368_v61 }
 0x118   : > { %v927_v59 = vadd.f32 %v1342_v55, %v1228_v35  ;;  %v973_v63 = vadd.f32 %v1367_v60, %v924_v56  ;;  %v1103_v56 = vld [vmem:[%s1708_s4] sm:$0x3] }
 0x11a   : > { %v976_v1 = vadd.f32 %v1370_v0, %v927_v59 }
 0x12a   : > { %v1387_v2 = vpop.f32.mrb[8].mxu0 }
 0x12b   : > { %v1415_v3 = vpop.f32.mrb[8].mxu1  ;;  %v1388_v4 = vpop.f32.mrb[9].mxu0 }
 0x12c   : > { %v1416_v5 = vpop.f32.mrb[9].mxu1  ;;  %v1389_v6 = vadd.f32 %v1388_v4, %v1387_v2  ;;  %v1390_v8 = vpop.f32.mrb[10].mxu0 }
 0x12d   : > { %v1417_v7 = vadd.f32 %v1416_v5, %v1415_v3  ;;  %v1418_v9 = vpop.f32.mrb[10].mxu1  ;;  %v1391_v10 = vpop.f32.mrb[11].mxu0 }
 0x12e   : > { %v1419_v11 = vpop.f32.mrb[11].mxu1  ;;  %v1014_v12 = vadd.f32 %v1389_v6, %v965_v47  ;;  %v1392_v13 = vadd.f32 %v1391_v10, %v1390_v8 }
 0x12f   : > { %v1420_v14 = vadd.f32 %v1419_v11, %v1418_v9 }
 0x130   : > { %v1063_v15 = vadd.f32 %v1417_v7, %v1014_v12  ;;  %v1017_v16 = vadd.f32 %v1392_v13, %v968_v49 }
 0x132   : > { %1077 = vst [vmem:[%s1597_s30] sm:$0xff] %v1063_v15  ;;  %v1066_v17 = vadd.f32 %v1420_v14, %v1017_v16  ;;  %v1393_v18 = vpop.f32.mrb[12].mxu0  ;;  %v1090_v20 = vmul.f32 %v1063_v15, %v1063_v15 }
 0x133   : > { %v1421_v19 = vpop.f32.mrb[12].mxu1  ;;  %v1394_v21 = vpop.f32.mrb[13].mxu0 }
 0x134   : > { %v1422_v22 = vpop.f32.mrb[13].mxu1  ;;  %1078 = vst [vmem:[%s1597_s30 + $0x8] sm:$0xff] %v1066_v17  ;;  %v1081_v23 = vadd.f32 %v1066_v17, %v1063_v15  ;;  %v1091_v24 = vmul.f32 %v1066_v17, %v1066_v17  ;;  %v1395_v25 = vadd.f32 %v1394_v21, %v1393_v18  ;;  %v1396_v27 = vpop.f32.mrb[14].mxu0 }
 0x135   : > { %v1423_v26 = vadd.f32 %v1422_v22, %v1421_v19  ;;  %v1424_v28 = vpop.f32.mrb[14].mxu1  ;;  %v1397_v29 = vpop.f32.mrb[15].mxu0 }
 0x136   : > { %v1425_v30 = vpop.f32.mrb[15].mxu1  ;;  %v1094_v31 = vadd.f32 %v1091_v24, %v1090_v20  ;;  %v1022_v32 = vadd.f32 %v1395_v25, %v973_v63  ;;  %v1398_v33 = vadd.f32 %v1397_v29, %v1396_v27 }
 0x137   : > { %v1426_v34 = vadd.f32 %v1425_v30, %v1424_v28 }
 0x138   : > { %v1071_v35 = vadd.f32 %v1423_v26, %v1022_v32  ;;  %v1025_v36 = vadd.f32 %v1398_v33, %v976_v1 }
 0x13a   : > { %1079 = vst [vmem:[%s1597_s30 + $0x10] sm:$0xff] %v1071_v35  ;;  %v1082_v37 = vadd.f32 %v1081_v23, %v1071_v35  ;;  %v1092_v38 = vmul.f32 %v1071_v35, %v1071_v35  ;;  %v1074_v39 = vadd.f32 %v1426_v34, %v1025_v36 }
 0x13c   : > { %v1095_v40 = vadd.f32 %v1094_v31, %v1092_v38  ;;  %1080 = vst [vmem:[%s1597_s30 + $0x18] sm:$0xff] %v1074_v39  ;;  %v1083_v41 = vadd.f32 %v1082_v37, %v1074_v39  ;;  %v1093_v42 = vmul.f32 %v1074_v39, %v1074_v39 }
 0x13e   : > { %v1084_v43 = vrot.slane %v1083_v41, 4  ;;  %v1096_v44 = vadd.f32 %v1095_v40, %v1093_v42 }
 0x140   : > { %v1085_v45 = vadd.f32 %v1084_v43, %v1083_v41  ;;  %v1097_v46 = vrot.slane %v1096_v44, 4 }
 0x142   : > { %v1086_v47 = vrot.slane %v1085_v45, 2  ;;  %v1098_v48 = vadd.f32 %v1097_v46, %v1096_v44 }
 0x144   : > { %v1087_v49 = vadd.f32 %v1086_v47, %v1085_v45  ;;  %v1099_v50 = vrot.slane %v1098_v48, 2 }
 0x146   : > { %v1088_v51 = vrot.slane %v1087_v49, 1  ;;  %v1100_v52 = vadd.f32 %v1099_v50, %v1098_v48 }
 0x148   : > { %v1101_v53 = vrot.slane %v1100_v52, 1  ;;  %v1089_v54 = vadd.f32 %v1088_v51, %v1087_v49 }
 0x14a   : > { %v1102_v55 = vadd.f32 %v1101_v53, %v1100_v52 }
 0x14c   : > { %v1105_v57 = vsel %vm1104_vm0, %v1089_v54, %v1102_v55 }
 0x14d   : > { %v1106_v58 = vadd.f32 %v1105_v57, %v1103_v56 }
 0x14f   : > { %1107 = vst [vmem:[%s1708_s4] sm:$0x3] %v1106_v58 }
 0x150 PF: > { %s15_s17 = sadd.s32 1, %s1538_s17   ;;  %s1709_s15 = smov %s1534_s16 }
 0x151   : > { %p12_p6 = scmp.ge.s32.totalorder %s15_s17, 6   ;;  %s1710_s16 = smov %s1712_s18 }
 0x153   :  { %14 = sbr.rel (!%p12_p6) target bundleno = 2 (0x2), region = 77 }

// kernel: generator_forward.8
= control target key start
LH: loop header
LB: loop body
LE: loop exit
PB: predicated region body
PF: predicated region fallthrough
CT: control target
= control target key end

     0   :  { %s305_s0 = inlined_call_operand.vmem [shape: f32[128,128], index: 0, kind: input, shape index: {}]   ;;  %s306_s1 = inlined_call_operand.vmem [shape: f32[1,128], index: 1, kind: input, shape index: {}]   ;;  %s307_s2 = inlined_call_operand.vmem [shape: f32[1,128], index: 2, kind: input, shape index: {}]   ;;  %s308_s3 = inlined_call_operand.vmem [shape: f32[128,128], index: 3, kind: output, shape index: {}]  }
   0x1   :  { %v14_v0 = vld [vmem:[%s305_s0] sm:$0xff]  ;;  %v15_v4 = vld [vmem:[%s305_s0 + $0x8] sm:$0xff]  ;;  %v16_v5 = vld [vmem:[%s305_s0 + $0x10] sm:$0xff] }
   0x2   :  { %v172_v1 = vld [vmem:[%s306_s1] ss:$0 sm:$0xff]  ;;  %v17_v6 = vld [vmem:[%s305_s0 + $0x18] sm:$0xff]  ;;  %v19_v11 = vld [vmem:[%s305_s0 + $0x28] sm:$0xff] }
   0x3   :  { %v177_v2 = vld [vmem:[%s307_s2] ss:$0 sm:$0xff]  ;;  %v37_v3 = vmul.f32 %v172_v1, %v14_v0  ;;  %v38_v7 = vmul.f32 %v172_v1, %v15_v4  ;;  %v39_v8 = vmul.f32 %v172_v1, %v16_v5  ;;  %v40_v9 = vmul.f32 %v172_v1, %v17_v6  ;;  %v20_v12 = vld [vmem:[%s305_s0 + $0x30] sm:$0xff]  ;;  %v21_v17 = vld [vmem:[%s305_s0 + $0x38] sm:$0xff] }
   0x4   :  { %v18_v10 = vld [vmem:[%s305_s0 + $0x20] sm:$0xff]  ;;  %v42_v15 = vmul.f32 %v172_v1, %v19_v11  ;;  %v43_v16 = vmul.f32 %v172_v1, %v20_v12  ;;  %v44_v21 = vmul.f32 %v172_v1, %v21_v17  ;;  %v23_v30 = vld [vmem:[%s305_s0 + $0x48] sm:$0xff]  ;;  %v24_v31 = vld [vmem:[%s305_s0 + $0x50] sm:$0xff] }
   0x5   :  { %v60_v13 = vadd.f32 %v177_v2, %v37_v3  ;;  %v41_v14 = vmul.f32 %v172_v1, %v18_v10  ;;  %v61_v18 = vadd.f32 %v177_v2, %v38_v7  ;;  %v62_v19 = vadd.f32 %v177_v2, %v39_v8  ;;  %v22_v25 = vld [vmem:[%s305_s0 + $0x40] sm:$0xff]  ;;  %v25_v43 = vld [vmem:[%s305_s0 + $0x58] sm:$0xff]  ;;  %v27_v45 = vld [vmem:[%s305_s0 + $0x68] sm:$0xff] }
   0x6   :  { %v63_v20 = vadd.f32 %v177_v2, %v40_v9  ;;  %v65_v24 = vadd.f32 %v177_v2, %v42_v15  ;;  %v66_v37 = vadd.f32 %v177_v2, %v43_v16  ;;  %v67_v38 = vadd.f32 %v177_v2, %v44_v21  ;;  %v26_v44 = vld [vmem:[%s305_s0 + $0x60] sm:$0xff]  ;;  %v28_v56 = vld [vmem:[%s305_s0 + $0x70] sm:$0xff]  ;;  %v29_v4 = vld [vmem:[%s305_s0 + $0x78] sm:$0xff] }
   0x7   :  { %vm76_vm0 = vcmp.gt.f32.partialorder %v60_v13, 0.0  ;;  %v92_v22 = vmul.f32 0.2, %v60_v13  ;;  %v64_v23 = vadd.f32 %v177_v2, %v41_v14  ;;  %vm77_vm1 = vcmp.gt.f32.partialorder %v61_v18, 0.0 }
   0x8   :  { %v93_v26 = vmul.f32 0.2, %v61_v18  ;;  %vm78_vm2 = vcmp.gt.f32.partialorder %v62_v19, 0.0  ;;  %v94_v27 = vmul.f32 0.2, %v62_v19  ;;  %vm79_vm3 = vcmp.gt.f32.partialorder %v63_v20, 0.0 }
   0x9   :  { %v108_v28 = vsel %vm76_vm0, %v60_v13, %v92_v22  ;;  %v95_v29 = vmul.f32 0.2, %v63_v20  ;;  %vm80_vm4 = vcmp.gt.f32.partialorder %v64_v23, 0.0  ;;  %v96_v34 = vmul.f32 0.2, %v64_v23 }
   0xa   :  { %124 = vst [vmem:[%s308_s3] sm:$0xff] %v108_v28  ;;  %v109_v32 = vsel %vm77_vm1, %v61_v18, %v93_v26  ;;  %v110_v33 = vsel %vm78_vm2, %v62_v19, %v94_v27  ;;  %vm81_vm5 = vcmp.gt.f32.partialorder %v65_v24, 0.0  ;;  %v97_v36 = vmul.f32 0.2, %v65_v24 }
   0xb   :  { %125 = vst [vmem:[%s308_s3 + $0x8] sm:$0xff] %v109_v32  ;;  %126 = vst [vmem:[%s308_s3 + $0x10] sm:$0xff] %v110_v33  ;;  %v111_v35 = vsel %vm79_vm3, %v63_v20, %v95_v29  ;;  %v112_v39 = vsel %vm80_vm4, %v64_v23, %v96_v34  ;;  %v45_v40 = vmul.f32 %v172_v1, %v22_v25  ;;  %vm82_vm6 = vcmp.gt.f32.partialorder %v66_v37, 0.0 }
   0xc   :  { %127 = vst [vmem:[%s308_s3 + $0x18] sm:$0xff] %v111_v35  ;;  %v46_v41 = vmul.f32 %v172_v1, %v23_v30  ;;  %v47_v42 = vmul.f32 %v172_v1, %v24_v31  ;;  %128 = vst [vmem:[%s308_s3 + $0x20] sm:$0xff] %v112_v39  ;;  %v113_v46 = vsel %vm81_vm5, %v65_v24, %v97_v36  ;;  %v98_v47 = vmul.f32 0.2, %v66_v37 }
   0xd   :  { %vm83_vm7 = vcmp.gt.f32.partialorder %v67_v38, 0.0  ;;  %129 = vst [vmem:[%s308_s3 + $0x28] sm:$0xff] %v113_v46  ;;  %v99_v48 = vmul.f32 0.2, %v67_v38  ;;  %v68_v49 = vadd.f32 %v177_v2, %v45_v40  ;;  %v48_v53 = vmul.f32 %v172_v1, %v25_v43 }
   0xe   :  { %v69_v50 = vadd.f32 %v177_v2, %v46_v41  ;;  %v70_v51 = vadd.f32 %v177_v2, %v47_v42  ;;  %v114_v52 = vsel %vm82_vm6, %v66_v37, %v98_v47  ;;  %v49_v54 = vmul.f32 %v172_v1, %v26_v44 }
   0xf   :  { %v50_v55 = vmul.f32 %v172_v1, %v27_v45  ;;  %130 = vst [vmem:[%s308_s3 + $0x30] sm:$0xff] %v114_v52  ;;  %v115_v57 = vsel %vm83_vm7, %v67_v38, %v99_v48  ;;  %vm84_vm8 = vcmp.gt.f32.partialorder %v68_v49, 0.0  ;;  %v100_v58 = vmul.f32 0.2, %v68_v49 }
  0x10   :  { %vm85_vm9 = vcmp.gt.f32.partialorder %v69_v50, 0.0  ;;  %131 = vst [vmem:[%s308_s3 + $0x38] sm:$0xff] %v115_v57  ;;  %v101_v59 = vmul.f32 0.2, %v69_v50  ;;  %vm86_vm10 = vcmp.gt.f32.partialorder %v70_v51, 0.0  ;;  %v71_v61 = vadd.f32 %v177_v2, %v48_v53 }
  0x11   :  { %v102_v60 = vmul.f32 0.2, %v70_v51  ;;  %v116_v62 = vsel %vm84_vm8, %v68_v49, %v100_v58  ;;  %v72_v63 = vadd.f32 %v177_v2, %v49_v54  ;;  %v73_v0 = vadd.f32 %v177_v2, %v50_v55 }
  0x12   :  { %v51_v3 = vmul.f32 %v172_v1, %v28_v56  ;;  %132 = vst [vmem:[%s308_s3 + $0x40] sm:$0xff] %v116_v62  ;;  %v117_v5 = vsel %vm85_vm9, %v69_v50, %v101_v59  ;;  %vm87_vm11 = vcmp.gt.f32.partialorder %v71_v61, 0.0  ;;  %v103_v7 = vmul.f32 0.2, %v71_v61 }
  0x13   :  { %v118_v6 = vsel %vm86_vm10, %v70_v51, %v102_v60  ;;  %133 = vst [vmem:[%s308_s3 + $0x48] sm:$0xff] %v117_v5  ;;  %vm88_vm12 = vcmp.gt.f32.partialorder %v72_v63, 0.0  ;;  %v104_v8 = vmul.f32 0.2, %v72_v63  ;;  %vm89_vm13 = vcmp.gt.f32.partialorder %v73_v0, 0.0 }
  0x14   :  { %134 = vst [vmem:[%s308_s3 + $0x50] sm:$0xff] %v118_v6  ;;  %v105_v9 = vmul.f32 0.2, %v73_v0  ;;  %v119_v10 = vsel %vm87_vm11, %v71_v61, %v103_v7  ;;  %v74_v11 = vadd.f32 %v177_v2, %v51_v3  ;;  %v52_v12 = vmul.f32 %v172_v1, %v29_v4 }
  0x15   :  { %135 = vst [vmem:[%s308_s3 + $0x58] sm:$0xff] %v119_v10  ;;  %v120_v13 = vsel %vm88_vm12, %v72_v63, %v104_v8 }
  0x16   :  { %v121_v14 = vsel %vm89_vm13, %v73_v0, %v105_v9  ;;  %136 = vst [vmem:[%s308_s3 + $0x60] sm:$0xff] %v120_v13  ;;  %vm90_vm14 = vcmp.gt.f32.partialorder %v74_v11, 0.0  ;;  %v106_v15 = vmul.f32 0.2, %v74_v11  ;;  %v75_v16 = vadd.f32 %v177_v2, %v52_v12 }
  0x17   :  { %137 = vst [vmem:[%s308_s3 + $0x68] sm:$0xff] %v121_v14 }
  0x18   :  { %v122_v17 = vsel %vm90_vm14, %v74_v11, %v106_v15  ;;  %vm91_vm15 = vcmp.gt.f32.partialorder %v75_v16, 0.0  ;;  %v107_v1 = vmul.f32 0.2, %v75_v16 }
  0x19   :  { %138 = vst [vmem:[%s308_s3 + $0x70] sm:$0xff] %v122_v17 }
  0x1a   :  { %v123_v18 = vsel %vm91_vm15, %v75_v16, %v107_v1 }
  0x1b   :  { %139 = vst [vmem:[%s308_s3 + $0x78] sm:$0xff] %v123_v18 }

// kernel: generator_forward.9
= control target key start
LH: loop header
LB: loop body
LE: loop exit
PB: predicated region body
PF: predicated region fallthrough
CT: control target
= control target key end

     0   :  { %s1468_s15 = smov 0   ;;  %s1470_s16 = smov 0   ;;  %s1620_s0 = inlined_call_operand.vmem [shape: bf16[4,128,512], index: 0, kind: input, shape index: {}]   ;;  %s1621_s1 = inlined_call_operand.vmem [shape: bf16[4,512,128], index: 1, kind: input, shape index: {}]   ;;  %s1622_s2 = inlined_call_operand.vmem [shape: f32[1,128], index: 2, kind: input, shape index: {}]   ;;  %s1623_s3 = inlined_call_operand.vmem [shape: f32[4,128,128], index: 3, kind: output, shape index: {0}]   ;;  %s1624_s4 = inlined_call_operand.vmem [shape: f32[2,128], index: 4, kind: output, shape index: {1}]  }
   0x1   :  { %s1472_s17 = smov 0  }
   0x2 LB: > { %s27_s18 = sadd.s32 1, %s1436_s16  ;;  %p1106_p0 = scmp.ge.s32.totalorder %s1440_s17, 1  ;;  %s1440_s17 = sphi %s1472_s17, %s15_s17   ;;  %s1436_s16 = sphi %s1470_s16, %s1626_s16   ;;  %s1432_s15 = sphi %s1468_s15, %s1625_s15  }
   0x3   : > { %p29_p1 = scmp.ge.s32.totalorder %s27_s18, 4  ;;  %p192_p2 = scmp.lt.s32.totalorder %s1440_s17, 5 }
   0x5   : > { %s1628_s18 = smov (%p29_p1, %s27_s18), 0  ;;  %p193_p3 = pnand %p1106_p0, %p192_p2 }
   0x6   : > { %p233_p4 = scmp.lt.s32.totalorder (!%p193_p3), %s1432_s15, 3  ;;  %p259_p5 = scmp.eq.s32.totalorder (!%p193_p3), %s1432_s15, 0 }
   0x7   : > { %196 = sbr.rel (%p193_p3) target bundleno = 352 (0x160), region = 32 }
   0xe   : > { %s1630_s15 = smov (!%p233_p4, %s1432_s15), 3  ;;  %264 = sbr.rel (!%p259_p5) target bundleno = 21 (0x15), region = 36 }
   0xf   : > { %s1181_s19 = sshll.u32 %s1630_s15, 8  ;;  %s1183_s20 = sshll.u32 %s1630_s15, 7  ;;  %v1442_v0 = vmov (%p259_p5), 0.0  }
  0x10   : > { %s1489_s23 = scalar_lea.vmem %s1620_s0, %s1181_s19  ;;  %s1494_s26 = scalar_lea.vmem %s1621_s1, %s1181_s19  ;;  %265 = vst [vmem:[%s1624_s4] sm:$0x3] (%p259_p5), %v1442_v0 }
  0x11   : > { %s1499_s29 = scalar_lea.vmem %s1623_s3, %s1183_s20 }
  0x15 PF: > { %v1338_v1 = vld [vmem:[%s1494_s26 + $0x40] sm:$0xff]   ;;  %v1342_v5 = vld [vmem:[%s1494_s26 + $0x48] sm:$0xff]   ;;  %v1346_v9 = vld [vmem:[%s1494_s26 + $0x50] sm:$0xff]   ;;  %vm990_vm0 = vcmask 1040384  }
  0x16   : > { %v1339_v2 = vld [vmem:[%s1494_s26 + $0xc0] sm:$0xff]   ;;  %1185 = vmatprep.subr.bf16.mxu0 %v1338_v1  ;;  %v1343_v6 = vld [vmem:[%s1494_s26 + $0xc8] sm:$0xff]   ;;  %v1347_v10 = vld [vmem:[%s1494_s26 + $0xd0] sm:$0xff]  }
  0x17   : > { %v1340_v3 = vld [vmem:[%s1494_s26] sm:$0xff]   ;;  %1249 = vmatprep.subr.bf16.mxu1 %v1339_v2  ;;  %v1344_v7 = vld [vmem:[%s1494_s26 + $0x8] sm:$0xff]   ;;  %v1348_v11 = vld [vmem:[%s1494_s26 + $0x10] sm:$0xff]  }
  0x18   : > { %v1341_v4 = vld [vmem:[%s1494_s26 + $0x80] sm:$0xff]   ;;  %1186 = vmatpush3.bf16.msra.mxu0 %v1340_v3  ;;  %v1345_v8 = vld [vmem:[%s1494_s26 + $0x88] sm:$0xff]   ;;  %v1349_v12 = vld [vmem:[%s1494_s26 + $0x90] sm:$0xff]  }
  0x19   : > { %1250 = vmatpush3.bf16.msra.mxu1 %v1341_v4  ;;  %1187 = vmatprep.subr.bf16.mxu0 %v1342_v5  ;;  %v1350_v13 = vld [vmem:[%s1494_s26 + $0x58] sm:$0xff]   ;;  %v1354_v17 = vld [vmem:[%s1494_s26 + $0x60] sm:$0xff]   ;;  %v1358_v21 = vld [vmem:[%s1494_s26 + $0x68] sm:$0xff]  }
  0x1a   : > { %1251 = vmatprep.subr.bf16.mxu1 %v1343_v6  ;;  %v1351_v14 = vld [vmem:[%s1494_s26 + $0xd8] sm:$0xff]   ;;  %v1355_v18 = vld [vmem:[%s1494_s26 + $0xe0] sm:$0xff]   ;;  %v1359_v22 = vld [vmem:[%s1494_s26 + $0xe8] sm:$0xff]  }
  0x1b   : > { %v1352_v15 = vld [vmem:[%s1494_s26 + $0x18] sm:$0xff]   ;;  %v1356_v19 = vld [vmem:[%s1494_s26 + $0x20] sm:$0xff]   ;;  %v1360_v23 = vld [vmem:[%s1494_s26 + $0x28] sm:$0xff]  }
  0x1c   : > { %1188 = vmatpush3.bf16.msra.mxu0 %v1344_v7  ;;  %v1353_v16 = vld [vmem:[%s1494_s26 + $0x98] sm:$0xff]   ;;  %v1357_v20 = vld [vmem:[%s1494_s26 + $0xa0] sm:$0xff]   ;;  %v1361_v24 = vld [vmem:[%s1494_s26 + $0xa8] sm:$0xff]  }
  0x1d   : > { %1252 = vmatpush3.bf16.msra.mxu1 %v1345_v8  ;;  %1189 = vmatprep.subr.bf16.mxu0 %v1346_v9  ;;  %v1362_v25 = vld [vmem:[%s1494_s26 + $0x70] sm:$0xff]   ;;  %v1366_v29 = vld [vmem:[%s1494_s26 + $0x78] sm:$0xff]   ;;  %v1571_v3 = vld [vmem:[%s1622_s2] ss:$0 sm:$0xff] }
  0x1e   : > { %1253 = vmatprep.subr.bf16.mxu1 %v1347_v10  ;;  %v1363_v26 = vld [vmem:[%s1494_s26 + $0xf0] sm:$0xff]   ;;  %v1367_v30 = vld [vmem:[%s1494_s26 + $0xf8] sm:$0xff]  }
  0x1f   : > { %v1364_v27 = vld [vmem:[%s1494_s26 + $0x30] sm:$0xff]   ;;  %v1368_v31 = vld [vmem:[%s1494_s26 + $0x38] sm:$0xff]  }
  0x20   : > { %1190 = vmatpush3.bf16.msra.mxu0 %v1348_v11  ;;  %v1365_v28 = vld [vmem:[%s1494_s26 + $0xb0] sm:$0xff]   ;;  %v1369_v32 = vld [vmem:[%s1494_s26 + $0xb8] sm:$0xff]  }
  0x21   : > { %1254 = vmatpush3.bf16.msra.mxu1 %v1349_v12  ;;  %1191 = vmatprep.subr.bf16.mxu0 %v1350_v13  ;;  %v1370_v33 = vld [vmem:[%s1489_s23] ss:$16 sps:$4 sm:$0xff]   ;;  %v1372_v34 = vld [vmem:[%s1489_s23 + $0x4] ss:$16 sps:$4 sm:$0xff]   ;;  %v1373_v35 = vld [vmem:[%s1489_s23 + $0x8] ss:$16 sps:$4 sm:$0xff]  }
  0x22   : > { %1255 = vmatprep.subr.bf16.mxu1 %v1351_v14  ;;  %v1375_v36 = vld [vmem:[%s1489_s23 + $0xc] ss:$16 sps:$4 sm:$0xff]   ;;  %753 = vmatprep.mubr.bf16.mxu0 %v1372_v34  ;;  %v1376_v37 = vld [vmem:[%s1489_s23 + $0x24] ss:$16 sps:$4 sm:$0xff]   ;;  %v1380_v39 = vld [vmem:[%s1489_s23 + $0x20] ss:$16 sps:$4 sm:$0xff]  }
  0x23   : > { %850 = vmatprep.mubr.bf16.mxu1 %v1375_v36  ;;  %v1378_v38 = vld [vmem:[%s1489_s23 + $0x2c] ss:$16 sps:$4 sm:$0xff]   ;;  %v1381_v40 = vld [vmem:[%s1489_s23 + $0x28] ss:$16 sps:$4 sm:$0xff]   ;;  %v1382_v41 = vld [vmem:[%s1489_s23 + $0x44] ss:$16 sps:$4 sm:$0xff]  }
  0x24   : > { %1192 = vmatpush3.bf16.msra.mxu0 %v1352_v15  ;;  %v1384_v42 = vld [vmem:[%s1489_s23 + $0x4c] ss:$16 sps:$4 sm:$0xff]   ;;  %v1386_v43 = vld [vmem:[%s1489_s23 + $0x40] ss:$16 sps:$4 sm:$0xff]   ;;  %v1387_v44 = vld [vmem:[%s1489_s23 + $0x48] ss:$16 sps:$4 sm:$0xff]  }
  0x25   : > { %1256 = vmatpush3.bf16.msra.mxu1 %v1353_v16  ;;  %1193 = vmatprep.subr.bf16.mxu0 %v1354_v17  ;;  %v1388_v45 = vld [vmem:[%s1489_s23 + $0x64] ss:$16 sps:$4 sm:$0xff]   ;;  %v1390_v46 = vld [vmem:[%s1489_s23 + $0x6c] ss:$16 sps:$4 sm:$0xff]   ;;  %v1392_v47 = vld [vmem:[%s1489_s23 + $0x60] ss:$16 sps:$4 sm:$0xff]  }
  0x26   : > { %1257 = vmatprep.subr.bf16.mxu1 %v1355_v18  ;;  %v1393_v48 = vld [vmem:[%s1489_s23 + $0x68] ss:$16 sps:$4 sm:$0xff]   ;;  %v1394_v49 = vld [vmem:[%s1489_s23 + $0x84] ss:$16 sps:$4 sm:$0xff]   ;;  %v1396_v50 = vld [vmem:[%s1489_s23 + $0x8c] ss:$16 sps:$4 sm:$0xff]  }
  0x27   : > { %v1398_v51 = vld [vmem:[%s1489_s23 + $0x80] ss:$16 sps:$4 sm:$0xff]   ;;  %v1399_v52 = vld [vmem:[%s1489_s23 + $0x88] ss:$16 sps:$4 sm:$0xff]   ;;  %v1400_v53 = vld [vmem:[%s1489_s23 + $0xa4] ss:$16 sps:$4 sm:$0xff]  }
  0x28   : > { %1194 = vmatpush3.bf16.msra.mxu0 %v1356_v19  ;;  %v1402_v54 = vld [vmem:[%s1489_s23 + $0xac] ss:$16 sps:$4 sm:$0xff]   ;;  %v1404_v55 = vld [vmem:[%s1489_s23 + $0xa0] ss:$16 sps:$4 sm:$0xff]   ;;  %v1405_v56 = vld [vmem:[%s1489_s23 + $0xa8] ss:$16 sps:$4 sm:$0xff]  }
  0x29   : > { %1258 = vmatpush3.bf16.msra.mxu1 %v1357_v20  ;;  %1195 = vmatprep.subr.bf16.mxu0 %v1358_v21  ;;  %v1406_v57 = vld [vmem:[%s1489_s23 + $0xc4] ss:$16 sps:$4 sm:$0xff]   ;;  %v1408_v58 = vld [vmem:[%s1489_s23 + $0xcc] ss:$16 sps:$4 sm:$0xff]   ;;  %v1410_v59 = vld [vmem:[%s1489_s23 + $0xc0] ss:$16 sps:$4 sm:$0xff]  }
  0x2a   : > { %1259 = vmatprep.subr.bf16.mxu1 %v1359_v22  ;;  %v1411_v60 = vld [vmem:[%s1489_s23 + $0xc8] ss:$16 sps:$4 sm:$0xff]   ;;  %v1412_v61 = vld [vmem:[%s1489_s23 + $0xe4] ss:$16 sps:$4 sm:$0xff]   ;;  %v1414_v62 = vld [vmem:[%s1489_s23 + $0xec] ss:$16 sps:$4 sm:$0xff]  }
  0x2b   : > { %v1416_v63 = vld [vmem:[%s1489_s23 + $0xe0] ss:$16 sps:$4 sm:$0xff]   ;;  %v1417_v0 = vld [vmem:[%s1489_s23 + $0xe8] ss:$16 sps:$4 sm:$0xff]  }
  0x2c   : > { %1196 = vmatpush3.bf16.msra.mxu0 %v1360_v23 }
  0x2d   : > { %1260 = vmatpush3.bf16.msra.mxu1 %v1361_v24  ;;  %1197 = vmatprep.subr.bf16.mxu0 %v1362_v25 }
  0x2e   : > { %1261 = vmatprep.subr.bf16.mxu1 %v1363_v26 }
  0x30   : > { %1198 = vmatpush3.bf16.msra.mxu0 %v1364_v27 }
  0x31   : > { %1262 = vmatpush3.bf16.msra.mxu1 %v1365_v28  ;;  %1199 = vmatprep.subr.bf16.mxu0 %v1366_v29 }
  0x32   : > { %1263 = vmatprep.subr.bf16.mxu1 %v1367_v30 }
  0x34   : > { %1200 = vmatpush3.bf16.msra.mxu0 %v1368_v31 }
  0x35   : > { %1264 = vmatpush3.bf16.msra.mxu1 %v1369_v32 }
  0x37   : > { %754 = vmatmul.mubr.bf16.vlgmr.msra.gmra.mrb[0].mxu0 %v1370_v33 }
  0x38   : > { %851 = vmatmul.mubr.bf16.vlgmr.msra.gmra.mrb[0].mxu1 %v1373_v35  ;;  %761 = vmatprep.mubr.bf16.mxu0 %v1376_v37 }
  0x39   : > { %858 = vmatprep.mubr.bf16.mxu1 %v1378_v38 }
  0x3f   : > { %762 = vmatmul.mubr.bf16.gmra.mrb[4].mxu0 %v1380_v39 }
  0x40   : > { %859 = vmatmul.mubr.bf16.gmra.mrb[4].mxu1 %v1381_v40  ;;  %769 = vmatprep.mubr.bf16.mxu0 %v1382_v41 }
  0x41   : > { %866 = vmatprep.mubr.bf16.mxu1 %v1384_v42 }
  0x47   : > { %770 = vmatmul.mubr.bf16.gmra.mrb[8].mxu0 %v1386_v43 }
  0x48   : > { %867 = vmatmul.mubr.bf16.gmra.mrb[8].mxu1 %v1387_v44  ;;  %777 = vmatprep.mubr.bf16.mxu0 %v1388_v45 }
  0x49   : > { %874 = vmatprep.mubr.bf16.mxu1 %v1390_v46 }
  0x4f   : > { %778 = vmatmul.mubr.bf16.gmra.mrb[12].mxu0 %v1392_v47 }
  0x50   : > { %875 = vmatmul.mubr.bf16.gmra.mrb[12].mxu1 %v1393_v48  ;;  %785 = vmatprep.mubr.bf16.mxu0 %v1394_v49 }
  0x51   : > { %882 = vmatprep.mubr.bf16.mxu1 %v1396_v50 }
  0x57   : > { %786 = vmatmul.mubr.bf16.gmra.mrb[16].mxu0 %v1398_v51 }
  0x58   : > { %883 = vmatmul.mubr.bf16.gmra.mrb[16].mxu1 %v1399_v52  ;;  %793 = vmatprep.mubr.bf16.mxu0 %v1400_v53 }
  0x59   : > { %890 = vmatprep.mubr.bf16.mxu1 %v1402_v54 }
  0x5f   : > { %794 = vmatmul.mubr.bf16.gmra.mrb[20].mxu0 %v1404_v55 }
  0x60   : > { %891 = vmatmul.mubr.bf16.gmra.mrb[20].mxu1 %v1405_v56  ;;  %801 = vmatprep.mubr.bf16.mxu0 %v1406_v57 }
  0x61   : > { %898 = vmatprep.mubr.bf16.mxu1 %v1408_v58 }
  0x67   : > { %802 = vmatmul.mubr.bf16.gmra.mrb[24].mxu0 %v1410_v59 }
  0x68   : > { %899 = vmatmul.mubr.bf16.gmra.mrb[24].mxu1 %v1411_v60  ;;  %809 = vmatprep.mubr.bf16.mxu0 %v1412_v61 }
  0x69   : > { %906 = vmatprep.mubr.bf16.mxu1 %v1414_v62 }
  0x6f   : > { %810 = vmatmul.mubr.bf16.gmra.mrb[28].mxu0 %v1416_v63 }
  0x70   : > { %907 = vmatmul.mubr.bf16.gmra.mrb[28].mxu1 %v1417_v0 }
 0x10a   : > { %v1201_v1 = vpop.f32.mrb[0].mxu0 }
 0x10b   : > { %v1265_v2 = vpop.f32.mrb[0].mxu1  ;;  %v1202_v4 = vpop.f32.mrb[1].mxu0 }
 0x10c   : > { %v1203_v5 = vadd.f32 %v1202_v4, %v1201_v1  ;;  %v1266_v6 = vpop.f32.mrb[1].mxu1  ;;  %v1204_v7 = vpop.f32.mrb[2].mxu0 }
 0x10d   : > { %v1267_v8 = vadd.f32 %v1266_v6, %v1265_v2  ;;  %v1268_v9 = vpop.f32.mrb[2].mxu1  ;;  %v1205_v10 = vpop.f32.mrb[3].mxu0 }
 0x10e   : > { %v756_v11 = vadd.f32 %v1203_v5, %v1571_v3  ;;  %v1206_v12 = vadd.f32 %v1205_v10, %v1204_v7  ;;  %v1269_v13 = vpop.f32.mrb[3].mxu1 }
 0x10f   : > { %v1270_v14 = vadd.f32 %v1269_v13, %v1268_v9 }
 0x110   : > { %v853_v15 = vadd.f32 %v1267_v8, %v756_v11  ;;  %v759_v16 = vadd.f32 %v1206_v12, %v1571_v3 }
 0x112   : > { %915 = vst [vmem:[%s1499_s29] sm:$0xff] %v853_v15  ;;  %v856_v17 = vadd.f32 %v1270_v14, %v759_v16  ;;  %v1207_v18 = vpop.f32.mrb[4].mxu0  ;;  %v952_v21 = vmul.f32 %v853_v15, %v853_v15 }
 0x113   : > { %v1271_v19 = vpop.f32.mrb[4].mxu1  ;;  %v1208_v20 = vpop.f32.mrb[5].mxu0 }
 0x114   : > { %916 = vst [vmem:[%s1499_s29 + $0x8] sm:$0xff] %v856_v17  ;;  %v931_v22 = vadd.f32 %v856_v17, %v853_v15  ;;  %v953_v23 = vmul.f32 %v856_v17, %v856_v17  ;;  %v1209_v24 = vadd.f32 %v1208_v20, %v1207_v18  ;;  %v1272_v25 = vpop.f32.mrb[5].mxu1  ;;  %v1210_v26 = vpop.f32.mrb[6].mxu0 }
 0x115   : > { %v1273_v27 = vadd.f32 %v1272_v25, %v1271_v19  ;;  %v1274_v28 = vpop.f32.mrb[6].mxu1  ;;  %v1211_v29 = vpop.f32.mrb[7].mxu0 }
 0x116   : > { %v968_v30 = vadd.f32 %v953_v23, %v952_v21  ;;  %v764_v31 = vadd.f32 %v1209_v24, %v1571_v3  ;;  %v1212_v32 = vadd.f32 %v1211_v29, %v1210_v26  ;;  %v1275_v33 = vpop.f32.mrb[7].mxu1 }
 0x117   : > { %v1276_v34 = vadd.f32 %v1275_v33, %v1274_v28 }
 0x118   : > { %v861_v35 = vadd.f32 %v1273_v27, %v764_v31  ;;  %v767_v36 = vadd.f32 %v1212_v32, %v1571_v3 }
 0x11a   : > { %917 = vst [vmem:[%s1499_s29 + $0x10] sm:$0xff] %v861_v35  ;;  %v932_v37 = vadd.f32 %v931_v22, %v861_v35  ;;  %v954_v38 = vmul.f32 %v861_v35, %v861_v35  ;;  %v864_v39 = vadd.f32 %v1276_v34, %v767_v36  ;;  %v1213_v40 = vpop.f32.mrb[8].mxu0 }
 0x11b   : > { %v1277_v41 = vpop.f32.mrb[8].mxu1  ;;  %v1214_v42 = vpop.f32.mrb[9].mxu0 }
 0x11c   : > { %v969_v43 = vadd.f32 %v968_v30, %v954_v38  ;;  %918 = vst [vmem:[%s1499_s29 + $0x18] sm:$0xff] %v864_v39  ;;  %v933_v44 = vadd.f32 %v932_v37, %v864_v39  ;;  %v955_v45 = vmul.f32 %v864_v39, %v864_v39  ;;  %v1215_v46 = vadd.f32 %v1214_v42, %v1213_v40  ;;  %v1278_v47 = vpop.f32.mrb[9].mxu1  ;;  %v1216_v48 = vpop.f32.mrb[10].mxu0 }
 0x11d   : > { %v1279_v49 = vadd.f32 %v1278_v47, %v1277_v41  ;;  %v1280_v50 = vpop.f32.mrb[10].mxu1  ;;  %v1217_v51 = vpop.f32.mrb[11].mxu0 }
 0x11e   : > { %v970_v52 = vadd.f32 %v969_v43, %v955_v45  ;;  %v772_v53 = vadd.f32 %v1215_v46, %v1571_v3  ;;  %v1218_v54 = vadd.f32 %v1217_v51, %v1216_v48  ;;  %v1281_v55 = vpop.f32.mrb[11].mxu1 }
 0x11f   : > { %v1282_v56 = vadd.f32 %v1281_v55, %v1280_v50 }
 0x120   : > { %v869_v57 = vadd.f32 %v1279_v49, %v772_v53  ;;  %v775_v58 = vadd.f32 %v1218_v54, %v1571_v3 }
 0x122   : > { %919 = vst [vmem:[%s1499_s29 + $0x20] sm:$0xff] %v869_v57  ;;  %v934_v59 = vadd.f32 %v933_v44, %v869_v57  ;;  %v956_v60 = vmul.f32 %v869_v57, %v869_v57  ;;  %v872_v61 = vadd.f32 %v1282_v56, %v775_v58  ;;  %v1219_v62 = vpop.f32.mrb[12].mxu0 }
 0x123   : > { %v1283_v63 = vpop.f32.mrb[12].mxu1  ;;  %v1220_v0 = vpop.f32.mrb[13].mxu0 }
 0x124   : > { %v971_v1 = vadd.f32 %v970_v52, %v956_v60  ;;  %920 = vst [vmem:[%s1499_s29 + $0x28] sm:$0xff] %v872_v61  ;;  %v935_v2 = vadd.f32 %v934_v59, %v872_v61  ;;  %v957_v4 = vmul.f32 %v872_v61, %v872_v61  ;;  %v1221_v5 = vadd.f32 %v1220_v0, %v1219_v62  ;;  %v1284_v6 = vpop.f32.mrb[13].mxu1  ;;  %v1222_v7 = vpop.f32.mrb[14].mxu0 }
 0x125   : > { %v1285_v8 = vadd.f32 %v1284_v6, %v1283_v63  ;;  %v1286_v9 = vpop.f32.mrb[14].mxu1  ;;  %v1223_v10 = vpop.f32.mrb[15].mxu0 }
 0x126   : > { %v972_v11 = vadd.f32 %v971_v1, %v957_v4  ;;  %v780_v12 = vadd.f32 %v1221_v5, %v1571_v3  ;;  %v1224_v13 = vadd.f32 %v1223_v10, %v1222_v7  ;;  %v1287_v14 = vpop.f32.mrb[15].mxu1 }
 0x127   : > { %v1288_v15 = vadd.f32 %v1287_v14, %v1286_v9 }
 0x128   : > { %v877_v16 = vadd.f32 %v1285_v8, %v780_v12  ;;  %v783_v17 = vadd.f32 %v1224_v13, %v1571_v3 }
 0x12a   : > { %921 = vst [vmem:[%s1499_s29 + $0x30] sm:$0xff] %v877_v16  ;;  %v936_v18 = vadd.f32 %v935_v2, %v877_v16  ;;  %v958_v19 = vmul.f32 %v877_v16, %v877_v16  ;;  %v880_v20 = vadd.f32 %v1288_v15, %v783_v17  ;;  %v1225_v21 = vpop.f32.mrb[16].mxu0 }
 0x12b   : > { %v1289_v22 = vpop.f32.mrb[16].mxu1  ;;  %v1226_v23 = vpop.f32.mrb[17].mxu0 }
 0x12c   : > { %v973_v24 = vadd.f32 %v972_v11, %v958_v19  ;;  %922 = vst [vmem:[%s1499_s29 + $0x38] sm:$0xff] %v880_v20  ;;  %v937_v25 = vadd.f32 %v936_v18, %v880_v20  ;;  %v959_v26 = vmul.f32 %v880_v20, %v880_v20  ;;  %v1227_v27 = vadd.f32 %v1226_v23, %v1225_v21  ;;  %v1290_v28 = vpop.f32.mrb[17].mxu1  ;;  %v1228_v29 = vpop.f32.mrb[18].mxu0 }
 0x12d   : > { %v1291_v30 = vadd.f32 %v1290_v28, %v1289_v22  ;;  %v1292_v31 = vpop.f32.mrb[18].mxu1  ;;  %v1229_v32 = vpop.f32.mrb[19].mxu0 }
 0x12e   : > { %v974_v33 = vadd.f32 %v973_v24, %v959_v26  ;;  %v788_v34 = vadd.f32 %v1227_v27, %v1571_v3  ;;  %v1230_v35 = vadd.f32 %v1229_v32, %v1228_v29  ;;  %v1293_v36 = vpop.f32.mrb[19].mxu1 }
 0x12f   : > { %v1294_v37 = vadd.f32 %v1293_v36, %v1292_v31 }
 0x130   : > { %v885_v38 = vadd.f32 %v1291_v30, %v788_v34  ;;  %v791_v39 = vadd.f32 %v1230_v35, %v1571_v3 }
 0x132   : > { %923 = vst [vmem:[%s1499_s29 + $0x40] sm:$0xff] %v885_v38  ;;  %v938_v40 = vadd.f32 %v937_v25, %v885_v38  ;;  %v960_v41 = vmul.f32 %v885_v38, %v885_v38  ;;  %v888_v42 = vadd.f32 %v1294_v37, %v791_v39  ;;  %v1231_v43 = vpop.f32.mrb[20].mxu0 }
 0x133   : > { %v1295_v44 = vpop.f32.mrb[20].mxu1  ;;  %v1232_v45 = vpop.f32.mrb[21].mxu0 }
 0x134   : > { %v975_v46 = vadd.f32 %v974_v33, %v960_v41  ;;  %924 = vst [vmem:[%s1499_s29 + $0x48] sm:$0xff] %v888_v42  ;;  %v939_v47 = vadd.f32 %v938_v40, %v888_v42  ;;  %v961_v48 = vmul.f32 %v888_v42, %v888_v42  ;;  %v1233_v49 = vadd.f32 %v1232_v45, %v1231_v43  ;;  %v1296_v50 = vpop.f32.mrb[21].mxu1  ;;  %v1234_v51 = vpop.f32.mrb[22].mxu0 }
 0x135   : > { %v1297_v52 = vadd.f32 %v1296_v50, %v1295_v44  ;;  %v1298_v53 = vpop.f32.mrb[22].mxu1  ;;  %v1235_v54 = vpop.f32.mrb[23].mxu0 }
 0x136   : > { %v976_v55 = vadd.f32 %v975_v46, %v961_v48  ;;  %v796_v56 = vadd.f32 %v1233_v49, %v1571_v3  ;;  %v1236_v57 = vadd.f32 %v1235_v54, %v1234_v51  ;;  %v1299_v58 = vpop.f32.mrb[23].mxu1 }
 0x137   : > { %v1300_v59 = vadd.f32 %v1299_v58, %v1298_v53 }
 0x138   : > { %v893_v60 = vadd.f32 %v1297_v52, %v796_v56  ;;  %v799_v61 = vadd.f32 %v1236_v57, %v1571_v3 }
 0x13a   : > { %925 = vst [vmem:[%s1499_s29 + $0x50] sm:$0xff] %v893_v60  ;;  %v940_v62 = vadd.f32 %v939_v47, %v893_v60  ;;  %v962_v63 = vmul.f32 %v893_v60, %v893_v60  ;;  %v896_v0 = vadd.f32 %v1300_v59, %v799_v61  ;;  %v1237_v1 = vpop.f32.mrb[24].mxu0  ;;  %v989_v61 = vld [vmem:[%s1624_s4] sm:$0x3] }
 0x13b   : > { %v1301_v2 = vpop.f32.mrb[24].mxu1  ;;  %v1238_v4 = vpop.f32.mrb[25].mxu0 }
 0x13c   : > { %v977_v5 = vadd.f32 %v976_v55, %v962_v63  ;;  %926 = vst [vmem:[%s1499_s29 + $0x58] sm:$0xff] %v896_v0  ;;  %v941_v6 = vadd.f32 %v940_v62, %v896_v0  ;;  %v963_v7 = vmul.f32 %v896_v0, %v896_v0  ;;  %v1239_v8 = vadd.f32 %v1238_v4, %v1237_v1  ;;  %v1302_v9 = vpop.f32.mrb[25].mxu1  ;;  %v1240_v10 = vpop.f32.mrb[26].mxu0 }
 0x13d   : > { %v1303_v11 = vadd.f32 %v1302_v9, %v1301_v2  ;;  %v1304_v12 = vpop.f32.mrb[26].mxu1  ;;  %v1241_v13 = vpop.f32.mrb[27].mxu0 }
 0x13e   : > { %v978_v14 = vadd.f32 %v977_v5, %v963_v7  ;;  %v804_v15 = vadd.f32 %v1239_v8, %v1571_v3  ;;  %v1242_v16 = vadd.f32 %v1241_v13, %v1240_v10  ;;  %v1305_v17 = vpop.f32.mrb[27].mxu1 }
 0x13f   : > { %v1306_v18 = vadd.f32 %v1305_v17, %v1304_v12 }
 0x140   : > { %v901_v19 = vadd.f32 %v1303_v11, %v804_v15  ;;  %v807_v20 = vadd.f32 %v1242_v16, %v1571_v3 }
 0x142   : > { %927 = vst [vmem:[%s1499_s29 + $0x60] sm:$0xff] %v901_v19  ;;  %v942_v21 = vadd.f32 %v941_v6, %v901_v19  ;;  %v964_v22 = vmul.f32 %v901_v19, %v901_v19  ;;  %v904_v23 = vadd.f32 %v1306_v18, %v807_v20  ;;  %v1243_v24 = vpop.f32.mrb[28].mxu0 }
 0x143   : > { %v1307_v25 = vpop.f32.mrb[28].mxu1  ;;  %v1244_v26 = vpop.f32.mrb[29].mxu0 }
 0x144   : > { %v979_v27 = vadd.f32 %v978_v14, %v964_v22  ;;  %928 = vst [vmem:[%s1499_s29 + $0x68] sm:$0xff] %v904_v23  ;;  %v943_v28 = vadd.f32 %v942_v21, %v904_v23  ;;  %v965_v29 = vmul.f32 %v904_v23, %v904_v23  ;;  %v1245_v30 = vadd.f32 %v1244_v26, %v1243_v24  ;;  %v1308_v31 = vpop.f32.mrb[29].mxu1  ;;  %v1246_v32 = vpop.f32.mrb[30].mxu0 }
 0x145   : > { %v1309_v33 = vadd.f32 %v1308_v31, %v1307_v25  ;;  %v1310_v34 = vpop.f32.mrb[30].mxu1  ;;  %v1247_v35 = vpop.f32.mrb[31].mxu0 }
 0x146   : > { %v980_v36 = vadd.f32 %v979_v27, %v965_v29  ;;  %v812_v37 = vadd.f32 %v1245_v30, %v1571_v3  ;;  %v1248_v38 = vadd.f32 %v1247_v35, %v1246_v32  ;;  %v1311_v39 = vpop.f32.mrb[31].mxu1 }
 0x147   : > { %v1312_v40 = vadd.f32 %v1311_v39, %v1310_v34 }
 0x148   : > { %v909_v41 = vadd.f32 %v1309_v33, %v812_v37  ;;  %v815_v42 = vadd.f32 %v1248_v38, %v1571_v3 }
 0x14a   : > { %929 = vst [vmem:[%s1499_s29 + $0x70] sm:$0xff] %v909_v41  ;;  %v944_v43 = vadd.f32 %v943_v28, %v909_v41  ;;  %v966_v44 = vmul.f32 %v909_v41, %v909_v41  ;;  %v912_v45 = vadd.f32 %v1312_v40, %v815_v42 }
 0x14c   : > { %v981_v46 = vadd.f32 %v980_v36, %v966_v44  ;;  %930 = vst [vmem:[%s1499_s29 + $0x78] sm:$0xff] %v912_v45  ;;  %v945_v47 = vadd.f32 %v944_v43, %v912_v45  ;;  %v967_v48 = vmul.f32 %v912_v45, %v912_v45 }
 0x14e   : > { %v946_v49 = vrot.slane %v945_v47, 4  ;;  %v982_v50 = vadd.f32 %v981_v46, %v967_v48 }
 0x150   : > { %v947_v51 = vadd.f32 %v946_v49, %v945_v47  ;;  %v983_v52 = vrot.slane %v982_v50, 4 }
 0x152   : > { %v948_v53 = vrot.slane %v947_v51, 2  ;;  %v984_v54 = vadd.f32 %v983_v52, %v982_v50 }
 0x154   : > { %v949_v55 = vadd.f32 %v948_v53, %v947_v51  ;;  %v985_v56 = vrot.slane %v984_v54, 2 }
 0x156   : > { %v950_v57 = vrot.slane %v949_v55, 1  ;;  %v986_v58 = vadd.f32 %v985_v56, %v984_v54 }
 0x158   : > { %v987_v59 = vrot.slane %v986_v58, 1  ;;  %v951_v3 = vadd.f32 %v950_v57, %v949_v55 }
 0x15a   : > { %v988_v60 = vadd.f32 %v987_v59, %v986_v58 }
 0x15c   : > { %v991_v62 = vsel %vm990_vm0, %v951_v3, %v988_v60 }
 0x15d   : > { %v992_v63 = vadd.f32 %v991_v62, %v989_v61 }
 0x15f   : > { %993 = vst [vmem:[%s1624_s4] sm:$0x3] %v992_v63 }
 0x160 PF: > { %s15_s17 = sadd.s32 1, %s1440_s17   ;;  %s1625_s15 = smov %s1436_s16 }
 0x161   : > { %p12_p6 = scmp.ge.s32.totalorder %s15_s17, 6   ;;  %s1626_s16 = smov %s1628_s18 }
 0x163   :  { %14 = sbr.rel (!%p12_p6) target bundleno = 2 (0x2), region = 77 }

// kernel: generator_forward.10
= control target key start
LH: loop header
LB: loop body
LE: loop exit
PB: predicated region body
PF: predicated region fallthrough
CT: control target
= control target key end

     0   :  { %s1030_s0 = inlined_call_operand.vmem [shape: f32[512,128], index: 0, kind: input, shape index: {}]   ;;  %s1031_s1 = inlined_call_operand.vmem [shape: f32[1,128], index: 1, kind: input, shape index: {}]   ;;  %s1032_s2 = inlined_call_operand.vmem [shape: f32[1,128], index: 2, kind: input, shape index: {}]   ;;  %s1033_s3 = inlined_call_operand.vmem [shape: f32[512,128], index: 3, kind: output, shape index: {}]  }
   0x1   :  { %v14_v0 = vld [vmem:[%s1030_s0] sm:$0xff]  ;;  %v15_v4 = vld [vmem:[%s1030_s0 + $0x8] sm:$0xff]  ;;  %v16_v5 = vld [vmem:[%s1030_s0 + $0x10] sm:$0xff] }
   0x2   :  { %v508_v1 = vld [vmem:[%s1031_s1] ss:$0 sm:$0xff]  ;;  %v17_v6 = vld [vmem:[%s1030_s0 + $0x18] sm:$0xff]  ;;  %v19_v11 = vld [vmem:[%s1030_s0 + $0x28] sm:$0xff] }
   0x3   :  { %v513_v2 = vld [vmem:[%s1032_s2] ss:$0 sm:$0xff]  ;;  %v85_v3 = vmul.f32 %v508_v1, %v14_v0  ;;  %v86_v7 = vmul.f32 %v508_v1, %v15_v4  ;;  %v87_v8 = vmul.f32 %v508_v1, %v16_v5  ;;  %v88_v9 = vmul.f32 %v508_v1, %v17_v6  ;;  %v20_v12 = vld [vmem:[%s1030_s0 + $0x30] sm:$0xff]  ;;  %v21_v17 = vld [vmem:[%s1030_s0 + $0x38] sm:$0xff] }
   0x4   :  { %v18_v10 = vld [vmem:[%s1030_s0 + $0x20] sm:$0xff]  ;;  %v90_v15 = vmul.f32 %v508_v1, %v19_v11  ;;  %v91_v16 = vmul.f32 %v508_v1, %v20_v12  ;;  %v92_v21 = vmul.f32 %v508_v1, %v21_v17  ;;  %v23_v30 = vld [vmem:[%s1030_s0 + $0x48] sm:$0xff]  ;;  %v24_v31 = vld [vmem:[%s1030_s0 + $0x50] sm:$0xff] }
   0x5   :  { %v156_v13 = vadd.f32 %v513_v2, %v85_v3  ;;  %v89_v14 = vmul.f32 %v508_v1, %v18_v10  ;;  %v157_v18 = vadd.f32 %v513_v2, %v86_v7  ;;  %v158_v19 = vadd.f32 %v513_v2, %v87_v8  ;;  %v22_v25 = vld [vmem:[%s1030_s0 + $0x40] sm:$0xff]  ;;  %v25_v43 = vld [vmem:[%s1030_s0 + $0x58] sm:$0xff]  ;;  %v27_v45 = vld [vmem:[%s1030_s0 + $0x68] sm:$0xff] }
   0x6   :  { %v159_v20 = vadd.f32 %v513_v2, %v88_v9  ;;  %v161_v24 = vadd.f32 %v513_v2, %v90_v15  ;;  %v162_v37 = vadd.f32 %v513_v2, %v91_v16  ;;  %v163_v38 = vadd.f32 %v513_v2, %v92_v21  ;;  %v26_v44 = vld [vmem:[%s1030_s0 + $0x60] sm:$0xff]  ;;  %v28_v56 = vld [vmem:[%s1030_s0 + $0x70] sm:$0xff]  ;;  %v29_v4 = vld [vmem:[%s1030_s0 + $0x78] sm:$0xff] }
   0x7   :  { %vm220_vm0 = vcmp.gt.f32.partialorder %v156_v13, 0.0  ;;  %v284_v22 = vmul.f32 0.2, %v156_v13  ;;  %v160_v23 = vadd.f32 %v513_v2, %v89_v14  ;;  %vm221_vm1 = vcmp.gt.f32.partialorder %v157_v18, 0.0  ;;  %v30_v5 = vld [vmem:[%s1030_s0 + $0x80] sm:$0xff]  ;;  %v31_v9 = vld [vmem:[%s1030_s0 + $0x88] sm:$0xff] }
   0x8   :  { %v285_v26 = vmul.f32 0.2, %v157_v18  ;;  %vm222_vm2 = vcmp.gt.f32.partialorder %v158_v19, 0.0  ;;  %v286_v27 = vmul.f32 0.2, %v158_v19  ;;  %vm223_vm3 = vcmp.gt.f32.partialorder %v159_v20, 0.0 }
   0x9   :  { %v348_v28 = vsel %vm220_vm0, %v156_v13, %v284_v22  ;;  %v287_v29 = vmul.f32 0.2, %v159_v20  ;;  %vm224_vm4 = vcmp.gt.f32.partialorder %v160_v23, 0.0  ;;  %v288_v34 = vmul.f32 0.2, %v160_v23  ;;  %v32_v10 = vld [vmem:[%s1030_s0 + $0x90] sm:$0xff] }
   0xa   :  { %412 = vst [vmem:[%s1033_s3] sm:$0xff] %v348_v28  ;;  %v349_v32 = vsel %vm221_vm1, %v157_v18, %v285_v26  ;;  %v350_v33 = vsel %vm222_vm2, %v158_v19, %v286_v27  ;;  %vm225_vm5 = vcmp.gt.f32.partialorder %v161_v24, 0.0  ;;  %v289_v36 = vmul.f32 0.2, %v161_v24  ;;  %v33_v17 = vld [vmem:[%s1030_s0 + $0x98] sm:$0xff]  ;;  %v34_v18 = vld [vmem:[%s1030_s0 + $0xa0] sm:$0xff] }
   0xb   :  { %413 = vst [vmem:[%s1033_s3 + $0x8] sm:$0xff] %v349_v32  ;;  %414 = vst [vmem:[%s1033_s3 + $0x10] sm:$0xff] %v350_v33  ;;  %v351_v35 = vsel %vm223_vm3, %v159_v20, %v287_v29  ;;  %v352_v39 = vsel %vm224_vm4, %v160_v23, %v288_v34  ;;  %v93_v40 = vmul.f32 %v508_v1, %v22_v25  ;;  %vm226_vm6 = vcmp.gt.f32.partialorder %v162_v37, 0.0  ;;  %v35_v32 = vld [vmem:[%s1030_s0 + $0xa8] sm:$0xff]  ;;  %v36_v33 = vld [vmem:[%s1030_s0 + $0xb0] sm:$0xff] }
   0xc   :  { %415 = vst [vmem:[%s1033_s3 + $0x18] sm:$0xff] %v351_v35  ;;  %v94_v41 = vmul.f32 %v508_v1, %v23_v30  ;;  %v95_v42 = vmul.f32 %v508_v1, %v24_v31  ;;  %416 = vst [vmem:[%s1033_s3 + $0x20] sm:$0xff] %v352_v39  ;;  %v353_v46 = vsel %vm225_vm5, %v161_v24, %v289_v36  ;;  %v290_v47 = vmul.f32 0.2, %v162_v37 }
   0xd   :  { %vm227_vm7 = vcmp.gt.f32.partialorder %v163_v38, 0.0  ;;  %417 = vst [vmem:[%s1033_s3 + $0x28] sm:$0xff] %v353_v46  ;;  %v291_v48 = vmul.f32 0.2, %v163_v38  ;;  %v164_v49 = vadd.f32 %v513_v2, %v93_v40  ;;  %v96_v53 = vmul.f32 %v508_v1, %v25_v43  ;;  %v37_v40 = vld [vmem:[%s1030_s0 + $0xb8] sm:$0xff]  ;;  %v39_v46 = vld [vmem:[%s1030_s0 + $0xc8] sm:$0xff] }
   0xe   :  { %v165_v50 = vadd.f32 %v513_v2, %v94_v41  ;;  %v166_v51 = vadd.f32 %v513_v2, %v95_v42  ;;  %v354_v52 = vsel %vm226_vm6, %v162_v37, %v290_v47  ;;  %v97_v54 = vmul.f32 %v508_v1, %v26_v44  ;;  %v40_v47 = vld [vmem:[%s1030_s0 + $0xd0] sm:$0xff] }
   0xf   :  { %v98_v55 = vmul.f32 %v508_v1, %v27_v45  ;;  %418 = vst [vmem:[%s1033_s3 + $0x30] sm:$0xff] %v354_v52  ;;  %v355_v57 = vsel %vm227_vm7, %v163_v38, %v291_v48  ;;  %vm228_vm8 = vcmp.gt.f32.partialorder %v164_v49, 0.0  ;;  %v292_v58 = vmul.f32 0.2, %v164_v49  ;;  %v38_v45 = vld [vmem:[%s1030_s0 + $0xc0] sm:$0xff] }
  0x10   :  { %vm229_vm9 = vcmp.gt.f32.partialorder %v165_v50, 0.0  ;;  %419 = vst [vmem:[%s1033_s3 + $0x38] sm:$0xff] %v355_v57  ;;  %v293_v59 = vmul.f32 0.2, %v165_v50  ;;  %vm230_vm10 = vcmp.gt.f32.partialorder %v166_v51, 0.0  ;;  %v167_v61 = vadd.f32 %v513_v2, %v96_v53 }
  0x11   :  { %v294_v60 = vmul.f32 0.2, %v166_v51  ;;  %v356_v62 = vsel %vm228_vm8, %v164_v49, %v292_v58  ;;  %v168_v63 = vadd.f32 %v513_v2, %v97_v54  ;;  %v169_v0 = vadd.f32 %v513_v2, %v98_v55  ;;  %v41_v58 = vld [vmem:[%s1030_s0 + $0xd8] sm:$0xff] }
  0x12   :  { %v99_v3 = vmul.f32 %v508_v1, %v28_v56  ;;  %420 = vst [vmem:[%s1033_s3 + $0x40] sm:$0xff] %v356_v62  ;;  %v357_v6 = vsel %vm229_vm9, %v165_v50, %v293_v59  ;;  %vm231_vm11 = vcmp.gt.f32.partialorder %v167_v61, 0.0  ;;  %v295_v8 = vmul.f32 0.2, %v167_v61  ;;  %v42_v59 = vld [vmem:[%s1030_s0 + $0xe0] sm:$0xff] }
  0x13   :  { %v358_v7 = vsel %vm230_vm10, %v166_v51, %v294_v60  ;;  %421 = vst [vmem:[%s1033_s3 + $0x48] sm:$0xff] %v357_v6  ;;  %vm232_vm12 = vcmp.gt.f32.partialorder %v168_v63, 0.0  ;;  %v296_v11 = vmul.f32 0.2, %v168_v63  ;;  %vm233_vm13 = vcmp.gt.f32.partialorder %v169_v0, 0.0 }
  0x14   :  { %422 = vst [vmem:[%s1033_s3 + $0x50] sm:$0xff] %v358_v7  ;;  %v297_v12 = vmul.f32 0.2, %v169_v0  ;;  %v359_v13 = vsel %vm231_vm11, %v167_v61, %v295_v8  ;;  %v170_v14 = vadd.f32 %v513_v2, %v99_v3  ;;  %v100_v15 = vmul.f32 %v508_v1, %v29_v4 }
  0x15   :  { %v101_v16 = vmul.f32 %v508_v1, %v30_v5  ;;  %423 = vst [vmem:[%s1033_s3 + $0x58] sm:$0xff] %v359_v13  ;;  %v360_v19 = vsel %vm232_vm12, %v168_v63, %v296_v11  ;;  %v102_v21 = vmul.f32 %v508_v1, %v31_v9  ;;  %v103_v22 = vmul.f32 %v508_v1, %v32_v10  ;;  %v43_v10 = vld [vmem:[%s1030_s0 + $0xe8] sm:$0xff]  ;;  %v44_v11 = vld [vmem:[%s1030_s0 + $0xf0] sm:$0xff] }
  0x16   :  { %v361_v20 = vsel %vm233_vm13, %v169_v0, %v297_v12  ;;  %424 = vst [vmem:[%s1033_s3 + $0x60] sm:$0xff] %v360_v19  ;;  %vm234_vm14 = vcmp.gt.f32.partialorder %v170_v14, 0.0  ;;  %v298_v23 = vmul.f32 0.2, %v170_v14  ;;  %v171_v24 = vadd.f32 %v513_v2, %v100_v15 }
  0x17   :  { %425 = vst [vmem:[%s1033_s3 + $0x68] sm:$0xff] %v361_v20  ;;  %v172_v25 = vadd.f32 %v513_v2, %v101_v16  ;;  %v173_v26 = vadd.f32 %v513_v2, %v102_v21  ;;  %v174_v27 = vadd.f32 %v513_v2, %v103_v22  ;;  %v104_v28 = vmul.f32 %v508_v1, %v33_v17 }
  0x18   :  { %v105_v29 = vmul.f32 %v508_v1, %v34_v18  ;;  %v362_v30 = vsel %vm234_vm14, %v170_v14, %v298_v23  ;;  %vm235_vm15 = vcmp.gt.f32.partialorder %v171_v24, 0.0  ;;  %v299_v31 = vmul.f32 0.2, %v171_v24  ;;  %v45_v18 = vld [vmem:[%s1030_s0 + $0xf8] sm:$0xff]  ;;  %v46_v23 = vld [vmem:[%s1030_s0 + $0x100] sm:$0xff] }
  0x19   :  { %vm236_vm0 = vcmp.gt.f32.partialorder %v172_v25, 0.0  ;;  %426 = vst [vmem:[%s1033_s3 + $0x70] sm:$0xff] %v362_v30  ;;  %v300_v34 = vmul.f32 0.2, %v172_v25  ;;  %vm237_vm1 = vcmp.gt.f32.partialorder %v173_v26, 0.0  ;;  %vm238_vm2 = vcmp.gt.f32.partialorder %v174_v27, 0.0 }
  0x1a   :  { %v301_v35 = vmul.f32 0.2, %v173_v26  ;;  %v363_v36 = vsel %vm235_vm15, %v171_v24, %v299_v31  ;;  %v302_v37 = vmul.f32 0.2, %v174_v27  ;;  %v175_v38 = vadd.f32 %v513_v2, %v104_v28  ;;  %v47_v24 = vld [vmem:[%s1030_s0 + $0x108] sm:$0xff] }
  0x1b   :  { %v176_v39 = vadd.f32 %v513_v2, %v105_v29  ;;  %427 = vst [vmem:[%s1033_s3 + $0x78] sm:$0xff] %v363_v36  ;;  %v364_v41 = vsel %vm236_vm0, %v172_v25, %v300_v34  ;;  %v106_v43 = vmul.f32 %v508_v1, %v35_v32  ;;  %v107_v44 = vmul.f32 %v508_v1, %v36_v33  ;;  %v48_v25 = vld [vmem:[%s1030_s0 + $0x110] sm:$0xff]  ;;  %v49_v36 = vld [vmem:[%s1030_s0 + $0x118] sm:$0xff] }
  0x1c   :  { %v365_v42 = vsel %vm237_vm1, %v173_v26, %v301_v35  ;;  %428 = vst [vmem:[%s1033_s3 + $0x80] sm:$0xff] %v364_v41  ;;  %v366_v48 = vsel %vm238_vm2, %v174_v27, %v302_v37  ;;  %vm239_vm3 = vcmp.gt.f32.partialorder %v175_v38, 0.0  ;;  %v303_v49 = vmul.f32 0.2, %v175_v38  ;;  %v50_v37 = vld [vmem:[%s1030_s0 + $0x120] sm:$0xff] }
  0x1d   :  { %429 = vst [vmem:[%s1033_s3 + $0x88] sm:$0xff] %v365_v42  ;;  %vm240_vm4 = vcmp.gt.f32.partialorder %v176_v39, 0.0  ;;  %430 = vst [vmem:[%s1033_s3 + $0x90] sm:$0xff] %v366_v48  ;;  %v304_v50 = vmul.f32 0.2, %v176_v39  ;;  %v177_v51 = vadd.f32 %v513_v2, %v106_v43  ;;  %v178_v52 = vadd.f32 %v513_v2, %v107_v44 }
  0x1e   :  { %v108_v53 = vmul.f32 %v508_v1, %v37_v40  ;;  %v367_v54 = vsel %vm239_vm3, %v175_v38, %v303_v49  ;;  %v109_v55 = vmul.f32 %v508_v1, %v38_v45  ;;  %v110_v56 = vmul.f32 %v508_v1, %v39_v46 }
  0x1f   :  { %v111_v57 = vmul.f32 %v508_v1, %v40_v47  ;;  %431 = vst [vmem:[%s1033_s3 + $0x98] sm:$0xff] %v367_v54  ;;  %v368_v60 = vsel %vm240_vm4, %v176_v39, %v304_v50  ;;  %vm241_vm5 = vcmp.gt.f32.partialorder %v177_v51, 0.0  ;;  %v305_v61 = vmul.f32 0.2, %v177_v51  ;;  %v51_v50 = vld [vmem:[%s1030_s0 + $0x128] sm:$0xff] }
  0x20   :  { %vm242_vm6 = vcmp.gt.f32.partialorder %v178_v52, 0.0  ;;  %432 = vst [vmem:[%s1033_s3 + $0xa0] sm:$0xff] %v368_v60  ;;  %v306_v62 = vmul.f32 0.2, %v178_v52  ;;  %v179_v63 = vadd.f32 %v513_v2, %v108_v53  ;;  %v180_v0 = vadd.f32 %v513_v2, %v109_v55 }
  0x21   :  { %v181_v3 = vadd.f32 %v513_v2, %v110_v56  ;;  %v369_v4 = vsel %vm241_vm5, %v177_v51, %v305_v61  ;;  %v182_v5 = vadd.f32 %v513_v2, %v111_v57  ;;  %v112_v6 = vmul.f32 %v508_v1, %v41_v58  ;;  %v52_v51 = vld [vmem:[%s1030_s0 + $0x130] sm:$0xff]  ;;  %v53_v58 = vld [vmem:[%s1030_s0 + $0x138] sm:$0xff] }
  0x22   :  { %v113_v7 = vmul.f32 %v508_v1, %v42_v59  ;;  %433 = vst [vmem:[%s1033_s3 + $0xa8] sm:$0xff] %v369_v4  ;;  %v370_v8 = vsel %vm242_vm6, %v178_v52, %v306_v62  ;;  %vm243_vm7 = vcmp.gt.f32.partialorder %v179_v63, 0.0  ;;  %v307_v9 = vmul.f32 0.2, %v179_v63 }
  0x23   :  { %vm244_vm8 = vcmp.gt.f32.partialorder %v180_v0, 0.0  ;;  %434 = vst [vmem:[%s1033_s3 + $0xb0] sm:$0xff] %v370_v8  ;;  %v308_v12 = vmul.f32 0.2, %v180_v0  ;;  %vm245_vm9 = vcmp.gt.f32.partialorder %v181_v3, 0.0  ;;  %vm246_vm10 = vcmp.gt.f32.partialorder %v182_v5, 0.0 }
  0x24   :  { %v309_v13 = vmul.f32 0.2, %v181_v3  ;;  %v371_v14 = vsel %vm243_vm7, %v179_v63, %v307_v9  ;;  %v310_v15 = vmul.f32 0.2, %v182_v5  ;;  %v183_v16 = vadd.f32 %v513_v2, %v112_v6  ;;  %v54_v63 = vld [vmem:[%s1030_s0 + $0x140] sm:$0xff] }
  0x25   :  { %v184_v17 = vadd.f32 %v513_v2, %v113_v7  ;;  %435 = vst [vmem:[%s1033_s3 + $0xb8] sm:$0xff] %v371_v14  ;;  %v372_v19 = vsel %vm244_vm8, %v180_v0, %v308_v12  ;;  %v114_v21 = vmul.f32 %v508_v1, %v43_v10  ;;  %v115_v22 = vmul.f32 %v508_v1, %v44_v11  ;;  %v55_v0 = vld [vmem:[%s1030_s0 + $0x148] sm:$0xff]  ;;  %v57_v14 = vld [vmem:[%s1030_s0 + $0x158] sm:$0xff] }
  0x26   :  { %v373_v20 = vsel %vm245_vm9, %v181_v3, %v309_v13  ;;  %436 = vst [vmem:[%s1033_s3 + $0xc0] sm:$0xff] %v372_v19  ;;  %v374_v26 = vsel %vm246_vm10, %v182_v5, %v310_v15  ;;  %vm247_vm11 = vcmp.gt.f32.partialorder %v183_v16, 0.0  ;;  %v311_v27 = vmul.f32 0.2, %v183_v16  ;;  %v56_v3 = vld [vmem:[%s1030_s0 + $0x150] sm:$0xff]  ;;  %v58_v15 = vld [vmem:[%s1030_s0 + $0x160] sm:$0xff] }
  0x27   :  { %437 = vst [vmem:[%s1033_s3 + $0xc8] sm:$0xff] %v373_v20  ;;  %vm248_vm12 = vcmp.gt.f32.partialorder %v184_v17, 0.0  ;;  %438 = vst [vmem:[%s1033_s3 + $0xd0] sm:$0xff] %v374_v26  ;;  %v312_v28 = vmul.f32 0.2, %v184_v17  ;;  %v185_v29 = vadd.f32 %v513_v2, %v114_v21  ;;  %v186_v30 = vadd.f32 %v513_v2, %v115_v22 }
  0x28   :  { %v116_v31 = vmul.f32 %v508_v1, %v45_v18  ;;  %v375_v32 = vsel %vm247_vm11, %v183_v16, %v311_v27  ;;  %v117_v33 = vmul.f32 %v508_v1, %v46_v23  ;;  %v118_v34 = vmul.f32 %v508_v1, %v47_v24 }
  0x29   :  { %v119_v35 = vmul.f32 %v508_v1, %v48_v25  ;;  %439 = vst [vmem:[%s1033_s3 + $0xd8] sm:$0xff] %v375_v32  ;;  %v376_v38 = vsel %vm248_vm12, %v184_v17, %v312_v28  ;;  %vm249_vm13 = vcmp.gt.f32.partialorder %v185_v29, 0.0  ;;  %v313_v39 = vmul.f32 0.2, %v185_v29  ;;  %v59_v28 = vld [vmem:[%s1030_s0 + $0x168] sm:$0xff] }
  0x2a   :  { %vm250_vm14 = vcmp.gt.f32.partialorder %v186_v30, 0.0  ;;  %440 = vst [vmem:[%s1033_s3 + $0xe0] sm:$0xff] %v376_v38  ;;  %v314_v40 = vmul.f32 0.2, %v186_v30  ;;  %v187_v41 = vadd.f32 %v513_v2, %v116_v31  ;;  %v188_v42 = vadd.f32 %v513_v2, %v117_v33 }
  0x2b   :  { %v189_v43 = vadd.f32 %v513_v2, %v118_v34  ;;  %v377_v44 = vsel %vm249_vm13, %v185_v29, %v313_v39  ;;  %v190_v45 = vadd.f32 %v513_v2, %v119_v35  ;;  %v120_v46 = vmul.f32 %v508_v1, %v49_v36  ;;  %v60_v29 = vld [vmem:[%s1030_s0 + $0x170] sm:$0xff]  ;;  %v61_v36 = vld [vmem:[%s1030_s0 + $0x178] sm:$0xff] }
  0x2c   :  { %v121_v47 = vmul.f32 %v508_v1, %v50_v37  ;;  %441 = vst [vmem:[%s1033_s3 + $0xe8] sm:$0xff] %v377_v44  ;;  %v378_v48 = vsel %vm250_vm14, %v186_v30, %v314_v40  ;;  %vm251_vm15 = vcmp.gt.f32.partialorder %v187_v41, 0.0  ;;  %v315_v49 = vmul.f32 0.2, %v187_v41 }
  0x2d   :  { %vm252_vm0 = vcmp.gt.f32.partialorder %v188_v42, 0.0  ;;  %442 = vst [vmem:[%s1033_s3 + $0xf0] sm:$0xff] %v378_v48  ;;  %v316_v52 = vmul.f32 0.2, %v188_v42  ;;  %vm253_vm1 = vcmp.gt.f32.partialorder %v189_v43, 0.0  ;;  %vm254_vm2 = vcmp.gt.f32.partialorder %v190_v45, 0.0 }
  0x2e   :  { %v317_v53 = vmul.f32 0.2, %v189_v43  ;;  %v379_v54 = vsel %vm251_vm15, %v187_v41, %v315_v49  ;;  %v318_v55 = vmul.f32 0.2, %v190_v45  ;;  %v191_v56 = vadd.f32 %v513_v2, %v120_v46  ;;  %v62_v41 = vld [vmem:[%s1030_s0 + $0x180] sm:$0xff] }
  0x2f   :  { %v192_v57 = vadd.f32 %v513_v2, %v121_v47  ;;  %443 = vst [vmem:[%s1033_s3 + $0xf8] sm:$0xff] %v379_v54  ;;  %v380_v59 = vsel %vm252_vm0, %v188_v42, %v316_v52  ;;  %v122_v61 = vmul.f32 %v508_v1, %v51_v50  ;;  %v123_v62 = vmul.f32 %v508_v1, %v52_v51  ;;  %v63_v42 = vld [vmem:[%s1030_s0 + $0x188] sm:$0xff]  ;;  %v65_v54 = vld [vmem:[%s1030_s0 + $0x198] sm:$0xff] }
  0x30   :  { %v381_v60 = vsel %vm253_vm1, %v189_v43, %v317_v53  ;;  %444 = vst [vmem:[%s1033_s3 + $0x100] sm:$0xff] %v380_v59  ;;  %v382_v4 = vsel %vm254_vm2, %v190_v45, %v318_v55  ;;  %vm255_vm3 = vcmp.gt.f32.partialorder %v191_v56, 0.0  ;;  %v319_v5 = vmul.f32 0.2, %v191_v56  ;;  %v64_v43 = vld [vmem:[%s1030_s0 + $0x190] sm:$0xff]  ;;  %v66_v55 = vld [vmem:[%s1030_s0 + $0x1a0] sm:$0xff] }
  0x31   :  { %445 = vst [vmem:[%s1033_s3 + $0x108] sm:$0xff] %v381_v60  ;;  %vm256_vm4 = vcmp.gt.f32.partialorder %v192_v57, 0.0  ;;  %446 = vst [vmem:[%s1033_s3 + $0x110] sm:$0xff] %v382_v4  ;;  %v320_v6 = vmul.f32 0.2, %v192_v57  ;;  %v193_v7 = vadd.f32 %v513_v2, %v122_v61  ;;  %v194_v8 = vadd.f32 %v513_v2, %v123_v62 }
  0x32   :  { %v124_v9 = vmul.f32 %v508_v1, %v53_v58  ;;  %v383_v10 = vsel %vm255_vm3, %v191_v56, %v319_v5  ;;  %v125_v11 = vmul.f32 %v508_v1, %v54_v63  ;;  %v126_v12 = vmul.f32 %v508_v1, %v55_v0 }
  0x33   :  { %v127_v13 = vmul.f32 %v508_v1, %v56_v3  ;;  %447 = vst [vmem:[%s1033_s3 + $0x118] sm:$0xff] %v383_v10  ;;  %v384_v16 = vsel %vm256_vm4, %v192_v57, %v320_v6  ;;  %vm257_vm5 = vcmp.gt.f32.partialorder %v193_v7, 0.0  ;;  %v321_v17 = vmul.f32 0.2, %v193_v7  ;;  %v67_v6 = vld [vmem:[%s1030_s0 + $0x1a8] sm:$0xff] }
  0x34   :  { %vm258_vm6 = vcmp.gt.f32.partialorder %v194_v8, 0.0  ;;  %448 = vst [vmem:[%s1033_s3 + $0x120] sm:$0xff] %v384_v16  ;;  %v322_v18 = vmul.f32 0.2, %v194_v8  ;;  %v195_v19 = vadd.f32 %v513_v2, %v124_v9  ;;  %v196_v20 = vadd.f32 %v513_v2, %v125_v11 }
  0x35   :  { %v197_v21 = vadd.f32 %v513_v2, %v126_v12  ;;  %v385_v22 = vsel %vm257_vm5, %v193_v7, %v321_v17  ;;  %v198_v23 = vadd.f32 %v513_v2, %v127_v13  ;;  %v128_v24 = vmul.f32 %v508_v1, %v57_v14  ;;  %v68_v7 = vld [vmem:[%s1030_s0 + $0x1b0] sm:$0xff]  ;;  %v69_v14 = vld [vmem:[%s1030_s0 + $0x1b8] sm:$0xff] }
  0x36   :  { %v129_v25 = vmul.f32 %v508_v1, %v58_v15  ;;  %449 = vst [vmem:[%s1033_s3 + $0x128] sm:$0xff] %v385_v22  ;;  %v386_v26 = vsel %vm258_vm6, %v194_v8, %v322_v18  ;;  %vm259_vm7 = vcmp.gt.f32.partialorder %v195_v19, 0.0  ;;  %v323_v27 = vmul.f32 0.2, %v195_v19 }
  0x37   :  { %vm260_vm8 = vcmp.gt.f32.partialorder %v196_v20, 0.0  ;;  %450 = vst [vmem:[%s1033_s3 + $0x130] sm:$0xff] %v386_v26  ;;  %v324_v30 = vmul.f32 0.2, %v196_v20  ;;  %vm261_vm9 = vcmp.gt.f32.partialorder %v197_v21, 0.0  ;;  %vm262_vm10 = vcmp.gt.f32.partialorder %v198_v23, 0.0 }
  0x38   :  { %v325_v31 = vmul.f32 0.2, %v197_v21  ;;  %v387_v32 = vsel %vm259_vm7, %v195_v19, %v323_v27  ;;  %v326_v33 = vmul.f32 0.2, %v198_v23  ;;  %v199_v34 = vadd.f32 %v513_v2, %v128_v24  ;;  %v70_v19 = vld [vmem:[%s1030_s0 + $0x1c0] sm:$0xff] }
  0x39   :  { %v200_v35 = vadd.f32 %v513_v2, %v129_v25  ;;  %451 = vst [vmem:[%s1033_s3 + $0x138] sm:$0xff] %v387_v32  ;;  %v388_v37 = vsel %vm260_vm8, %v196_v20, %v324_v30  ;;  %v130_v39 = vmul.f32 %v508_v1, %v59_v28  ;;  %v131_v40 = vmul.f32 %v508_v1, %v60_v29  ;;  %v71_v20 = vld [vmem:[%s1030_s0 + $0x1c8] sm:$0xff]  ;;  %v73_v32 = vld [vmem:[%s1030_s0 + $0x1d8] sm:$0xff] }
  0x3a   :  { %v389_v38 = vsel %vm261_vm9, %v197_v21, %v325_v31  ;;  %452 = vst [vmem:[%s1033_s3 + $0x140] sm:$0xff] %v388_v37  ;;  %v390_v44 = vsel %vm262_vm10, %v198_v23, %v326_v33  ;;  %vm263_vm11 = vcmp.gt.f32.partialorder %v199_v34, 0.0  ;;  %v327_v45 = vmul.f32 0.2, %v199_v34  ;;  %v72_v21 = vld [vmem:[%s1030_s0 + $0x1d0] sm:$0xff]  ;;  %v74_v33 = vld [vmem:[%s1030_s0 + $0x1e0] sm:$0xff] }
  0x3b   :  { %453 = vst [vmem:[%s1033_s3 + $0x148] sm:$0xff] %v389_v38  ;;  %vm264_vm12 = vcmp.gt.f32.partialorder %v200_v35, 0.0  ;;  %454 = vst [vmem:[%s1033_s3 + $0x150] sm:$0xff] %v390_v44  ;;  %v328_v46 = vmul.f32 0.2, %v200_v35  ;;  %v201_v47 = vadd.f32 %v513_v2, %v130_v39  ;;  %v202_v48 = vadd.f32 %v513_v2, %v131_v40 }
  0x3c   :  { %v132_v49 = vmul.f32 %v508_v1, %v61_v36  ;;  %v391_v50 = vsel %vm263_vm11, %v199_v34, %v327_v45  ;;  %v133_v51 = vmul.f32 %v508_v1, %v62_v41  ;;  %v134_v52 = vmul.f32 %v508_v1, %v63_v42 }
  0x3d   :  { %v135_v53 = vmul.f32 %v508_v1, %v64_v43  ;;  %455 = vst [vmem:[%s1033_s3 + $0x158] sm:$0xff] %v391_v50  ;;  %v392_v56 = vsel %vm264_vm12, %v200_v35, %v328_v46  ;;  %vm265_vm13 = vcmp.gt.f32.partialorder %v201_v47, 0.0  ;;  %v329_v57 = vmul.f32 0.2, %v201_v47  ;;  %v75_v46 = vld [vmem:[%s1030_s0 + $0x1e8] sm:$0xff] }
  0x3e   :  { %vm266_vm14 = vcmp.gt.f32.partialorder %v202_v48, 0.0  ;;  %456 = vst [vmem:[%s1033_s3 + $0x160] sm:$0xff] %v392_v56  ;;  %v330_v58 = vmul.f32 0.2, %v202_v48  ;;  %v203_v59 = vadd.f32 %v513_v2, %v132_v49  ;;  %v204_v60 = vadd.f32 %v513_v2, %v133_v51 }
  0x3f   :  { %v205_v61 = vadd.f32 %v513_v2, %v134_v52  ;;  %v393_v62 = vsel %vm265_vm13, %v201_v47, %v329_v57  ;;  %v206_v63 = vadd.f32 %v513_v2, %v135_v53  ;;  %v136_v0 = vmul.f32 %v508_v1, %v65_v54  ;;  %v76_v47 = vld [vmem:[%s1030_s0 + $0x1f0] sm:$0xff]  ;;  %v77_v54 = vld [vmem:[%s1030_s0 + $0x1f8] sm:$0xff] }
  0x40   :  { %v137_v3 = vmul.f32 %v508_v1, %v66_v55  ;;  %457 = vst [vmem:[%s1033_s3 + $0x168] sm:$0xff] %v393_v62  ;;  %v394_v4 = vsel %vm266_vm14, %v202_v48, %v330_v58  ;;  %vm267_vm15 = vcmp.gt.f32.partialorder %v203_v59, 0.0  ;;  %v331_v5 = vmul.f32 0.2, %v203_v59 }
  0x41   :  { %vm268_vm0 = vcmp.gt.f32.partialorder %v204_v60, 0.0  ;;  %458 = vst [vmem:[%s1033_s3 + $0x170] sm:$0xff] %v394_v4  ;;  %v332_v8 = vmul.f32 0.2, %v204_v60  ;;  %vm269_vm1 = vcmp.gt.f32.partialorder %v205_v61, 0.0  ;;  %vm270_vm2 = vcmp.gt.f32.partialorder %v206_v63, 0.0 }
  0x42   :  { %v333_v9 = vmul.f32 0.2, %v205_v61  ;;  %v395_v10 = vsel %vm267_vm15, %v203_v59, %v331_v5  ;;  %v334_v11 = vmul.f32 0.2, %v206_v63  ;;  %v207_v12 = vadd.f32 %v513_v2, %v136_v0 }
  0x43   :  { %v208_v13 = vadd.f32 %v513_v2, %v137_v3  ;;  %459 = vst [vmem:[%s1033_s3 + $0x178] sm:$0xff] %v395_v10  ;;  %v396_v15 = vsel %vm268_vm0, %v204_v60, %v332_v8  ;;  %v138_v17 = vmul.f32 %v508_v1, %v67_v6  ;;  %v139_v18 = vmul.f32 %v508_v1, %v68_v7 }
  0x44   :  { %v397_v16 = vsel %vm269_vm1, %v205_v61, %v333_v9  ;;  %460 = vst [vmem:[%s1033_s3 + $0x180] sm:$0xff] %v396_v15  ;;  %v398_v22 = vsel %vm270_vm2, %v206_v63, %v334_v11  ;;  %vm271_vm3 = vcmp.gt.f32.partialorder %v207_v12, 0.0  ;;  %v335_v23 = vmul.f32 0.2, %v207_v12 }
  0x45   :  { %461 = vst [vmem:[%s1033_s3 + $0x188] sm:$0xff] %v397_v16  ;;  %vm272_vm4 = vcmp.gt.f32.partialorder %v208_v13, 0.0  ;;  %462 = vst [vmem:[%s1033_s3 + $0x190] sm:$0xff] %v398_v22  ;;  %v336_v24 = vmul.f32 0.2, %v208_v13  ;;  %v209_v25 = vadd.f32 %v513_v2, %v138_v17  ;;  %v210_v26 = vadd.f32 %v513_v2, %v139_v18 }
  0x46   :  { %v140_v27 = vmul.f32 %v508_v1, %v69_v14  ;;  %v399_v28 = vsel %vm271_vm3, %v207_v12, %v335_v23  ;;  %v141_v29 = vmul.f32 %v508_v1, %v70_v19  ;;  %v142_v30 = vmul.f32 %v508_v1, %v71_v20 }
  0x47   :  { %v143_v31 = vmul.f32 %v508_v1, %v72_v21  ;;  %463 = vst [vmem:[%s1033_s3 + $0x198] sm:$0xff] %v399_v28  ;;  %v400_v34 = vsel %vm272_vm4, %v208_v13, %v336_v24  ;;  %vm273_vm5 = vcmp.gt.f32.partialorder %v209_v25, 0.0  ;;  %v337_v35 = vmul.f32 0.2, %v209_v25 }
  0x48   :  { %vm274_vm6 = vcmp.gt.f32.partialorder %v210_v26, 0.0  ;;  %464 = vst [vmem:[%s1033_s3 + $0x1a0] sm:$0xff] %v400_v34  ;;  %v338_v36 = vmul.f32 0.2, %v210_v26  ;;  %v211_v37 = vadd.f32 %v513_v2, %v140_v27  ;;  %v212_v38 = vadd.f32 %v513_v2, %v141_v29 }
  0x49   :  { %v213_v39 = vadd.f32 %v513_v2, %v142_v30  ;;  %v401_v40 = vsel %vm273_vm5, %v209_v25, %v337_v35  ;;  %v214_v41 = vadd.f32 %v513_v2, %v143_v31  ;;  %v144_v42 = vmul.f32 %v508_v1, %v73_v32 }
  0x4a   :  { %v145_v43 = vmul.f32 %v508_v1, %v74_v33  ;;  %465 = vst [vmem:[%s1033_s3 + $0x1a8] sm:$0xff] %v401_v40  ;;  %v402_v44 = vsel %vm274_vm6, %v210_v26, %v338_v36  ;;  %vm275_vm7 = vcmp.gt.f32.partialorder %v211_v37, 0.0  ;;  %v339_v45 = vmul.f32 0.2, %v211_v37 }
  0x4b   :  { %vm276_vm8 = vcmp.gt.f32.partialorder %v212_v38, 0.0  ;;  %466 = vst [vmem:[%s1033_s3 + $0x1b0] sm:$0xff] %v402_v44  ;;  %v340_v48 = vmul.f32 0.2, %v212_v38  ;;  %vm277_vm9 = vcmp.gt.f32.partialorder %v213_v39, 0.0  ;;  %vm278_vm10 = vcmp.gt.f32.partialorder %v214_v41, 0.0 }
  0x4c   :  { %v341_v49 = vmul.f32 0.2, %v213_v39  ;;  %v403_v50 = vsel %vm275_vm7, %v211_v37, %v339_v45  ;;  %v342_v51 = vmul.f32 0.2, %v214_v41  ;;  %v215_v52 = vadd.f32 %v513_v2, %v144_v42 }
  0x4d   :  { %v216_v53 = vadd.f32 %v513_v2, %v145_v43  ;;  %467 = vst [vmem:[%s1033_s3 + $0x1b8] sm:$0xff] %v403_v50  ;;  %v404_v55 = vsel %vm276_vm8, %v212_v38, %v340_v48  ;;  %v146_v57 = vmul.f32 %v508_v1, %v75_v46  ;;  %v147_v58 = vmul.f32 %v508_v1, %v76_v47 }
  0x4e   :  { %v405_v56 = vsel %vm277_vm9, %v213_v39, %v341_v49  ;;  %468 = vst [vmem:[%s1033_s3 + $0x1c0] sm:$0xff] %v404_v55  ;;  %v406_v59 = vsel %vm278_vm10, %v214_v41, %v342_v51  ;;  %vm279_vm11 = vcmp.gt.f32.partialorder %v215_v52, 0.0  ;;  %v343_v60 = vmul.f32 0.2, %v215_v52 }
  0x4f   :  { %469 = vst [vmem:[%s1033_s3 + $0x1c8] sm:$0xff] %v405_v56  ;;  %vm280_vm12 = vcmp.gt.f32.partialorder %v216_v53, 0.0  ;;  %470 = vst [vmem:[%s1033_s3 + $0x1d0] sm:$0xff] %v406_v59  ;;  %v344_v61 = vmul.f32 0.2, %v216_v53  ;;  %v217_v62 = vadd.f32 %v513_v2, %v146_v57  ;;  %v218_v63 = vadd.f32 %v513_v2, %v147_v58 }
  0x50   :  { %v148_v0 = vmul.f32 %v508_v1, %v77_v54  ;;  %v407_v3 = vsel %vm279_vm11, %v215_v52, %v343_v60 }
  0x51   :  { %471 = vst [vmem:[%s1033_s3 + $0x1d8] sm:$0xff] %v407_v3  ;;  %v408_v4 = vsel %vm280_vm12, %v216_v53, %v344_v61  ;;  %vm281_vm13 = vcmp.gt.f32.partialorder %v217_v62, 0.0  ;;  %v345_v5 = vmul.f32 0.2, %v217_v62  ;;  %vm282_vm14 = vcmp.gt.f32.partialorder %v218_v63, 0.0 }
  0x52   :  { %472 = vst [vmem:[%s1033_s3 + $0x1e0] sm:$0xff] %v408_v4  ;;  %v346_v6 = vmul.f32 0.2, %v218_v63  ;;  %v219_v7 = vadd.f32 %v513_v2, %v148_v0 }
  0x53   :  { %v409_v8 = vsel %vm281_vm13, %v217_v62, %v345_v5 }
  0x54   :  { %473 = vst [vmem:[%s1033_s3 + $0x1e8] sm:$0xff] %v409_v8  ;;  %v410_v1 = vsel %vm282_vm14, %v218_v63, %v346_v6  ;;  %vm283_vm15 = vcmp.gt.f32.partialorder %v219_v7, 0.0  ;;  %v347_v9 = vmul.f32 0.2, %v219_v7 }
  0x55   :  { %474 = vst [vmem:[%s1033_s3 + $0x1f0] sm:$0xff] %v410_v1 }
  0x56   :  { %v411_v10 = vsel %vm283_vm15, %v219_v7, %v347_v9 }
  0x57   :  { %475 = vst [vmem:[%s1033_s3 + $0x1f8] sm:$0xff] %v411_v10 }

// kernel: generator_forward.11
= control target key start
LH: loop header
LB: loop body
LE: loop exit
PB: predicated region body
PF: predicated region fallthrough
CT: control target
= control target key end

     0   :  { %s1711_s12 = smov 0   ;;  %s1713_s13 = smov 0   ;;  %s2006_s0 = inlined_call_operand.vmem [shape: bf16[4,512,256], index: 0, kind: input, shape index: {}]   ;;  %s2007_s1 = inlined_call_operand.vmem [shape: bf16[4,256,128], index: 1, kind: input, shape index: {}]   ;;  %s2008_s2 = inlined_call_operand.vmem [shape: f32[1,128], index: 2, kind: input, shape index: {}]   ;;  %s2009_s3 = inlined_call_operand.vmem [shape: f32[4,512,128], index: 3, kind: output, shape index: {}]  }
   0x1   :  { %s1715_s14 = smov 0  }
   0x2 LB: > { %s25_s15 = sadd.s32 1, %s1684_s13  ;;  %p1276_p0 = scmp.ge.s32.totalorder %s1688_s14, 1  ;;  %s1688_s14 = sphi %s1715_s14, %s13_s14   ;;  %s1684_s13 = sphi %s1713_s13, %s2011_s13   ;;  %s1680_s12 = sphi %s1711_s12, %s2010_s12  }
   0x3   : > { %p27_p1 = scmp.ge.s32.totalorder %s25_s15, 4  ;;  %p169_p2 = scmp.lt.s32.totalorder %s1688_s14, 5 }
   0x5   : > { %s2013_s15 = smov (%p27_p1, %s25_s15), 0  ;;  %p170_p3 = pnand %p1276_p0, %p169_p2 }
   0x6   : > { %p208_p4 = scmp.lt.s32.totalorder (!%p170_p3), %s1680_s12, 3  ;;  %v1690_v0 = vmov (!%p170_p3), 0  }
   0x7   : > { %173 = sbr.rel (%p170_p3) target bundleno = 430 (0x1ae), region = 32  ;;  %753 = vmatprep.subr.bf16.mxu0 (!%p170_p3), %v1690_v0  ;;  %1369 = vmatprep.subr.bf16.mxu1 (!%p170_p3), %v1690_v0 }
   0xe   : > { %s2015_s12 = smov (!%p208_p4, %s1680_s12), 3 }
   0xf   : > { %s1367_s16 = sshll.u32 %s2015_s12, 7  ;;  %s1366_s20 = sshll.u32 %s2015_s12, 9 }
  0x10   : > { %s1737_s19 = scalar_lea.vmem %s2007_s1, %s1367_s16  ;;  %s1756_s23 = scalar_lea.vmem %s2006_s0, %s1366_s20 }
  0x11   : > { %v1426_v1 = vld [vmem:[%s1737_s19] sm:$0xff]   ;;  %v1427_v2 = vld [vmem:[%s1737_s19 + $0x8] sm:$0xff]   ;;  %v1428_v3 = vld [vmem:[%s1737_s19 + $0x10] sm:$0xff]   ;;  %s1873_s28 = scalar_lea.vmem %s2009_s3, %s1366_s20 }
  0x12   : > { %754 = vmatpush1.bf16.msra.mxu0 %v1426_v1  ;;  %1385 = vmatpush1.bf16.msra.mxu1 %v1426_v1  ;;  %v1429_v4 = vld [vmem:[%s1737_s19 + $0x18] sm:$0xff]   ;;  %v1430_v5 = vld [vmem:[%s1737_s19 + $0x20] sm:$0xff]   ;;  %v1431_v7 = vld [vmem:[%s1737_s19 + $0x28] sm:$0xff]  }
  0x13   : > { %755 = vmatprep.subr.bf16.mxu0 %v1690_v0  ;;  %1370 = vmatprep.subr.bf16.mxu1 %v1690_v0  ;;  %v1444_v6 = vld [vmem:[%s1756_s23 + $0x4] ss:$8 sps:$4 sm:$0xff]   ;;  %v1432_v9 = vld [vmem:[%s1737_s19 + $0x30] sm:$0xff]   ;;  %v1433_v10 = vld [vmem:[%s1737_s19 + $0x38] sm:$0xff]  }
  0x14   : > { %v1447_v8 = vld [vmem:[%s1756_s23 + $0x104] ss:$8 sps:$4 sm:$0xff]   ;;  %785 = vmatprep.mubr.bf16.mxu0 %v1444_v6  ;;  %v1436_v13 = vld [vmem:[%s1737_s19 + $0x50] sm:$0xff]   ;;  %v1437_v14 = vld [vmem:[%s1737_s19 + $0x58] sm:$0xff]  }
  0x15   : > { %913 = vmatprep.mubr.bf16.mxu1 %v1447_v8  ;;  %v1434_v11 = vld [vmem:[%s1737_s19 + $0x40] sm:$0xff]   ;;  %v1435_v12 = vld [vmem:[%s1737_s19 + $0x48] sm:$0xff]   ;;  %v1440_v17 = vld [vmem:[%s1737_s19 + $0x70] sm:$0xff]  }
  0x16   : > { %756 = vmatpush1.bf16.msra.mxu0 %v1427_v2  ;;  %1386 = vmatpush1.bf16.msra.mxu1 %v1427_v2  ;;  %v1438_v15 = vld [vmem:[%s1737_s19 + $0x60] sm:$0xff]   ;;  %v1439_v16 = vld [vmem:[%s1737_s19 + $0x68] sm:$0xff]   ;;  %v1441_v18 = vld [vmem:[%s1737_s19 + $0x78] sm:$0xff]  }
  0x17   : > { %757 = vmatprep.subr.bf16.mxu0 %v1690_v0  ;;  %1371 = vmatprep.subr.bf16.mxu1 %v1690_v0  ;;  %v1442_v19 = vld [vmem:[%s1756_s23] ss:$8 sps:$4 sm:$0xff]   ;;  %v1448_v21 = vld [vmem:[%s1756_s23 + $0x14] ss:$8 sps:$4 sm:$0xff]   ;;  %v1452_v23 = vld [vmem:[%s1756_s23 + $0x10] ss:$8 sps:$4 sm:$0xff]  }
  0x18   : > { %v1445_v20 = vld [vmem:[%s1756_s23 + $0x100] ss:$8 sps:$4 sm:$0xff]   ;;  %v1450_v22 = vld [vmem:[%s1756_s23 + $0x114] ss:$8 sps:$4 sm:$0xff]   ;;  %v1453_v24 = vld [vmem:[%s1756_s23 + $0x110] ss:$8 sps:$4 sm:$0xff]  }
  0x19   : > { %v1454_v25 = vld [vmem:[%s1756_s23 + $0x24] ss:$8 sps:$4 sm:$0xff]   ;;  %v1458_v27 = vld [vmem:[%s1756_s23 + $0x20] ss:$8 sps:$4 sm:$0xff]   ;;  %v1460_v29 = vld [vmem:[%s1756_s23 + $0x34] ss:$8 sps:$4 sm:$0xff]  }
  0x1a   : > { %758 = vmatpush1.bf16.msra.mxu0 %v1428_v3  ;;  %1387 = vmatpush1.bf16.msra.mxu1 %v1428_v3  ;;  %v1456_v26 = vld [vmem:[%s1756_s23 + $0x124] ss:$8 sps:$4 sm:$0xff]   ;;  %v1459_v28 = vld [vmem:[%s1756_s23 + $0x120] ss:$8 sps:$4 sm:$0xff]   ;;  %v1462_v30 = vld [vmem:[%s1756_s23 + $0x134] ss:$8 sps:$4 sm:$0xff]  }
  0x1b   : > { %759 = vmatprep.subr.bf16.mxu0 %v1690_v0  ;;  %1372 = vmatprep.subr.bf16.mxu1 %v1690_v0  ;;  %v1464_v31 = vld [vmem:[%s1756_s23 + $0x30] ss:$8 sps:$4 sm:$0xff]   ;;  %v1466_v33 = vld [vmem:[%s1756_s23 + $0x44] ss:$8 sps:$4 sm:$0xff]   ;;  %v1470_v35 = vld [vmem:[%s1756_s23 + $0x40] ss:$8 sps:$4 sm:$0xff]  }
  0x1c   : > { %v1465_v32 = vld [vmem:[%s1756_s23 + $0x130] ss:$8 sps:$4 sm:$0xff]   ;;  %v1468_v34 = vld [vmem:[%s1756_s23 + $0x144] ss:$8 sps:$4 sm:$0xff]   ;;  %v1471_v36 = vld [vmem:[%s1756_s23 + $0x140] ss:$8 sps:$4 sm:$0xff]  }
  0x1d   : > { %v1472_v37 = vld [vmem:[%s1756_s23 + $0x54] ss:$8 sps:$4 sm:$0xff]   ;;  %v1476_v39 = vld [vmem:[%s1756_s23 + $0x50] ss:$8 sps:$4 sm:$0xff]   ;;  %v1478_v41 = vld [vmem:[%s1756_s23 + $0x64] ss:$8 sps:$4 sm:$0xff]  }
  0x1e   : > { %760 = vmatpush1.bf16.msra.mxu0 %v1429_v4  ;;  %1388 = vmatpush1.bf16.msra.mxu1 %v1429_v4  ;;  %v1474_v38 = vld [vmem:[%s1756_s23 + $0x154] ss:$8 sps:$4 sm:$0xff]   ;;  %v1477_v40 = vld [vmem:[%s1756_s23 + $0x150] ss:$8 sps:$4 sm:$0xff]   ;;  %v1480_v42 = vld [vmem:[%s1756_s23 + $0x164] ss:$8 sps:$4 sm:$0xff]  }
  0x1f   : > { %761 = vmatprep.subr.bf16.mxu0 %v1690_v0  ;;  %1373 = vmatprep.subr.bf16.mxu1 %v1690_v0  ;;  %v1482_v43 = vld [vmem:[%s1756_s23 + $0x60] ss:$8 sps:$4 sm:$0xff]   ;;  %v1484_v45 = vld [vmem:[%s1756_s23 + $0x74] ss:$8 sps:$4 sm:$0xff]   ;;  %v1488_v47 = vld [vmem:[%s1756_s23 + $0x70] ss:$8 sps:$4 sm:$0xff]  }
  0x20   : > { %v1483_v44 = vld [vmem:[%s1756_s23 + $0x160] ss:$8 sps:$4 sm:$0xff]   ;;  %v1486_v46 = vld [vmem:[%s1756_s23 + $0x174] ss:$8 sps:$4 sm:$0xff]   ;;  %v1489_v48 = vld [vmem:[%s1756_s23 + $0x170] ss:$8 sps:$4 sm:$0xff]  }
  0x21   : > { %v1490_v49 = vld [vmem:[%s1756_s23 + $0x84] ss:$8 sps:$4 sm:$0xff]   ;;  %v1494_v51 = vld [vmem:[%s1756_s23 + $0x80] ss:$8 sps:$4 sm:$0xff]   ;;  %v1496_v53 = vld [vmem:[%s1756_s23 + $0x94] ss:$8 sps:$4 sm:$0xff]  }
  0x22   : > { %762 = vmatpush1.bf16.msra.mxu0 %v1430_v5  ;;  %1389 = vmatpush1.bf16.msra.mxu1 %v1430_v5  ;;  %v1492_v50 = vld [vmem:[%s1756_s23 + $0x184] ss:$8 sps:$4 sm:$0xff]   ;;  %v1495_v52 = vld [vmem:[%s1756_s23 + $0x180] ss:$8 sps:$4 sm:$0xff]   ;;  %v1498_v54 = vld [vmem:[%s1756_s23 + $0x194] ss:$8 sps:$4 sm:$0xff]  }
  0x23   : > { %763 = vmatprep.subr.bf16.mxu0 %v1690_v0  ;;  %1374 = vmatprep.subr.bf16.mxu1 %v1690_v0  ;;  %v1500_v55 = vld [vmem:[%s1756_s23 + $0x90] ss:$8 sps:$4 sm:$0xff]   ;;  %v1502_v57 = vld [vmem:[%s1756_s23 + $0xa4] ss:$8 sps:$4 sm:$0xff]   ;;  %v1506_v59 = vld [vmem:[%s1756_s23 + $0xa0] ss:$8 sps:$4 sm:$0xff]  }
  0x24   : > { %v1501_v56 = vld [vmem:[%s1756_s23 + $0x190] ss:$8 sps:$4 sm:$0xff]   ;;  %v1504_v58 = vld [vmem:[%s1756_s23 + $0x1a4] ss:$8 sps:$4 sm:$0xff]   ;;  %v1507_v60 = vld [vmem:[%s1756_s23 + $0x1a0] ss:$8 sps:$4 sm:$0xff]  }
  0x25   : > { %v1508_v61 = vld [vmem:[%s1756_s23 + $0xb4] ss:$8 sps:$4 sm:$0xff]   ;;  %v1512_v63 = vld [vmem:[%s1756_s23 + $0xb0] ss:$8 sps:$4 sm:$0xff]   ;;  %v1514_v1 = vld [vmem:[%s1756_s23 + $0xc4] ss:$8 sps:$4 sm:$0xff]  }
  0x26   : > { %764 = vmatpush1.bf16.msra.mxu0 %v1431_v7  ;;  %1390 = vmatpush1.bf16.msra.mxu1 %v1431_v7  ;;  %v1510_v62 = vld [vmem:[%s1756_s23 + $0x1b4] ss:$8 sps:$4 sm:$0xff]   ;;  %v1516_v2 = vld [vmem:[%s1756_s23 + $0x1c4] ss:$8 sps:$4 sm:$0xff]   ;;  %v1518_v3 = vld [vmem:[%s1756_s23 + $0xc0] ss:$8 sps:$4 sm:$0xff]  }
  0x27   : > { %765 = vmatprep.subr.bf16.mxu0 %v1690_v0  ;;  %1375 = vmatprep.subr.bf16.mxu1 %v1690_v0  ;;  %v1519_v4 = vld [vmem:[%s1756_s23 + $0x1c0] ss:$8 sps:$4 sm:$0xff]   ;;  %v1520_v5 = vld [vmem:[%s1756_s23 + $0xd4] ss:$8 sps:$4 sm:$0xff]   ;;  %v1524_v7 = vld [vmem:[%s1756_s23 + $0xd0] ss:$8 sps:$4 sm:$0xff]  }
  0x28   : > { %v1522_v6 = vld [vmem:[%s1756_s23 + $0x1d4] ss:$8 sps:$4 sm:$0xff]   ;;  %v1525_v8 = vld [vmem:[%s1756_s23 + $0x1d0] ss:$8 sps:$4 sm:$0xff]  }
  0x2a   : > { %766 = vmatpush1.bf16.msra.mxu0 %v1432_v9  ;;  %1391 = vmatpush1.bf16.msra.mxu1 %v1432_v9  ;;  %v1526_v9 = vld [vmem:[%s1756_s23 + $0xe4] ss:$8 sps:$4 sm:$0xff]  }
  0x2b   : > { %767 = vmatprep.subr.bf16.mxu0 %v1690_v0  ;;  %1376 = vmatprep.subr.bf16.mxu1 %v1690_v0 }
  0x2e   : > { %768 = vmatpush1.bf16.msra.mxu0 %v1433_v10  ;;  %1392 = vmatpush1.bf16.msra.mxu1 %v1433_v10  ;;  %v1528_v10 = vld [vmem:[%s1756_s23 + $0x1e4] ss:$8 sps:$4 sm:$0xff]  }
  0x2f   : > { %769 = vmatprep.subr.bf16.mxu0 %v1690_v0  ;;  %1377 = vmatprep.subr.bf16.mxu1 %v1690_v0 }
  0x32   : > { %770 = vmatpush1.bf16.msra.mxu0 %v1434_v11  ;;  %1393 = vmatpush1.bf16.msra.mxu1 %v1434_v11  ;;  %v1530_v11 = vld [vmem:[%s1756_s23 + $0xe0] ss:$8 sps:$4 sm:$0xff]  }
  0x33   : > { %771 = vmatprep.subr.bf16.mxu0 %v1690_v0  ;;  %1378 = vmatprep.subr.bf16.mxu1 %v1690_v0 }
  0x36   : > { %772 = vmatpush1.bf16.msra.mxu0 %v1435_v12  ;;  %1394 = vmatpush1.bf16.msra.mxu1 %v1435_v12  ;;  %v1531_v12 = vld [vmem:[%s1756_s23 + $0x1e0] ss:$8 sps:$4 sm:$0xff]  }
  0x37   : > { %773 = vmatprep.subr.bf16.mxu0 %v1690_v0  ;;  %1379 = vmatprep.subr.bf16.mxu1 %v1690_v0 }
  0x3a   : > { %774 = vmatpush1.bf16.msra.mxu0 %v1436_v13  ;;  %1395 = vmatpush1.bf16.msra.mxu1 %v1436_v13  ;;  %v1532_v13 = vld [vmem:[%s1756_s23 + $0xf4] ss:$8 sps:$4 sm:$0xff]  }
  0x3b   : > { %775 = vmatprep.subr.bf16.mxu0 %v1690_v0  ;;  %1380 = vmatprep.subr.bf16.mxu1 %v1690_v0 }
  0x3e   : > { %776 = vmatpush1.bf16.msra.mxu0 %v1437_v14  ;;  %1396 = vmatpush1.bf16.msra.mxu1 %v1437_v14  ;;  %v1534_v14 = vld [vmem:[%s1756_s23 + $0x1f4] ss:$8 sps:$4 sm:$0xff]  }
  0x3f   : > { %777 = vmatprep.subr.bf16.mxu0 %v1690_v0  ;;  %1381 = vmatprep.subr.bf16.mxu1 %v1690_v0 }
  0x42   : > { %778 = vmatpush1.bf16.msra.mxu0 %v1438_v15  ;;  %1397 = vmatpush1.bf16.msra.mxu1 %v1438_v15  ;;  %v1536_v15 = vld [vmem:[%s1756_s23 + $0xf0] ss:$8 sps:$4 sm:$0xff]  }
  0x43   : > { %779 = vmatprep.subr.bf16.mxu0 %v1690_v0  ;;  %1382 = vmatprep.subr.bf16.mxu1 %v1690_v0 }
  0x46   : > { %780 = vmatpush1.bf16.msra.mxu0 %v1439_v16  ;;  %1398 = vmatpush1.bf16.msra.mxu1 %v1439_v16  ;;  %v1537_v16 = vld [vmem:[%s1756_s23 + $0x1f0] ss:$8 sps:$4 sm:$0xff]  }
  0x47   : > { %781 = vmatprep.subr.bf16.mxu0 %v1690_v0  ;;  %1383 = vmatprep.subr.bf16.mxu1 %v1690_v0 }
  0x4a   : > { %782 = vmatpush1.bf16.msra.mxu0 %v1440_v17  ;;  %1399 = vmatpush1.bf16.msra.mxu1 %v1440_v17  ;;  %v1860_v17 = vld [vmem:[%s2008_s2] ss:$0 sm:$0xff] }
  0x4b   : > { %783 = vmatprep.subr.bf16.mxu0 %v1690_v0  ;;  %1384 = vmatprep.subr.bf16.mxu1 %v1690_v0  ;;  %v1513_v0 = vld [vmem:[%s1756_s23 + $0x1b0] ss:$8 sps:$4 sm:$0xff]  }
  0x4e   : > { %784 = vmatpush1.bf16.msra.mxu0 %v1441_v18  ;;  %1400 = vmatpush1.bf16.msra.mxu1 %v1441_v18 }
  0x51   : > { %786 = vmatmul.mubr.bf16.vlgmr.msra.gmra.mrb[0].mxu0 %v1442_v19  ;;  %914 = vmatmul.mubr.bf16.vlgmr.msra.gmra.mrb[0].mxu1 %v1445_v20 }
  0x52   : > { %793 = vmatprep.mubr.bf16.mxu0 %v1448_v21  ;;  %921 = vmatprep.mubr.bf16.mxu1 %v1450_v22 }
  0x59   : > { %794 = vmatmul.mubr.bf16.gmra.mrb[4].mxu0 %v1452_v23  ;;  %922 = vmatmul.mubr.bf16.gmra.mrb[4].mxu1 %v1453_v24 }
  0x5a   : > { %801 = vmatprep.mubr.bf16.mxu0 %v1454_v25  ;;  %929 = vmatprep.mubr.bf16.mxu1 %v1456_v26 }
  0x61   : > { %802 = vmatmul.mubr.bf16.gmra.mrb[8].mxu0 %v1458_v27  ;;  %930 = vmatmul.mubr.bf16.gmra.mrb[8].mxu1 %v1459_v28 }
  0x62   : > { %809 = vmatprep.mubr.bf16.mxu0 %v1460_v29  ;;  %937 = vmatprep.mubr.bf16.mxu1 %v1462_v30 }
  0x69   : > { %810 = vmatmul.mubr.bf16.gmra.mrb[12].mxu0 %v1464_v31  ;;  %938 = vmatmul.mubr.bf16.gmra.mrb[12].mxu1 %v1465_v32 }
  0x6a   : > { %817 = vmatprep.mubr.bf16.mxu0 %v1466_v33  ;;  %945 = vmatprep.mubr.bf16.mxu1 %v1468_v34 }
  0x71   : > { %818 = vmatmul.mubr.bf16.gmra.mrb[16].mxu0 %v1470_v35  ;;  %946 = vmatmul.mubr.bf16.gmra.mrb[16].mxu1 %v1471_v36 }
  0x72   : > { %825 = vmatprep.mubr.bf16.mxu0 %v1472_v37  ;;  %953 = vmatprep.mubr.bf16.mxu1 %v1474_v38 }
  0x79   : > { %826 = vmatmul.mubr.bf16.gmra.mrb[20].mxu0 %v1476_v39  ;;  %954 = vmatmul.mubr.bf16.gmra.mrb[20].mxu1 %v1477_v40 }
  0x7a   : > { %833 = vmatprep.mubr.bf16.mxu0 %v1478_v41  ;;  %961 = vmatprep.mubr.bf16.mxu1 %v1480_v42 }
  0x81   : > { %834 = vmatmul.mubr.bf16.gmra.mrb[24].mxu0 %v1482_v43  ;;  %962 = vmatmul.mubr.bf16.gmra.mrb[24].mxu1 %v1483_v44 }
  0x82   : > { %841 = vmatprep.mubr.bf16.mxu0 %v1484_v45  ;;  %969 = vmatprep.mubr.bf16.mxu1 %v1486_v46 }
  0x89   : > { %842 = vmatmul.mubr.bf16.gmra.mrb[28].mxu0 %v1488_v47  ;;  %970 = vmatmul.mubr.bf16.gmra.mrb[28].mxu1 %v1489_v48 }
  0x8a   : > { %849 = vmatprep.mubr.bf16.mxu0 %v1490_v49  ;;  %977 = vmatprep.mubr.bf16.mxu1 %v1492_v50 }
  0x91   : > { %850 = vmatmul.mubr.bf16.gmra.mrb[32].mxu0 %v1494_v51  ;;  %978 = vmatmul.mubr.bf16.gmra.mrb[32].mxu1 %v1495_v52 }
  0x92   : > { %857 = vmatprep.mubr.bf16.mxu0 %v1496_v53  ;;  %985 = vmatprep.mubr.bf16.mxu1 %v1498_v54 }
  0x99   : > { %858 = vmatmul.mubr.bf16.gmra.mrb[36].mxu0 %v1500_v55  ;;  %986 = vmatmul.mubr.bf16.gmra.mrb[36].mxu1 %v1501_v56 }
  0x9a   : > { %865 = vmatprep.mubr.bf16.mxu0 %v1502_v57  ;;  %993 = vmatprep.mubr.bf16.mxu1 %v1504_v58 }
  0xa1   : > { %866 = vmatmul.mubr.bf16.gmra.mrb[40].mxu0 %v1506_v59  ;;  %994 = vmatmul.mubr.bf16.gmra.mrb[40].mxu1 %v1507_v60 }
  0xa2   : > { %873 = vmatprep.mubr.bf16.mxu0 %v1508_v61  ;;  %1001 = vmatprep.mubr.bf16.mxu1 %v1510_v62 }
  0xa9   : > { %874 = vmatmul.mubr.bf16.gmra.mrb[44].mxu0 %v1512_v63  ;;  %1002 = vmatmul.mubr.bf16.gmra.mrb[44].mxu1 %v1513_v0 }
  0xaa   : > { %881 = vmatprep.mubr.bf16.mxu0 %v1514_v1  ;;  %1009 = vmatprep.mubr.bf16.mxu1 %v1516_v2 }
  0xb1   : > { %882 = vmatmul.mubr.bf16.gmra.mrb[48].mxu0 %v1518_v3  ;;  %1010 = vmatmul.mubr.bf16.gmra.mrb[48].mxu1 %v1519_v4 }
  0xb2   : > { %889 = vmatprep.mubr.bf16.mxu0 %v1520_v5  ;;  %1017 = vmatprep.mubr.bf16.mxu1 %v1522_v6 }
  0xb9   : > { %890 = vmatmul.mubr.bf16.gmra.mrb[52].mxu0 %v1524_v7  ;;  %1018 = vmatmul.mubr.bf16.gmra.mrb[52].mxu1 %v1525_v8 }
  0xba   : > { %897 = vmatprep.mubr.bf16.mxu0 %v1526_v9  ;;  %1025 = vmatprep.mubr.bf16.mxu1 %v1528_v10 }
  0xc1   : > { %898 = vmatmul.mubr.bf16.gmra.mrb[56].mxu0 %v1530_v11  ;;  %1026 = vmatmul.mubr.bf16.gmra.mrb[56].mxu1 %v1531_v12 }
  0xc2   : > { %905 = vmatprep.mubr.bf16.mxu0 %v1532_v13  ;;  %1033 = vmatprep.mubr.bf16.mxu1 %v1534_v14 }
  0xc9   : > { %906 = vmatmul.mubr.bf16.gmra.mrb[60].mxu0 %v1536_v15  ;;  %1034 = vmatmul.mubr.bf16.gmra.mrb[60].mxu1 %v1537_v16 }
 0x124   : > { %v787_v18 = vpop.f32.mrb[0].mxu0  ;;  %v915_v19 = vpop.f32.mrb[0].mxu1 }
 0x125   : > { %v788_v20 = vadd.f32 %v1860_v17, %v787_v18  ;;  %v916_v21 = vadd.f32 %v1860_v17, %v915_v19  ;;  %v789_v22 = vpop.f32.mrb[1].mxu0  ;;  %v917_v23 = vpop.f32.mrb[1].mxu1 }
 0x126   : > { %v790_v24 = vpop.f32.mrb[2].mxu0  ;;  %v918_v25 = vpop.f32.mrb[2].mxu1 }
 0x127   : > { %1538 = vtanh.f32 %v788_v20  ;;  %v791_v26 = vadd.f32 %v1860_v17, %v790_v24  ;;  %v919_v27 = vadd.f32 %v1860_v17, %v918_v25  ;;  %v792_v28 = vpop.f32.mrb[3].mxu0  ;;  %v920_v29 = vpop.f32.mrb[3].mxu1 }
 0x128   : > { %1540 = vtanh.f32 %v916_v21 }
 0x129   : > { %1542 = vtanh.f32 %v791_v26 }
 0x12a   : > { %1544 = vtanh.f32 %v919_v27 }
 0x12c   : > { %v795_v30 = vpop.f32.mrb[4].mxu0  ;;  %v923_v31 = vpop.f32.mrb[4].mxu1 }
 0x12d   : > { %v796_v32 = vadd.f32 %v1860_v17, %v795_v30  ;;  %v924_v33 = vadd.f32 %v1860_v17, %v923_v31  ;;  %v797_v34 = vpop.f32.mrb[5].mxu0  ;;  %v925_v35 = vpop.f32.mrb[5].mxu1 }
 0x12e   : > { %v798_v36 = vpop.f32.mrb[6].mxu0  ;;  %v926_v37 = vpop.f32.mrb[6].mxu1 }
 0x12f   : > { %1546 = vtanh.f32 %v796_v32  ;;  %v799_v38 = vadd.f32 %v1860_v17, %v798_v36  ;;  %v927_v39 = vadd.f32 %v1860_v17, %v926_v37  ;;  %v800_v40 = vpop.f32.mrb[7].mxu0  ;;  %v928_v41 = vpop.f32.mrb[7].mxu1 }
 0x130   : > { %1548 = vtanh.f32 %v924_v33 }
 0x131   : > { %v1539_v42 = vpop.eup %1538  ;;  %1550 = vtanh.f32 %v799_v38 }
 0x132   : > { %v1541_v43 = vpop.eup %1540  ;;  %1106 = vst [vmem:[%s1873_s28] sm:$0xff] %v1539_v42  ;;  %1552 = vtanh.f32 %v927_v39 }
 0x133   : > { %v1543_v44 = vpop.eup %1542  ;;  %1138 = vst [vmem:[%s1873_s28 + $0x100] sm:$0xff] %v1541_v43 }
 0x134   : > { %v1545_v45 = vpop.eup %1544  ;;  %1107 = vst [vmem:[%s1873_s28 + $0x8] sm:$0xff] %v1543_v44  ;;  %v803_v46 = vpop.f32.mrb[8].mxu0 }
 0x135   : > { %v931_v47 = vpop.f32.mrb[8].mxu1  ;;  %1139 = vst [vmem:[%s1873_s28 + $0x108] sm:$0xff] %v1545_v45  ;;  %v804_v48 = vadd.f32 %v1860_v17, %v803_v46  ;;  %v805_v50 = vpop.f32.mrb[9].mxu0 }
 0x136   : > { %v932_v49 = vadd.f32 %v1860_v17, %v931_v47  ;;  %v933_v51 = vpop.f32.mrb[9].mxu1  ;;  %v806_v52 = vpop.f32.mrb[10].mxu0 }
 0x137   : > { %v934_v53 = vpop.f32.mrb[10].mxu1  ;;  %1554 = vtanh.f32 %v804_v48  ;;  %v807_v54 = vadd.f32 %v1860_v17, %v806_v52  ;;  %v808_v56 = vpop.f32.mrb[11].mxu0 }
 0x138   : > { %v935_v55 = vadd.f32 %v1860_v17, %v934_v53  ;;  %v936_v57 = vpop.f32.mrb[11].mxu1  ;;  %1556 = vtanh.f32 %v932_v49 }
 0x139   : > { %v1547_v58 = vpop.eup %1546  ;;  %1558 = vtanh.f32 %v807_v54 }
 0x13a   : > { %v1549_v59 = vpop.eup %1548  ;;  %1108 = vst [vmem:[%s1873_s28 + $0x10] sm:$0xff] %v1547_v58  ;;  %1560 = vtanh.f32 %v935_v55 }
 0x13b   : > { %v1551_v60 = vpop.eup %1550  ;;  %1140 = vst [vmem:[%s1873_s28 + $0x110] sm:$0xff] %v1549_v59 }
 0x13c   : > { %v1553_v61 = vpop.eup %1552  ;;  %1109 = vst [vmem:[%s1873_s28 + $0x18] sm:$0xff] %v1551_v60  ;;  %v811_v62 = vpop.f32.mrb[12].mxu0 }
 0x13d   : > { %v939_v63 = vpop.f32.mrb[12].mxu1  ;;  %1141 = vst [vmem:[%s1873_s28 + $0x118] sm:$0xff] %v1553_v61  ;;  %v812_v0 = vadd.f32 %v1860_v17, %v811_v62  ;;  %v813_v2 = vpop.f32.mrb[13].mxu0 }
 0x13e   : > { %v940_v1 = vadd.f32 %v1860_v17, %v939_v63  ;;  %v941_v3 = vpop.f32.mrb[13].mxu1  ;;  %v814_v4 = vpop.f32.mrb[14].mxu0 }
 0x13f   : > { %v942_v5 = vpop.f32.mrb[14].mxu1  ;;  %1562 = vtanh.f32 %v812_v0  ;;  %v815_v6 = vadd.f32 %v1860_v17, %v814_v4  ;;  %v816_v8 = vpop.f32.mrb[15].mxu0 }
 0x140   : > { %v943_v7 = vadd.f32 %v1860_v17, %v942_v5  ;;  %v944_v9 = vpop.f32.mrb[15].mxu1  ;;  %1564 = vtanh.f32 %v940_v1 }
 0x141   : > { %v1555_v10 = vpop.eup %1554  ;;  %1566 = vtanh.f32 %v815_v6 }
 0x142   : > { %v1557_v11 = vpop.eup %1556  ;;  %1110 = vst [vmem:[%s1873_s28 + $0x20] sm:$0xff] %v1555_v10  ;;  %1568 = vtanh.f32 %v943_v7 }
 0x143   : > { %v1559_v12 = vpop.eup %1558  ;;  %1142 = vst [vmem:[%s1873_s28 + $0x120] sm:$0xff] %v1557_v11 }
 0x144   : > { %v1561_v13 = vpop.eup %1560  ;;  %1111 = vst [vmem:[%s1873_s28 + $0x28] sm:$0xff] %v1559_v12  ;;  %v819_v14 = vpop.f32.mrb[16].mxu0 }
 0x145   : > { %v947_v15 = vpop.f32.mrb[16].mxu1  ;;  %1143 = vst [vmem:[%s1873_s28 + $0x128] sm:$0xff] %v1561_v13  ;;  %v820_v16 = vadd.f32 %v1860_v17, %v819_v14  ;;  %v821_v19 = vpop.f32.mrb[17].mxu0 }
 0x146   : > { %v948_v18 = vadd.f32 %v1860_v17, %v947_v15  ;;  %v949_v20 = vpop.f32.mrb[17].mxu1  ;;  %v822_v21 = vpop.f32.mrb[18].mxu0 }
 0x147   : > { %v950_v22 = vpop.f32.mrb[18].mxu1  ;;  %1570 = vtanh.f32 %v820_v16  ;;  %v823_v23 = vadd.f32 %v1860_v17, %v822_v21  ;;  %v824_v25 = vpop.f32.mrb[19].mxu0 }
 0x148   : > { %v951_v24 = vadd.f32 %v1860_v17, %v950_v22  ;;  %v952_v26 = vpop.f32.mrb[19].mxu1  ;;  %1572 = vtanh.f32 %v948_v18 }
 0x149   : > { %v1563_v27 = vpop.eup %1562  ;;  %1574 = vtanh.f32 %v823_v23 }
 0x14a   : > { %v1565_v28 = vpop.eup %1564  ;;  %1112 = vst [vmem:[%s1873_s28 + $0x30] sm:$0xff] %v1563_v27  ;;  %1576 = vtanh.f32 %v951_v24 }
 0x14b   : > { %v1567_v29 = vpop.eup %1566  ;;  %1144 = vst [vmem:[%s1873_s28 + $0x130] sm:$0xff] %v1565_v28 }
 0x14c   : > { %v1569_v30 = vpop.eup %1568  ;;  %1113 = vst [vmem:[%s1873_s28 + $0x38] sm:$0xff] %v1567_v29  ;;  %v827_v31 = vpop.f32.mrb[20].mxu0 }
 0x14d   : > { %v955_v32 = vpop.f32.mrb[20].mxu1  ;;  %1145 = vst [vmem:[%s1873_s28 + $0x138] sm:$0xff] %v1569_v30  ;;  %v828_v33 = vadd.f32 %v1860_v17, %v827_v31  ;;  %v829_v35 = vpop.f32.mrb[21].mxu0 }
 0x14e   : > { %v956_v34 = vadd.f32 %v1860_v17, %v955_v32  ;;  %v957_v36 = vpop.f32.mrb[21].mxu1  ;;  %v830_v37 = vpop.f32.mrb[22].mxu0 }
 0x14f   : > { %v958_v38 = vpop.f32.mrb[22].mxu1  ;;  %1578 = vtanh.f32 %v828_v33  ;;  %v831_v39 = vadd.f32 %v1860_v17, %v830_v37  ;;  %v832_v41 = vpop.f32.mrb[23].mxu0 }
 0x150   : > { %v959_v40 = vadd.f32 %v1860_v17, %v958_v38  ;;  %v960_v42 = vpop.f32.mrb[23].mxu1  ;;  %1580 = vtanh.f32 %v956_v34 }
 0x151   : > { %v1571_v43 = vpop.eup %1570  ;;  %1582 = vtanh.f32 %v831_v39 }
 0x152   : > { %v1573_v44 = vpop.eup %1572  ;;  %1114 = vst [vmem:[%s1873_s28 + $0x40] sm:$0xff] %v1571_v43  ;;  %1584 = vtanh.f32 %v959_v40 }
 0x153   : > { %v1575_v45 = vpop.eup %1574  ;;  %1146 = vst [vmem:[%s1873_s28 + $0x140] sm:$0xff] %v1573_v44 }
 0x154   : > { %v1577_v46 = vpop.eup %1576  ;;  %1115 = vst [vmem:[%s1873_s28 + $0x48] sm:$0xff] %v1575_v45  ;;  %v835_v47 = vpop.f32.mrb[24].mxu0 }
 0x155   : > { %v963_v48 = vpop.f32.mrb[24].mxu1  ;;  %1147 = vst [vmem:[%s1873_s28 + $0x148] sm:$0xff] %v1577_v46  ;;  %v836_v49 = vadd.f32 %v1860_v17, %v835_v47  ;;  %v837_v51 = vpop.f32.mrb[25].mxu0 }
 0x156   : > { %v964_v50 = vadd.f32 %v1860_v17, %v963_v48  ;;  %v965_v52 = vpop.f32.mrb[25].mxu1  ;;  %v838_v53 = vpop.f32.mrb[26].mxu0 }
 0x157   : > { %v966_v54 = vpop.f32.mrb[26].mxu1  ;;  %1586 = vtanh.f32 %v836_v49  ;;  %v839_v55 = vadd.f32 %v1860_v17, %v838_v53  ;;  %v840_v57 = vpop.f32.mrb[27].mxu0 }
 0x158   : > { %v967_v56 = vadd.f32 %v1860_v17, %v966_v54  ;;  %v968_v58 = vpop.f32.mrb[27].mxu1  ;;  %1588 = vtanh.f32 %v964_v50 }
 0x159   : > { %v1579_v59 = vpop.eup %1578  ;;  %1590 = vtanh.f32 %v839_v55 }
 0x15a   : > { %v1581_v60 = vpop.eup %1580  ;;  %1116 = vst [vmem:[%s1873_s28 + $0x50] sm:$0xff] %v1579_v59  ;;  %1592 = vtanh.f32 %v967_v56 }
 0x15b   : > { %v1583_v61 = vpop.eup %1582  ;;  %1148 = vst [vmem:[%s1873_s28 + $0x150] sm:$0xff] %v1581_v60 }
 0x15c   : > { %v1585_v62 = vpop.eup %1584  ;;  %1117 = vst [vmem:[%s1873_s28 + $0x58] sm:$0xff] %v1583_v61  ;;  %v843_v63 = vpop.f32.mrb[28].mxu0 }
 0x15d   : > { %v971_v0 = vpop.f32.mrb[28].mxu1  ;;  %1149 = vst [vmem:[%s1873_s28 + $0x158] sm:$0xff] %v1585_v62  ;;  %v844_v1 = vadd.f32 %v1860_v17, %v843_v63  ;;  %v845_v3 = vpop.f32.mrb[29].mxu0 }
 0x15e   : > { %v972_v2 = vadd.f32 %v1860_v17, %v971_v0  ;;  %v973_v4 = vpop.f32.mrb[29].mxu1  ;;  %v846_v5 = vpop.f32.mrb[30].mxu0 }
 0x15f   : > { %v974_v6 = vpop.f32.mrb[30].mxu1  ;;  %1594 = vtanh.f32 %v844_v1  ;;  %v847_v7 = vadd.f32 %v1860_v17, %v846_v5  ;;  %v848_v9 = vpop.f32.mrb[31].mxu0 }
 0x160   : > { %v975_v8 = vadd.f32 %v1860_v17, %v974_v6  ;;  %v976_v10 = vpop.f32.mrb[31].mxu1  ;;  %1596 = vtanh.f32 %v972_v2 }
 0x161   : > { %v1587_v11 = vpop.eup %1586  ;;  %1598 = vtanh.f32 %v847_v7 }
 0x162   : > { %v1589_v12 = vpop.eup %1588  ;;  %1118 = vst [vmem:[%s1873_s28 + $0x60] sm:$0xff] %v1587_v11  ;;  %1600 = vtanh.f32 %v975_v8 }
 0x163   : > { %v1591_v13 = vpop.eup %1590  ;;  %1150 = vst [vmem:[%s1873_s28 + $0x160] sm:$0xff] %v1589_v12 }
 0x164   : > { %v1593_v14 = vpop.eup %1592  ;;  %1119 = vst [vmem:[%s1873_s28 + $0x68] sm:$0xff] %v1591_v13  ;;  %v851_v15 = vpop.f32.mrb[32].mxu0 }
 0x165   : > { %v979_v16 = vpop.f32.mrb[32].mxu1  ;;  %1151 = vst [vmem:[%s1873_s28 + $0x168] sm:$0xff] %v1593_v14  ;;  %v852_v18 = vadd.f32 %v1860_v17, %v851_v15  ;;  %v853_v20 = vpop.f32.mrb[33].mxu0 }
 0x166   : > { %v980_v19 = vadd.f32 %v1860_v17, %v979_v16  ;;  %v981_v21 = vpop.f32.mrb[33].mxu1  ;;  %v854_v22 = vpop.f32.mrb[34].mxu0 }
 0x167   : > { %v982_v23 = vpop.f32.mrb[34].mxu1  ;;  %1602 = vtanh.f32 %v852_v18  ;;  %v855_v24 = vadd.f32 %v1860_v17, %v854_v22  ;;  %v856_v26 = vpop.f32.mrb[35].mxu0 }
 0x168   : > { %v983_v25 = vadd.f32 %v1860_v17, %v982_v23  ;;  %v984_v27 = vpop.f32.mrb[35].mxu1  ;;  %1604 = vtanh.f32 %v980_v19 }
 0x169   : > { %v1595_v28 = vpop.eup %1594  ;;  %1606 = vtanh.f32 %v855_v24 }
 0x16a   : > { %v1597_v29 = vpop.eup %1596  ;;  %1120 = vst [vmem:[%s1873_s28 + $0x70] sm:$0xff] %v1595_v28  ;;  %1608 = vtanh.f32 %v983_v25 }
 0x16b   : > { %v1599_v30 = vpop.eup %1598  ;;  %1152 = vst [vmem:[%s1873_s28 + $0x170] sm:$0xff] %v1597_v29 }
 0x16c   : > { %v1601_v31 = vpop.eup %1600  ;;  %1121 = vst [vmem:[%s1873_s28 + $0x78] sm:$0xff] %v1599_v30  ;;  %v859_v32 = vpop.f32.mrb[36].mxu0 }
 0x16d   : > { %v987_v33 = vpop.f32.mrb[36].mxu1  ;;  %1153 = vst [vmem:[%s1873_s28 + $0x178] sm:$0xff] %v1601_v31  ;;  %v860_v34 = vadd.f32 %v1860_v17, %v859_v32  ;;  %v861_v36 = vpop.f32.mrb[37].mxu0 }
 0x16e   : > { %v988_v35 = vadd.f32 %v1860_v17, %v987_v33  ;;  %v989_v37 = vpop.f32.mrb[37].mxu1  ;;  %v862_v38 = vpop.f32.mrb[38].mxu0 }
 0x16f   : > { %v990_v39 = vpop.f32.mrb[38].mxu1  ;;  %1610 = vtanh.f32 %v860_v34  ;;  %v863_v40 = vadd.f32 %v1860_v17, %v862_v38  ;;  %v864_v42 = vpop.f32.mrb[39].mxu0 }
 0x170   : > { %v991_v41 = vadd.f32 %v1860_v17, %v990_v39  ;;  %v992_v43 = vpop.f32.mrb[39].mxu1  ;;  %1612 = vtanh.f32 %v988_v35 }
 0x171   : > { %v1603_v44 = vpop.eup %1602  ;;  %1614 = vtanh.f32 %v863_v40 }
 0x172   : > { %v1605_v45 = vpop.eup %1604  ;;  %1122 = vst [vmem:[%s1873_s28 + $0x80] sm:$0xff] %v1603_v44  ;;  %1616 = vtanh.f32 %v991_v41 }
 0x173   : > { %v1607_v46 = vpop.eup %1606  ;;  %1154 = vst [vmem:[%s1873_s28 + $0x180] sm:$0xff] %v1605_v45 }
 0x174   : > { %v1609_v47 = vpop.eup %1608  ;;  %1123 = vst [vmem:[%s1873_s28 + $0x88] sm:$0xff] %v1607_v46  ;;  %v867_v48 = vpop.f32.mrb[40].mxu0 }
 0x175   : > { %v995_v49 = vpop.f32.mrb[40].mxu1  ;;  %1155 = vst [vmem:[%s1873_s28 + $0x188] sm:$0xff] %v1609_v47  ;;  %v868_v50 = vadd.f32 %v1860_v17, %v867_v48  ;;  %v869_v52 = vpop.f32.mrb[41].mxu0 }
 0x176   : > { %v996_v51 = vadd.f32 %v1860_v17, %v995_v49  ;;  %v997_v53 = vpop.f32.mrb[41].mxu1  ;;  %v870_v54 = vpop.f32.mrb[42].mxu0 }
 0x177   : > { %v998_v55 = vpop.f32.mrb[42].mxu1  ;;  %1618 = vtanh.f32 %v868_v50  ;;  %v871_v56 = vadd.f32 %v1860_v17, %v870_v54  ;;  %v872_v58 = vpop.f32.mrb[43].mxu0 }
 0x178   : > { %v999_v57 = vadd.f32 %v1860_v17, %v998_v55  ;;  %v1000_v59 = vpop.f32.mrb[43].mxu1  ;;  %1620 = vtanh.f32 %v996_v51 }
 0x179   : > { %v1611_v60 = vpop.eup %1610  ;;  %1622 = vtanh.f32 %v871_v56 }
 0x17a   : > { %v1613_v61 = vpop.eup %1612  ;;  %1124 = vst [vmem:[%s1873_s28 + $0x90] sm:$0xff] %v1611_v60  ;;  %1624 = vtanh.f32 %v999_v57 }
 0x17b   : > { %v1615_v62 = vpop.eup %1614  ;;  %1156 = vst [vmem:[%s1873_s28 + $0x190] sm:$0xff] %v1613_v61 }
 0x17c   : > { %v1617_v63 = vpop.eup %1616  ;;  %1125 = vst [vmem:[%s1873_s28 + $0x98] sm:$0xff] %v1615_v62  ;;  %v875_v0 = vpop.f32.mrb[44].mxu0 }
 0x17d   : > { %v1003_v1 = vpop.f32.mrb[44].mxu1  ;;  %1157 = vst [vmem:[%s1873_s28 + $0x198] sm:$0xff] %v1617_v63  ;;  %v876_v2 = vadd.f32 %v1860_v17, %v875_v0  ;;  %v877_v4 = vpop.f32.mrb[45].mxu0 }
 0x17e   : > { %v1004_v3 = vadd.f32 %v1860_v17, %v1003_v1  ;;  %v1005_v5 = vpop.f32.mrb[45].mxu1  ;;  %v878_v6 = vpop.f32.mrb[46].mxu0 }
 0x17f   : > { %v1006_v7 = vpop.f32.mrb[46].mxu1  ;;  %1626 = vtanh.f32 %v876_v2  ;;  %v879_v8 = vadd.f32 %v1860_v17, %v878_v6  ;;  %v880_v10 = vpop.f32.mrb[47].mxu0 }
 0x180   : > { %v1007_v9 = vadd.f32 %v1860_v17, %v1006_v7  ;;  %v1008_v11 = vpop.f32.mrb[47].mxu1  ;;  %1628 = vtanh.f32 %v1004_v3 }
 0x181   : > { %v1619_v12 = vpop.eup %1618  ;;  %1630 = vtanh.f32 %v879_v8 }
 0x182   : > { %v1621_v13 = vpop.eup %1620  ;;  %1126 = vst [vmem:[%s1873_s28 + $0xa0] sm:$0xff] %v1619_v12  ;;  %1632 = vtanh.f32 %v1007_v9 }
 0x183   : > { %v1623_v14 = vpop.eup %1622  ;;  %1158 = vst [vmem:[%s1873_s28 + $0x1a0] sm:$0xff] %v1621_v13 }
 0x184   : > { %v1625_v15 = vpop.eup %1624  ;;  %1127 = vst [vmem:[%s1873_s28 + $0xa8] sm:$0xff] %v1623_v14  ;;  %v883_v16 = vpop.f32.mrb[48].mxu0 }
 0x185   : > { %v1011_v18 = vpop.f32.mrb[48].mxu1  ;;  %1159 = vst [vmem:[%s1873_s28 + $0x1a8] sm:$0xff] %v1625_v15  ;;  %v884_v19 = vadd.f32 %v1860_v17, %v883_v16  ;;  %v885_v21 = vpop.f32.mrb[49].mxu0 }
 0x186   : > { %v1012_v20 = vadd.f32 %v1860_v17, %v1011_v18  ;;  %v1013_v22 = vpop.f32.mrb[49].mxu1  ;;  %v886_v23 = vpop.f32.mrb[50].mxu0 }
 0x187   : > { %v1014_v24 = vpop.f32.mrb[50].mxu1  ;;  %1634 = vtanh.f32 %v884_v19  ;;  %v887_v25 = vadd.f32 %v1860_v17, %v886_v23  ;;  %v888_v27 = vpop.f32.mrb[51].mxu0 }
 0x188   : > { %v1015_v26 = vadd.f32 %v1860_v17, %v1014_v24  ;;  %v1016_v28 = vpop.f32.mrb[51].mxu1  ;;  %1636 = vtanh.f32 %v1012_v20 }
 0x189   : > { %v1627_v29 = vpop.eup %1626  ;;  %1638 = vtanh.f32 %v887_v25 }
 0x18a   : > { %v1629_v30 = vpop.eup %1628  ;;  %1128 = vst [vmem:[%s1873_s28 + $0xb0] sm:$0xff] %v1627_v29  ;;  %1640 = vtanh.f32 %v1015_v26 }
 0x18b   : > { %v1631_v31 = vpop.eup %1630  ;;  %1160 = vst [vmem:[%s1873_s28 + $0x1b0] sm:$0xff] %v1629_v30 }
 0x18c   : > { %v1633_v32 = vpop.eup %1632  ;;  %1129 = vst [vmem:[%s1873_s28 + $0xb8] sm:$0xff] %v1631_v31  ;;  %v891_v33 = vpop.f32.mrb[52].mxu0 }
 0x18d   : > { %v1019_v34 = vpop.f32.mrb[52].mxu1  ;;  %1161 = vst [vmem:[%s1873_s28 + $0x1b8] sm:$0xff] %v1633_v32  ;;  %v892_v35 = vadd.f32 %v1860_v17, %v891_v33  ;;  %v893_v37 = vpop.f32.mrb[53].mxu0 }
 0x18e   : > { %v1020_v36 = vadd.f32 %v1860_v17, %v1019_v34  ;;  %v1021_v38 = vpop.f32.mrb[53].mxu1  ;;  %v894_v39 = vpop.f32.mrb[54].mxu0 }
 0x18f   : > { %v1022_v40 = vpop.f32.mrb[54].mxu1  ;;  %1642 = vtanh.f32 %v892_v35  ;;  %v895_v41 = vadd.f32 %v1860_v17, %v894_v39  ;;  %v896_v43 = vpop.f32.mrb[55].mxu0 }
 0x190   : > { %v1023_v42 = vadd.f32 %v1860_v17, %v1022_v40  ;;  %v1024_v44 = vpop.f32.mrb[55].mxu1  ;;  %1644 = vtanh.f32 %v1020_v36 }
 0x191   : > { %v1635_v45 = vpop.eup %1634  ;;  %1646 = vtanh.f32 %v895_v41 }
 0x192   : > { %v1637_v46 = vpop.eup %1636  ;;  %1130 = vst [vmem:[%s1873_s28 + $0xc0] sm:$0xff] %v1635_v45  ;;  %1648 = vtanh.f32 %v1023_v42 }
 0x193   : > { %v1639_v47 = vpop.eup %1638  ;;  %1162 = vst [vmem:[%s1873_s28 + $0x1c0] sm:$0xff] %v1637_v46 }
 0x194   : > { %v1641_v48 = vpop.eup %1640  ;;  %1131 = vst [vmem:[%s1873_s28 + $0xc8] sm:$0xff] %v1639_v47  ;;  %v899_v49 = vpop.f32.mrb[56].mxu0 }
 0x195   : > { %v1027_v50 = vpop.f32.mrb[56].mxu1  ;;  %1163 = vst [vmem:[%s1873_s28 + $0x1c8] sm:$0xff] %v1641_v48  ;;  %v900_v51 = vadd.f32 %v1860_v17, %v899_v49  ;;  %v901_v53 = vpop.f32.mrb[57].mxu0 }
 0x196   : > { %v1028_v52 = vadd.f32 %v1860_v17, %v1027_v50  ;;  %v1029_v54 = vpop.f32.mrb[57].mxu1  ;;  %v902_v55 = vpop.f32.mrb[58].mxu0 }
 0x197   : > { %v1030_v56 = vpop.f32.mrb[58].mxu1  ;;  %1650 = vtanh.f32 %v900_v51  ;;  %v903_v57 = vadd.f32 %v1860_v17, %v902_v55  ;;  %v904_v59 = vpop.f32.mrb[59].mxu0 }
 0x198   : > { %v1031_v58 = vadd.f32 %v1860_v17, %v1030_v56  ;;  %v1032_v60 = vpop.f32.mrb[59].mxu1  ;;  %1652 = vtanh.f32 %v1028_v52 }
 0x199   : > { %v1643_v61 = vpop.eup %1642  ;;  %1654 = vtanh.f32 %v903_v57 }
 0x19a   : > { %v1645_v62 = vpop.eup %1644  ;;  %1132 = vst [vmem:[%s1873_s28 + $0xd0] sm:$0xff] %v1643_v61  ;;  %1656 = vtanh.f32 %v1031_v58 }
 0x19b   : > { %v1647_v63 = vpop.eup %1646  ;;  %1164 = vst [vmem:[%s1873_s28 + $0x1d0] sm:$0xff] %v1645_v62 }
 0x19c   : > { %v1649_v0 = vpop.eup %1648  ;;  %1133 = vst [vmem:[%s1873_s28 + $0xd8] sm:$0xff] %v1647_v63  ;;  %v907_v1 = vpop.f32.mrb[60].mxu0 }
 0x19d   : > { %v1035_v2 = vpop.f32.mrb[60].mxu1  ;;  %1165 = vst [vmem:[%s1873_s28 + $0x1d8] sm:$0xff] %v1649_v0  ;;  %v908_v3 = vadd.f32 %v1860_v17, %v907_v1  ;;  %v909_v5 = vpop.f32.mrb[61].mxu0 }
 0x19e   : > { %v1036_v4 = vadd.f32 %v1860_v17, %v1035_v2  ;;  %v1037_v6 = vpop.f32.mrb[61].mxu1  ;;  %v910_v7 = vpop.f32.mrb[62].mxu0 }
 0x19f   : > { %v1038_v8 = vpop.f32.mrb[62].mxu1  ;;  %1658 = vtanh.f32 %v908_v3  ;;  %v911_v9 = vadd.f32 %v1860_v17, %v910_v7  ;;  %v912_v11 = vpop.f32.mrb[63].mxu0 }
 0x1a0   : > { %v1039_v10 = vadd.f32 %v1860_v17, %v1038_v8  ;;  %v1040_v12 = vpop.f32.mrb[63].mxu1  ;;  %1660 = vtanh.f32 %v1036_v4 }
 0x1a1   : > { %v1651_v13 = vpop.eup %1650  ;;  %1662 = vtanh.f32 %v911_v9 }
 0x1a2   : > { %v1653_v14 = vpop.eup %1652  ;;  %1134 = vst [vmem:[%s1873_s28 + $0xe0] sm:$0xff] %v1651_v13  ;;  %1664 = vtanh.f32 %v1039_v10 }
 0x1a3   : > { %v1655_v15 = vpop.eup %1654  ;;  %1166 = vst [vmem:[%s1873_s28 + $0x1e0] sm:$0xff] %v1653_v14 }
 0x1a4   : > { %v1657_v16 = vpop.eup %1656  ;;  %1135 = vst [vmem:[%s1873_s28 + $0xe8] sm:$0xff] %v1655_v15 }
 0x1a5   : > { %1167 = vst [vmem:[%s1873_s28 + $0x1e8] sm:$0xff] %v1657_v16 }
 0x1a9   : > { %v1659_v18 = vpop.eup %1658 }
 0x1aa   : > { %v1661_v19 = vpop.eup %1660  ;;  %1136 = vst [vmem:[%s1873_s28 + $0xf0] sm:$0xff] %v1659_v18 }
 0x1ab   : > { %v1663_v17 = vpop.eup %1662  ;;  %1168 = vst [vmem:[%s1873_s28 + $0x1f0] sm:$0xff] %v1661_v19 }
 0x1ac   : > { %v1665_v20 = vpop.eup %1664  ;;  %1137 = vst [vmem:[%s1873_s28 + $0xf8] sm:$0xff] %v1663_v17 }
 0x1ad   : > { %1169 = vst [vmem:[%s1873_s28 + $0x1f8] sm:$0xff] %v1665_v20 }
 0x1ae PF: > { %s13_s14 = sadd.s32 1, %s1688_s14   ;;  %s2010_s12 = smov %s1684_s13 }
 0x1af   : > { %p10_p5 = scmp.ge.s32.totalorder %s13_s14, 6   ;;  %s2011_s13 = smov %s2013_s15 }
 0x1b1   :  { %12 = sbr.rel (!%p10_p5) target bundleno = 2 (0x2), region = 65 }

</bundles_post_ra>
